<compile_context>
chip_gen: v7x
topology: tpu7x:2x2x1
jax: 0.10.0
libtpu: 0.0.40
codegen_flags: <defaults>
</compile_context>

<pallas_src>
import jax
import jax.numpy as jnp
from jax.experimental import pallas as pl
from jax.experimental.pallas import tpu as pltpu


T_TILE_MAX = 16   # timesteps per grid step (amortizes ~0.35us/step grid overhead)


# ------------------------------------------------------------------ kernels --

def lstm_recurrence_kernel(gx_ref, whh_hbm, out_ref, whh_scr, h_scr, c_scr):
    """Recurrent core of one LSTM layer.

    grid=(Tp // t_tile,), sequential ("arbitrary").
      gx_ref : (t_tile, Bp, 4H) bf16  precomputed x_t @ W_ih + (b_ih + b_hh)
      whh_hbm: (H, 4H)          bf16  hidden-to-hidden weights (HBM, memory_space=ANY)
      out_ref: (t_tile, Bp, H)  bf16  emitted hidden states
      whh_scr: (H, 4H)          bf16  single-buffered VMEM copy of W_hh
      h_scr/c_scr: (Bp, H)      f32   carried state across grid steps
    """
    H = h_scr.shape[-1]
    t_tile = gx_ref.shape[0]

    @pl.when(pl.program_id(0) == 0)
    def _():
        # One-time DMA of the constant weight block into single-buffered VMEM scratch.
        pltpu.sync_copy(whh_hbm, whh_scr)
        h_scr[...] = jnp.zeros_like(h_scr)
        c_scr[...] = jnp.zeros_like(c_scr)

    def sigmoid(z):
        # One EUP transcendental (tanh) instead of exp + divide.
        return 0.5 * (1.0 + jnp.tanh(0.5 * z))

    def step(t, carry):
        h, c = carry                                   # (Bp, H) f32, kept in vregs
        h_b = h.astype(jnp.bfloat16)
        gx_t = gx_ref[t]                               # (Bp, 4H) bf16

        def gate(k):
            # Per-gate chunk: keeps the live f32 gate footprint at (Bp, H) instead of
            # (Bp, 4H), so the fully unrolled loop does not spill vregs at large H.
            w_k = whh_scr[:, k * H:(k + 1) * H]        # (H, H) bf16
            return (gx_t[:, k * H:(k + 1) * H].astype(jnp.float32)
                    + jnp.dot(h_b, w_k, preferred_element_type=jnp.float32))

        # PyTorch gate order: [i, f, g, o]; gate math in f32.
        i_g = sigmoid(gate(0))
        f_g = sigmoid(gate(1))
        g_g = jnp.tanh(gate(2))
        o_g = sigmoid(gate(3))
        c_new = f_g * c + i_g * g_g
        h_new = o_g * jnp.tanh(c_new)
        out_ref[t] = h_new.astype(out_ref.dtype)
        return (h_new, c_new)

    h_fin, c_fin = jax.lax.fori_loop(0, t_tile, step,
                                     (h_scr[...], c_scr[...]), unroll=True)
    # Scratch is touched once per grid step (not once per timestep).
    h_scr[...] = h_fin
    c_scr[...] = c_fin


# ----------------------------------------------------------------- wrappers --

def _vmem_limit_bytes(t_tile, Bp, H):
    G = 4 * H
    resident = (2 * t_tile * Bp * G * 2      # gx tiles (bf16, double-buffered)
                + 2 * t_tile * Bp * H * 2    # out tiles (bf16, double-buffered)
                + H * G * 2                  # W_hh scratch (single copy, bf16)
                + 2 * Bp * H * 4)            # h/c scratch (f32)
    cap = 64 << 20                           # conservative default (v7x physical VMEM)
    try:
        cap = int(pltpu.get_tpu_info().vmem_capacity_bytes)
    except Exception:
        pass
    return int(min(max(resident + (4 << 20), 32 << 20), int(cap * 0.9)))


def lstm_layer_recurrence(gx, w_hh_bf16, t_tile):
    """gx: (Tp, Bp, 4H) bf16 precomputed input projection -> (Tp, Bp, H) bf16 hidden."""
    Tp, Bp, G = gx.shape
    H = w_hh_bf16.shape[0]
    assert G == 4 * H and Tp % t_tile == 0

    return pl.pallas_call(
        lstm_recurrence_kernel,
        out_shape=jax.ShapeDtypeStruct((Tp, Bp, H), jnp.bfloat16),
        grid_spec=pltpu.PrefetchScalarGridSpec(
            num_scalar_prefetch=0,
            grid=(Tp // t_tile,),
            in_specs=[
                pl.BlockSpec((t_tile, Bp, G), lambda s: (s, 0, 0)),   # streamed gates_x
                pl.BlockSpec(memory_space=pl.ANY),                    # W_hh stays in HBM
            ],
            out_specs=pl.BlockSpec((t_tile, Bp, H), lambda s: (s, 0, 0)),
            scratch_shapes=[
                pltpu.VMEM((H, G), jnp.bfloat16),   # single-buffered W_hh copy
                pltpu.VMEM((Bp, H), jnp.float32),   # h carry
                pltpu.VMEM((Bp, H), jnp.float32),   # c carry
            ],
        ),
        compiler_params=pltpu.CompilerParams(
            dimension_semantics=("arbitrary",),     # time recurrence: sequential
            vmem_limit_bytes=_vmem_limit_bytes(t_tile, Bp, H),
        ),
    )(gx, w_hh_bf16)


def lstm_model_forward(x_btf, params):
    """Matches LSTM.forward: x (B, T, input_size) -> (B, num_classes) (eval mode)."""
    B, T, _ = x_btf.shape
    Bp = ((B + 7) // 8) * 8                                   # pad batch to sublane
    t_tile = min(T_TILE_MAX, T)
    Tp = ((T + t_tile - 1) // t_tile) * t_tile                # pad T to keep t_tile full

    x = jnp.transpose(x_btf, (1, 0, 2)).astype(jnp.bfloat16)  # (T, B, I)
    if Bp != B:
        x = jnp.pad(x, ((0, 0), (0, Bp - B), (0, 0)))         # (T, Bp, I)

    for (w_ih_t, w_hh_t, bias) in params["layers"]:
        # Hoisted input projection for ALL timesteps (big bf16 MXU matmul, XLA).
        gx = (jnp.einsum("tbi,ig->tbg", x, w_ih_t,
                         preferred_element_type=jnp.float32) + bias
              ).astype(jnp.bfloat16)                          # (T, Bp, 4H) bf16
        if Tp != T:
            gx = jnp.pad(gx, ((0, Tp - T), (0, 0), (0, 0)))   # (Tp, Bp, 4H)
        h_seq = lstm_layer_recurrence(gx, w_hh_t, t_tile)     # (Tp, Bp, H) bf16
        x = h_seq[:T]                                         # drop padded timesteps

    h_last = x[-1, :B]                                        # hn of last layer: (B, H)
    # Classifier head left to XLA: (B,H)@(H,C) with C=1 is launch-overhead dominated.
    return h_last @ params["fc_w_t"] + params["fc_b"]         # (B, num_classes) f32


# ---------------------------------------------------------------- reference --

def lstm_model_reference(x_btf, params):
    """Pure-JAX reference mirroring the kernel numerics (bf16 operands / bf16 gx & h
    streaming / f32 accumulate and cell math), without Pallas or padding."""
    x = jnp.transpose(x_btf, (1, 0, 2)).astype(jnp.bfloat16)  # (T, B, I)
    for (w_ih_t, w_hh_t, bias) in params["layers"]:
        H = w_hh_t.shape[0]
        B = x.shape[1]
        gx_seq = (jnp.einsum("tbi,ig->tbg", x, w_ih_t,
                             preferred_element_type=jnp.float32) + bias
                  ).astype(jnp.bfloat16)
        h0 = jnp.zeros((B, H), jnp.float32)
        c0 = jnp.zeros((B, H), jnp.float32)

        def step(carry, gx_t, w_hh_t=w_hh_t, H=H):
            h, c = carry
            g = (gx_t.astype(jnp.float32)
                 + jnp.dot(h.astype(jnp.bfloat16), w_hh_t,
                           preferred_element_type=jnp.float32))
            i_g = jax.nn.sigmoid(g[:, 0 * H:1 * H])
            f_g = jax.nn.sigmoid(g[:, 1 * H:2 * H])
            g_g = jnp.tanh(g[:, 2 * H:3 * H])
            o_g = jax.nn.sigmoid(g[:, 3 * H:4 * H])
            c_n = f_g * c + i_g * g_g
            h_n = o_g * jnp.tanh(c_n)
            return (h_n, c_n), h_n

        (_, _), hs = jax.lax.scan(step, (h0, c0), gx_seq)
        x = hs.astype(jnp.bfloat16)                           # mirror bf16 h emission
    return x[-1] @ params["fc_w_t"] + params["fc_b"]


# --------------------------------------------------------------------- init --

def init_params(key, input_size, hidden_size, num_layers, num_classes):
    """Deterministic init mirroring PyTorch's U(-1/sqrt(H), 1/sqrt(H)).

    LSTM weights pre-transposed to (in, 4H)/(H, 4H) and stored bf16 (matmul operands);
    biases fused (b_ih + b_hh), kept f32.  FC head stays f32.
    """
    k = 1.0 / jnp.sqrt(jnp.float32(hidden_size))
    layers = []
    for l in range(num_layers):
        in_dim = input_size if l == 0 else hidden_size
        key, k1, k2, k3, k4 = jax.random.split(key, 5)
        w_ih = jax.random.uniform(k1, (4 * hidden_size, in_dim), jnp.float32, -k, k)
        w_hh = jax.random.uniform(k2, (4 * hidden_size, hidden_size), jnp.float32, -k, k)
        b_ih = jax.random.uniform(k3, (4 * hidden_size,), jnp.float32, -k, k)
        b_hh = jax.random.uniform(k4, (4 * hidden_size,), jnp.float32, -k, k)
        layers.append((w_ih.T.astype(jnp.bfloat16),
                       w_hh.T.astype(jnp.bfloat16),
                       (b_ih + b_hh)))
    key, k5, k6 = jax.random.split(key, 3)
    fc_w = jax.random.uniform(k5, (num_classes, hidden_size), jnp.float32, -k, k)
    fc_b = jax.random.uniform(k6, (num_classes,), jnp.float32, -k, k)
    return {"layers": layers, "fc_w_t": fc_w.T, "fc_b": fc_b}


# --------------------------------------------------------------------- main --

if __name__ == "__main__":
    # Small shapes consistent with the module's forward:
    # x: (batch, seq, input_size); hidden scaled down from 1024 -> 128.
    batch, seq, input_size = 2, 8, 2
    hidden_size, num_layers, num_classes = 128, 4, 1

    key = jax.random.PRNGKey(0)
    key, xk, pk = jax.random.split(key, 3)
    x = jax.random.normal(xk, (batch, seq, input_size), jnp.float32)
    params = init_params(pk, input_size, hidden_size, num_layers, num_classes)

    out = jax.block_until_ready(jax.jit(lstm_model_forward)(x, params))
    ref = jax.block_until_ready(jax.jit(lstm_model_reference)(x, params))

    assert out.shape == (batch, num_classes), out.shape
    max_err = float(jnp.max(jnp.abs(out - ref)))
    assert jnp.allclose(out, ref, atol=1e-3, rtol=1e-3), (out, ref, max_err)
    print("KERNEL_OK")
</pallas_src>

<mosaic_0001>
module attributes {stable_mosaic.version = 11 : i64} {
  func.func @lstm_recurrence_kernel(%arg0: i32, %arg1: memref<8x8x512xbf16, #tpu.memory_space<vmem>>, %arg2: memref<128x512xbf16, #tpu.memory_space<any>>, %arg3: memref<8x8x128xbf16, #tpu.memory_space<vmem>>, %arg4: memref<128x512xbf16, #tpu.memory_space<vmem>>, %arg5: memref<8x128xf32, #tpu.memory_space<vmem>>, %arg6: memref<8x128xf32, #tpu.memory_space<vmem>>) attributes {dimension_semantics = [#tpu.dimension_semantics<arbitrary>], iteration_bounds = array<i64: 1>, scalar_prefetch = 0 : i64, scratch_operands = 3 : i64, tpu.core_type = #tpu.core_type<tc>, window_params = [{transform_indices = @transform_0, window_bounds = array<i64: 8, 8, 512>}, {}, {transform_indices = @transform_2, window_bounds = array<i64: 8, 8, 128>}]} {
    %c0_i32 = arith.constant 0 : i32
    %0 = arith.cmpi eq, %arg0, %c0_i32 : i32
    %1 = arith.extui %0 : i1 to i32
    %c0_i32_0 = arith.constant 0 : i32
    %2 = arith.cmpi ne, %1, %c0_i32_0 : i32
    scf.if %2 {
      "tpu.region"() ({
        %459 = tpu.sem_alloc : memref<!tpu.dma_semaphore, #tpu.memory_space<semaphore_mem>>
        tpu.enqueue_dma source(%arg2 : memref<128x512xbf16, #tpu.memory_space<any>>) target(%arg4 : memref<128x512xbf16, #tpu.memory_space<vmem>>) target_semaphore(%459 : memref<!tpu.dma_semaphore, #tpu.memory_space<semaphore_mem>>)
        tpu.wait_dma2 semaphore(%459 : memref<!tpu.dma_semaphore, #tpu.memory_space<semaphore_mem>>) src(%arg2 : memref<128x512xbf16, #tpu.memory_space<any>>) dst(%arg4 : memref<128x512xbf16, #tpu.memory_space<vmem>>)
        tpu.yield
      }) : () -> ()
      %cst_205 = arith.constant 0.000000e+00 : f32
      %455 = vector.broadcast %cst_205 : f32 to vector<8x128xf32>
      %c0_206 = arith.constant 0 : index
      %c0_207 = arith.constant 0 : index
      %456 = vector.load %arg5[%c0_206, %c0_207] : memref<8x128xf32, #tpu.memory_space<vmem>>, vector<8x128xf32>
      tpu.vector_store %arg5[%c0_206, %c0_207], %455 {strides = array<i32>} : memref<8x128xf32, #tpu.memory_space<vmem>>, vector<8x128xf32>,
      %cst_208 = arith.constant 0.000000e+00 : f32
      %457 = vector.broadcast %cst_208 : f32 to vector<8x128xf32>
      %c0_209 = arith.constant 0 : index
      %c0_210 = arith.constant 0 : index
      %458 = vector.load %arg6[%c0_209, %c0_210] : memref<8x128xf32, #tpu.memory_space<vmem>>, vector<8x128xf32>
      tpu.vector_store %arg6[%c0_209, %c0_210], %457 {strides = array<i32>} : memref<8x128xf32, #tpu.memory_space<vmem>>, vector<8x128xf32>,
    } else {
    }
    %c0 = arith.constant 0 : index
    %c0_1 = arith.constant 0 : index
    %3 = vector.load %arg5[%c0, %c0_1] : memref<8x128xf32, #tpu.memory_space<vmem>>, vector<8x128xf32>
    %c0_2 = arith.constant 0 : index
    %c0_3 = arith.constant 0 : index
    %4 = vector.load %arg6[%c0_2, %c0_3] : memref<8x128xf32, #tpu.memory_space<vmem>>, vector<8x128xf32>
    %c0_i32_4 = arith.constant 0 : i32
    %5 = arith.truncf %3 : vector<8x128xf32> to vector<8x128xbf16>
    %6 = arith.index_cast %c0_i32_4 : i32 to index
    %c0_5 = arith.constant 0 : index
    %c0_6 = arith.constant 0 : index
    %7 = vector.load %arg1[%6, %c0_5, %c0_6] : memref<8x8x512xbf16, #tpu.memory_space<vmem>>, vector<1x8x512xbf16>
    %8 = vector.shape_cast %7 : vector<1x8x512xbf16> to vector<8x512xbf16>
    %c0_7 = arith.constant 0 : index
    %c0_8 = arith.constant 0 : index
    %9 = vector.load %arg4[%c0_7, %c0_8] : memref<128x512xbf16, #tpu.memory_space<vmem>>, vector<128x128xbf16>
    %10 = vector.extract_strided_slice %8 {offsets = [0, 0], sizes = [8, 128], strides = [1, 1]} : vector<8x512xbf16> to vector<8x128xbf16>
    %11 = arith.extf %10 : vector<8x128xbf16> to vector<8x128xf32>
    %cst = arith.constant dense<0.000000e+00> : vector<8x128xf32>
    %12 = tpu.matmul %5, %9, %cst {dimension_numbers = #tpu.dot_dimension_numbers<[1], [0], [0], [1], [0, 0, 1, 1], [], []>} : vector<8x128xbf16>, vector<128x128xbf16>, vector<8x128xf32> -> vector<8x128xf32>
    %13 = arith.addf %11, %12 : vector<8x128xf32>
    %cst_9 = arith.constant 5.000000e-01 : f32
    %14 = vector.broadcast %cst_9 : f32 to vector<8x128xf32>
    %15 = arith.mulf %14, %13 : vector<8x128xf32>
    %16 = math.tanh %15 : vector<8x128xf32>
    %cst_10 = arith.constant 1.000000e+00 : f32
    %17 = vector.broadcast %cst_10 : f32 to vector<8x128xf32>
    %18 = arith.addf %17, %16 : vector<8x128xf32>
    %cst_11 = arith.constant 5.000000e-01 : f32
    %19 = vector.broadcast %cst_11 : f32 to vector<8x128xf32>
    %20 = arith.mulf %19, %18 : vector<8x128xf32>
    %c0_12 = arith.constant 0 : index
    %c128 = arith.constant 128 : index
    %21 = vector.load %arg4[%c0_12, %c128] : memref<128x512xbf16, #tpu.memory_space<vmem>>, vector<128x128xbf16>
    %22 = vector.extract_strided_slice %8 {offsets = [0, 128], sizes = [8, 128], strides = [1, 1]} : vector<8x512xbf16> to vector<8x128xbf16>
    %23 = arith.extf %22 : vector<8x128xbf16> to vector<8x128xf32>
    %cst_13 = arith.constant dense<0.000000e+00> : vector<8x128xf32>
    %24 = tpu.matmul %5, %21, %cst_13 {dimension_numbers = #tpu.dot_dimension_numbers<[1], [0], [0], [1], [0, 0, 1, 1], [], []>} : vector<8x128xbf16>, vector<128x128xbf16>, vector<8x128xf32> -> vector<8x128xf32>
    %25 = arith.addf %23, %24 : vector<8x128xf32>
    %cst_14 = arith.constant 5.000000e-01 : f32
    %26 = vector.broadcast %cst_14 : f32 to vector<8x128xf32>
    %27 = arith.mulf %26, %25 : vector<8x128xf32>
    %28 = math.tanh %27 : vector<8x128xf32>
    %cst_15 = arith.constant 1.000000e+00 : f32
    %29 = vector.broadcast %cst_15 : f32 to vector<8x128xf32>
    %30 = arith.addf %29, %28 : vector<8x128xf32>
    %cst_16 = arith.constant 5.000000e-01 : f32
    %31 = vector.broadcast %cst_16 : f32 to vector<8x128xf32>
    %32 = arith.mulf %31, %30 : vector<8x128xf32>
    %c0_17 = arith.constant 0 : index
    %c256 = arith.constant 256 : index
    %33 = vector.load %arg4[%c0_17, %c256] : memref<128x512xbf16, #tpu.memory_space<vmem>>, vector<128x128xbf16>
    %34 = vector.extract_strided_slice %8 {offsets = [0, 256], sizes = [8, 128], strides = [1, 1]} : vector<8x512xbf16> to vector<8x128xbf16>
    %35 = arith.extf %34 : vector<8x128xbf16> to vector<8x128xf32>
    %cst_18 = arith.constant dense<0.000000e+00> : vector<8x128xf32>
    %36 = tpu.matmul %5, %33, %cst_18 {dimension_numbers = #tpu.dot_dimension_numbers<[1], [0], [0], [1], [0, 0, 1, 1], [], []>} : vector<8x128xbf16>, vector<128x128xbf16>, vector<8x128xf32> -> vector<8x128xf32>
    %37 = arith.addf %35, %36 : vector<8x128xf32>
    %38 = math.tanh %37 : vector<8x128xf32>
    %c0_19 = arith.constant 0 : index
    %c384 = arith.constant 384 : index
    %39 = vector.load %arg4[%c0_19, %c384] : memref<128x512xbf16, #tpu.memory_space<vmem>>, vector<128x128xbf16>
    %40 = vector.extract_strided_slice %8 {offsets = [0, 384], sizes = [8, 128], strides = [1, 1]} : vector<8x512xbf16> to vector<8x128xbf16>
    %41 = arith.extf %40 : vector<8x128xbf16> to vector<8x128xf32>
    %cst_20 = arith.constant dense<0.000000e+00> : vector<8x128xf32>
    %42 = tpu.matmul %5, %39, %cst_20 {dimension_numbers = #tpu.dot_dimension_numbers<[1], [0], [0], [1], [0, 0, 1, 1], [], []>} : vector<8x128xbf16>, vector<128x128xbf16>, vector<8x128xf32> -> vector<8x128xf32>
    %43 = arith.addf %41, %42 : vector<8x128xf32>
    %cst_21 = arith.constant 5.000000e-01 : f32
    %44 = vector.broadcast %cst_21 : f32 to vector<8x128xf32>
    %45 = arith.mulf %44, %43 : vector<8x128xf32>
    %46 = math.tanh %45 : vector<8x128xf32>
    %cst_22 = arith.constant 1.000000e+00 : f32
    %47 = vector.broadcast %cst_22 : f32 to vector<8x128xf32>
    %48 = arith.addf %47, %46 : vector<8x128xf32>
    %cst_23 = arith.constant 5.000000e-01 : f32
    %49 = vector.broadcast %cst_23 : f32 to vector<8x128xf32>
    %50 = arith.mulf %49, %48 : vector<8x128xf32>
    %51 = arith.mulf %32, %4 : vector<8x128xf32>
    %52 = arith.mulf %20, %38 : vector<8x128xf32>
    %53 = arith.addf %51, %52 : vector<8x128xf32>
    %54 = math.tanh %53 : vector<8x128xf32>
    %55 = arith.mulf %50, %54 : vector<8x128xf32>
    %56 = arith.truncf %55 : vector<8x128xf32> to vector<8x128xbf16>
    %57 = arith.index_cast %c0_i32_4 : i32 to index
    %c0_24 = arith.constant 0 : index
    %c0_25 = arith.constant 0 : index
    %58 = vector.load %arg3[%57, %c0_24, %c0_25] : memref<8x8x128xbf16, #tpu.memory_space<vmem>>, vector<1x8x128xbf16>
    %59 = vector.shape_cast %58 : vector<1x8x128xbf16> to vector<8x128xbf16>
    %60 = vector.shape_cast %56 : vector<8x128xbf16> to vector<1x8x128xbf16>
    tpu.vector_store %arg3[%57, %c0_24, %c0_25], %60 {strides = array<i32>} : memref<8x8x128xbf16, #tpu.memory_space<vmem>>, vector<1x8x128xbf16>,
    %c1_i32 = arith.constant 1 : i32
    %61 = arith.truncf %55 : vector<8x128xf32> to vector<8x128xbf16>
    %62 = arith.index_cast %c1_i32 : i32 to index
    %c0_26 = arith.constant 0 : index
    %c0_27 = arith.constant 0 : index
    %63 = vector.load %arg1[%62, %c0_26, %c0_27] : memref<8x8x512xbf16, #tpu.memory_space<vmem>>, vector<1x8x512xbf16>
    %64 = vector.shape_cast %63 : vector<1x8x512xbf16> to vector<8x512xbf16>
    %c0_28 = arith.constant 0 : index
    %c0_29 = arith.constant 0 : index
    %65 = vector.load %arg4[%c0_28, %c0_29] : memref<128x512xbf16, #tpu.memory_space<vmem>>, vector<128x128xbf16>
    %66 = vector.extract_strided_slice %64 {offsets = [0, 0], sizes = [8, 128], strides = [1, 1]} : vector<8x512xbf16> to vector<8x128xbf16>
    %67 = arith.extf %66 : vector<8x128xbf16> to vector<8x128xf32>
    %cst_30 = arith.constant dense<0.000000e+00> : vector<8x128xf32>
    %68 = tpu.matmul %61, %65, %cst_30 {dimension_numbers = #tpu.dot_dimension_numbers<[1], [0], [0], [1], [0, 0, 1, 1], [], []>} : vector<8x128xbf16>, vector<128x128xbf16>, vector<8x128xf32> -> vector<8x128xf32>
    %69 = arith.addf %67, %68 : vector<8x128xf32>
    %cst_31 = arith.constant 5.000000e-01 : f32
    %70 = vector.broadcast %cst_31 : f32 to vector<8x128xf32>
    %71 = arith.mulf %70, %69 : vector<8x128xf32>
    %72 = math.tanh %71 : vector<8x128xf32>
    %cst_32 = arith.constant 1.000000e+00 : f32
    %73 = vector.broadcast %cst_32 : f32 to vector<8x128xf32>
    %74 = arith.addf %73, %72 : vector<8x128xf32>
    %cst_33 = arith.constant 5.000000e-01 : f32
    %75 = vector.broadcast %cst_33 : f32 to vector<8x128xf32>
    %76 = arith.mulf %75, %74 : vector<8x128xf32>
    %c0_34 = arith.constant 0 : index
    %c128_35 = arith.constant 128 : index
    %77 = vector.load %arg4[%c0_34, %c128_35] : memref<128x512xbf16, #tpu.memory_space<vmem>>, vector<128x128xbf16>
    %78 = vector.extract_strided_slice %64 {offsets = [0, 128], sizes = [8, 128], strides = [1, 1]} : vector<8x512xbf16> to vector<8x128xbf16>
    %79 = arith.extf %78 : vector<8x128xbf16> to vector<8x128xf32>
    %cst_36 = arith.constant dense<0.000000e+00> : vector<8x128xf32>
    %80 = tpu.matmul %61, %77, %cst_36 {dimension_numbers = #tpu.dot_dimension_numbers<[1], [0], [0], [1], [0, 0, 1, 1], [], []>} : vector<8x128xbf16>, vector<128x128xbf16>, vector<8x128xf32> -> vector<8x128xf32>
    %81 = arith.addf %79, %80 : vector<8x128xf32>
    %cst_37 = arith.constant 5.000000e-01 : f32
    %82 = vector.broadcast %cst_37 : f32 to vector<8x128xf32>
    %83 = arith.mulf %82, %81 : vector<8x128xf32>
    %84 = math.tanh %83 : vector<8x128xf32>
    %cst_38 = arith.constant 1.000000e+00 : f32
    %85 = vector.broadcast %cst_38 : f32 to vector<8x128xf32>
    %86 = arith.addf %85, %84 : vector<8x128xf32>
    %cst_39 = arith.constant 5.000000e-01 : f32
    %87 = vector.broadcast %cst_39 : f32 to vector<8x128xf32>
    %88 = arith.mulf %87, %86 : vector<8x128xf32>
    %c0_40 = arith.constant 0 : index
    %c256_41 = arith.constant 256 : index
    %89 = vector.load %arg4[%c0_40, %c256_41] : memref<128x512xbf16, #tpu.memory_space<vmem>>, vector<128x128xbf16>
    %90 = vector.extract_strided_slice %64 {offsets = [0, 256], sizes = [8, 128], strides = [1, 1]} : vector<8x512xbf16> to vector<8x128xbf16>
    %91 = arith.extf %90 : vector<8x128xbf16> to vector<8x128xf32>
    %cst_42 = arith.constant dense<0.000000e+00> : vector<8x128xf32>
    %92 = tpu.matmul %61, %89, %cst_42 {dimension_numbers = #tpu.dot_dimension_numbers<[1], [0], [0], [1], [0, 0, 1, 1], [], []>} : vector<8x128xbf16>, vector<128x128xbf16>, vector<8x128xf32> -> vector<8x128xf32>
    %93 = arith.addf %91, %92 : vector<8x128xf32>
    %94 = math.tanh %93 : vector<8x128xf32>
    %c0_43 = arith.constant 0 : index
    %c384_44 = arith.constant 384 : index
    %95 = vector.load %arg4[%c0_43, %c384_44] : memref<128x512xbf16, #tpu.memory_space<vmem>>, vector<128x128xbf16>
    %96 = vector.extract_strided_slice %64 {offsets = [0, 384], sizes = [8, 128], strides = [1, 1]} : vector<8x512xbf16> to vector<8x128xbf16>
    %97 = arith.extf %96 : vector<8x128xbf16> to vector<8x128xf32>
    %cst_45 = arith.constant dense<0.000000e+00> : vector<8x128xf32>
    %98 = tpu.matmul %61, %95, %cst_45 {dimension_numbers = #tpu.dot_dimension_numbers<[1], [0], [0], [1], [0, 0, 1, 1], [], []>} : vector<8x128xbf16>, vector<128x128xbf16>, vector<8x128xf32> -> vector<8x128xf32>
    %99 = arith.addf %97, %98 : vector<8x128xf32>
    %cst_46 = arith.constant 5.000000e-01 : f32
    %100 = vector.broadcast %cst_46 : f32 to vector<8x128xf32>
    %101 = arith.mulf %100, %99 : vector<8x128xf32>
    %102 = math.tanh %101 : vector<8x128xf32>
    %cst_47 = arith.constant 1.000000e+00 : f32
    %103 = vector.broadcast %cst_47 : f32 to vector<8x128xf32>
    %104 = arith.addf %103, %102 : vector<8x128xf32>
    %cst_48 = arith.constant 5.000000e-01 : f32
    %105 = vector.broadcast %cst_48 : f32 to vector<8x128xf32>
    %106 = arith.mulf %105, %104 : vector<8x128xf32>
    %107 = arith.mulf %88, %53 : vector<8x128xf32>
    %108 = arith.mulf %76, %94 : vector<8x128xf32>
    %109 = arith.addf %107, %108 : vector<8x128xf32>
    %110 = math.tanh %109 : vector<8x128xf32>
    %111 = arith.mulf %106, %110 : vector<8x128xf32>
    %112 = arith.truncf %111 : vector<8x128xf32> to vector<8x128xbf16>
    %113 = arith.index_cast %c1_i32 : i32 to index
    %c0_49 = arith.constant 0 : index
    %c0_50 = arith.constant 0 : index
    %114 = vector.load %arg3[%113, %c0_49, %c0_50] : memref<8x8x128xbf16, #tpu.memory_space<vmem>>, vector<1x8x128xbf16>
    %115 = vector.shape_cast %114 : vector<1x8x128xbf16> to vector<8x128xbf16>
    %116 = vector.shape_cast %112 : vector<8x128xbf16> to vector<1x8x128xbf16>
    tpu.vector_store %arg3[%113, %c0_49, %c0_50], %116 {strides = array<i32>} : memref<8x8x128xbf16, #tpu.memory_space<vmem>>, vector<1x8x128xbf16>,
    %c2_i32 = arith.constant 2 : i32
    %117 = arith.truncf %111 : vector<8x128xf32> to vector<8x128xbf16>
    %118 = arith.index_cast %c2_i32 : i32 to index
    %c0_51 = arith.constant 0 : index
    %c0_52 = arith.constant 0 : index
    %119 = vector.load %arg1[%118, %c0_51, %c0_52] : memref<8x8x512xbf16, #tpu.memory_space<vmem>>, vector<1x8x512xbf16>
    %120 = vector.shape_cast %119 : vector<1x8x512xbf16> to vector<8x512xbf16>
    %c0_53 = arith.constant 0 : index
    %c0_54 = arith.constant 0 : index
    %121 = vector.load %arg4[%c0_53, %c0_54] : memref<128x512xbf16, #tpu.memory_space<vmem>>, vector<128x128xbf16>
    %122 = vector.extract_strided_slice %120 {offsets = [0, 0], sizes = [8, 128], strides = [1, 1]} : vector<8x512xbf16> to vector<8x128xbf16>
    %123 = arith.extf %122 : vector<8x128xbf16> to vector<8x128xf32>
    %cst_55 = arith.constant dense<0.000000e+00> : vector<8x128xf32>
    %124 = tpu.matmul %117, %121, %cst_55 {dimension_numbers = #tpu.dot_dimension_numbers<[1], [0], [0], [1], [0, 0, 1, 1], [], []>} : vector<8x128xbf16>, vector<128x128xbf16>, vector<8x128xf32> -> vector<8x128xf32>
    %125 = arith.addf %123, %124 : vector<8x128xf32>
    %cst_56 = arith.constant 5.000000e-01 : f32
    %126 = vector.broadcast %cst_56 : f32 to vector<8x128xf32>
    %127 = arith.mulf %126, %125 : vector<8x128xf32>
    %128 = math.tanh %127 : vector<8x128xf32>
    %cst_57 = arith.constant 1.000000e+00 : f32
    %129 = vector.broadcast %cst_57 : f32 to vector<8x128xf32>
    %130 = arith.addf %129, %128 : vector<8x128xf32>
    %cst_58 = arith.constant 5.000000e-01 : f32
    %131 = vector.broadcast %cst_58 : f32 to vector<8x128xf32>
    %132 = arith.mulf %131, %130 : vector<8x128xf32>
    %c0_59 = arith.constant 0 : index
    %c128_60 = arith.constant 128 : index
    %133 = vector.load %arg4[%c0_59, %c128_60] : memref<128x512xbf16, #tpu.memory_space<vmem>>, vector<128x128xbf16>
    %134 = vector.extract_strided_slice %120 {offsets = [0, 128], sizes = [8, 128], strides = [1, 1]} : vector<8x512xbf16> to vector<8x128xbf16>
    %135 = arith.extf %134 : vector<8x128xbf16> to vector<8x128xf32>
    %cst_61 = arith.constant dense<0.000000e+00> : vector<8x128xf32>
    %136 = tpu.matmul %117, %133, %cst_61 {dimension_numbers = #tpu.dot_dimension_numbers<[1], [0], [0], [1], [0, 0, 1, 1], [], []>} : vector<8x128xbf16>, vector<128x128xbf16>, vector<8x128xf32> -> vector<8x128xf32>
    %137 = arith.addf %135, %136 : vector<8x128xf32>
    %cst_62 = arith.constant 5.000000e-01 : f32
    %138 = vector.broadcast %cst_62 : f32 to vector<8x128xf32>
    %139 = arith.mulf %138, %137 : vector<8x128xf32>
    %140 = math.tanh %139 : vector<8x128xf32>
    %cst_63 = arith.constant 1.000000e+00 : f32
    %141 = vector.broadcast %cst_63 : f32 to vector<8x128xf32>
    %142 = arith.addf %141, %140 : vector<8x128xf32>
    %cst_64 = arith.constant 5.000000e-01 : f32
    %143 = vector.broadcast %cst_64 : f32 to vector<8x128xf32>
    %144 = arith.mulf %143, %142 : vector<8x128xf32>
    %c0_65 = arith.constant 0 : index
    %c256_66 = arith.constant 256 : index
    %145 = vector.load %arg4[%c0_65, %c256_66] : memref<128x512xbf16, #tpu.memory_space<vmem>>, vector<128x128xbf16>
    %146 = vector.extract_strided_slice %120 {offsets = [0, 256], sizes = [8, 128], strides = [1, 1]} : vector<8x512xbf16> to vector<8x128xbf16>
    %147 = arith.extf %146 : vector<8x128xbf16> to vector<8x128xf32>
    %cst_67 = arith.constant dense<0.000000e+00> : vector<8x128xf32>
    %148 = tpu.matmul %117, %145, %cst_67 {dimension_numbers = #tpu.dot_dimension_numbers<[1], [0], [0], [1], [0, 0, 1, 1], [], []>} : vector<8x128xbf16>, vector<128x128xbf16>, vector<8x128xf32> -> vector<8x128xf32>
    %149 = arith.addf %147, %148 : vector<8x128xf32>
    %150 = math.tanh %149 : vector<8x128xf32>
    %c0_68 = arith.constant 0 : index
    %c384_69 = arith.constant 384 : index
    %151 = vector.load %arg4[%c0_68, %c384_69] : memref<128x512xbf16, #tpu.memory_space<vmem>>, vector<128x128xbf16>
    %152 = vector.extract_strided_slice %120 {offsets = [0, 384], sizes = [8, 128], strides = [1, 1]} : vector<8x512xbf16> to vector<8x128xbf16>
    %153 = arith.extf %152 : vector<8x128xbf16> to vector<8x128xf32>
    %cst_70 = arith.constant dense<0.000000e+00> : vector<8x128xf32>
    %154 = tpu.matmul %117, %151, %cst_70 {dimension_numbers = #tpu.dot_dimension_numbers<[1], [0], [0], [1], [0, 0, 1, 1], [], []>} : vector<8x128xbf16>, vector<128x128xbf16>, vector<8x128xf32> -> vector<8x128xf32>
    %155 = arith.addf %153, %154 : vector<8x128xf32>
    %cst_71 = arith.constant 5.000000e-01 : f32
    %156 = vector.broadcast %cst_71 : f32 to vector<8x128xf32>
    %157 = arith.mulf %156, %155 : vector<8x128xf32>
    %158 = math.tanh %157 : vector<8x128xf32>
    %cst_72 = arith.constant 1.000000e+00 : f32
    %159 = vector.broadcast %cst_72 : f32 to vector<8x128xf32>
    %160 = arith.addf %159, %158 : vector<8x128xf32>
    %cst_73 = arith.constant 5.000000e-01 : f32
    %161 = vector.broadcast %cst_73 : f32 to vector<8x128xf32>
    %162 = arith.mulf %161, %160 : vector<8x128xf32>
    %163 = arith.mulf %144, %109 : vector<8x128xf32>
    %164 = arith.mulf %132, %150 : vector<8x128xf32>
    %165 = arith.addf %163, %164 : vector<8x128xf32>
    %166 = math.tanh %165 : vector<8x128xf32>
    %167 = arith.mulf %162, %166 : vector<8x128xf32>
    %168 = arith.truncf %167 : vector<8x128xf32> to vector<8x128xbf16>
    %169 = arith.index_cast %c2_i32 : i32 to index
    %c0_74 = arith.constant 0 : index
    %c0_75 = arith.constant 0 : index
    %170 = vector.load %arg3[%169, %c0_74, %c0_75] : memref<8x8x128xbf16, #tpu.memory_space<vmem>>, vector<1x8x128xbf16>
    %171 = vector.shape_cast %170 : vector<1x8x128xbf16> to vector<8x128xbf16>
    %172 = vector.shape_cast %168 : vector<8x128xbf16> to vector<1x8x128xbf16>
    tpu.vector_store %arg3[%169, %c0_74, %c0_75], %172 {strides = array<i32>} : memref<8x8x128xbf16, #tpu.memory_space<vmem>>, vector<1x8x128xbf16>,
    %c3_i32 = arith.constant 3 : i32
    %173 = arith.truncf %167 : vector<8x128xf32> to vector<8x128xbf16>
    %174 = arith.index_cast %c3_i32 : i32 to index
    %c0_76 = arith.constant 0 : index
    %c0_77 = arith.constant 0 : index
    %175 = vector.load %arg1[%174, %c0_76, %c0_77] : memref<8x8x512xbf16, #tpu.memory_space<vmem>>, vector<1x8x512xbf16>
    %176 = vector.shape_cast %175 : vector<1x8x512xbf16> to vector<8x512xbf16>
    %c0_78 = arith.constant 0 : index
    %c0_79 = arith.constant 0 : index
    %177 = vector.load %arg4[%c0_78, %c0_79] : memref<128x512xbf16, #tpu.memory_space<vmem>>, vector<128x128xbf16>
    %178 = vector.extract_strided_slice %176 {offsets = [0, 0], sizes = [8, 128], strides = [1, 1]} : vector<8x512xbf16> to vector<8x128xbf16>
    %179 = arith.extf %178 : vector<8x128xbf16> to vector<8x128xf32>
    %cst_80 = arith.constant dense<0.000000e+00> : vector<8x128xf32>
    %180 = tpu.matmul %173, %177, %cst_80 {dimension_numbers = #tpu.dot_dimension_numbers<[1], [0], [0], [1], [0, 0, 1, 1], [], []>} : vector<8x128xbf16>, vector<128x128xbf16>, vector<8x128xf32> -> vector<8x128xf32>
    %181 = arith.addf %179, %180 : vector<8x128xf32>
    %cst_81 = arith.constant 5.000000e-01 : f32
    %182 = vector.broadcast %cst_81 : f32 to vector<8x128xf32>
    %183 = arith.mulf %182, %181 : vector<8x128xf32>
    %184 = math.tanh %183 : vector<8x128xf32>
    %cst_82 = arith.constant 1.000000e+00 : f32
    %185 = vector.broadcast %cst_82 : f32 to vector<8x128xf32>
    %186 = arith.addf %185, %184 : vector<8x128xf32>
    %cst_83 = arith.constant 5.000000e-01 : f32
    %187 = vector.broadcast %cst_83 : f32 to vector<8x128xf32>
    %188 = arith.mulf %187, %186 : vector<8x128xf32>
    %c0_84 = arith.constant 0 : index
    %c128_85 = arith.constant 128 : index
    %189 = vector.load %arg4[%c0_84, %c128_85] : memref<128x512xbf16, #tpu.memory_space<vmem>>, vector<128x128xbf16>
    %190 = vector.extract_strided_slice %176 {offsets = [0, 128], sizes = [8, 128], strides = [1, 1]} : vector<8x512xbf16> to vector<8x128xbf16>
    %191 = arith.extf %190 : vector<8x128xbf16> to vector<8x128xf32>
    %cst_86 = arith.constant dense<0.000000e+00> : vector<8x128xf32>
    %192 = tpu.matmul %173, %189, %cst_86 {dimension_numbers = #tpu.dot_dimension_numbers<[1], [0], [0], [1], [0, 0, 1, 1], [], []>} : vector<8x128xbf16>, vector<128x128xbf16>, vector<8x128xf32> -> vector<8x128xf32>
    %193 = arith.addf %191, %192 : vector<8x128xf32>
    %cst_87 = arith.constant 5.000000e-01 : f32
    %194 = vector.broadcast %cst_87 : f32 to vector<8x128xf32>
    %195 = arith.mulf %194, %193 : vector<8x128xf32>
    %196 = math.tanh %195 : vector<8x128xf32>
    %cst_88 = arith.constant 1.000000e+00 : f32
    %197 = vector.broadcast %cst_88 : f32 to vector<8x128xf32>
    %198 = arith.addf %197, %196 : vector<8x128xf32>
    %cst_89 = arith.constant 5.000000e-01 : f32
    %199 = vector.broadcast %cst_89 : f32 to vector<8x128xf32>
    %200 = arith.mulf %199, %198 : vector<8x128xf32>
    %c0_90 = arith.constant 0 : index
    %c256_91 = arith.constant 256 : index
    %201 = vector.load %arg4[%c0_90, %c256_91] : memref<128x512xbf16, #tpu.memory_space<vmem>>, vector<128x128xbf16>
    %202 = vector.extract_strided_slice %176 {offsets = [0, 256], sizes = [8, 128], strides = [1, 1]} : vector<8x512xbf16> to vector<8x128xbf16>
    %203 = arith.extf %202 : vector<8x128xbf16> to vector<8x128xf32>
    %cst_92 = arith.constant dense<0.000000e+00> : vector<8x128xf32>
    %204 = tpu.matmul %173, %201, %cst_92 {dimension_numbers = #tpu.dot_dimension_numbers<[1], [0], [0], [1], [0, 0, 1, 1], [], []>} : vector<8x128xbf16>, vector<128x128xbf16>, vector<8x128xf32> -> vector<8x128xf32>
    %205 = arith.addf %203, %204 : vector<8x128xf32>
    %206 = math.tanh %205 : vector<8x128xf32>
    %c0_93 = arith.constant 0 : index
    %c384_94 = arith.constant 384 : index
    %207 = vector.load %arg4[%c0_93, %c384_94] : memref<128x512xbf16, #tpu.memory_space<vmem>>, vector<128x128xbf16>
    %208 = vector.extract_strided_slice %176 {offsets = [0, 384], sizes = [8, 128], strides = [1, 1]} : vector<8x512xbf16> to vector<8x128xbf16>
    %209 = arith.extf %208 : vector<8x128xbf16> to vector<8x128xf32>
    %cst_95 = arith.constant dense<0.000000e+00> : vector<8x128xf32>
    %210 = tpu.matmul %173, %207, %cst_95 {dimension_numbers = #tpu.dot_dimension_numbers<[1], [0], [0], [1], [0, 0, 1, 1], [], []>} : vector<8x128xbf16>, vector<128x128xbf16>, vector<8x128xf32> -> vector<8x128xf32>
    %211 = arith.addf %209, %210 : vector<8x128xf32>
    %cst_96 = arith.constant 5.000000e-01 : f32
    %212 = vector.broadcast %cst_96 : f32 to vector<8x128xf32>
    %213 = arith.mulf %212, %211 : vector<8x128xf32>
    %214 = math.tanh %213 : vector<8x128xf32>
    %cst_97 = arith.constant 1.000000e+00 : f32
    %215 = vector.broadcast %cst_97 : f32 to vector<8x128xf32>
    %216 = arith.addf %215, %214 : vector<8x128xf32>
    %cst_98 = arith.constant 5.000000e-01 : f32
    %217 = vector.broadcast %cst_98 : f32 to vector<8x128xf32>
    %218 = arith.mulf %217, %216 : vector<8x128xf32>
    %219 = arith.mulf %200, %165 : vector<8x128xf32>
    %220 = arith.mulf %188, %206 : vector<8x128xf32>
    %221 = arith.addf %219, %220 : vector<8x128xf32>
    %222 = math.tanh %221 : vector<8x128xf32>
    %223 = arith.mulf %218, %222 : vector<8x128xf32>
    %224 = arith.truncf %223 : vector<8x128xf32> to vector<8x128xbf16>
    %225 = arith.index_cast %c3_i32 : i32 to index
    %c0_99 = arith.constant 0 : index
    %c0_100 = arith.constant 0 : index
    %226 = vector.load %arg3[%225, %c0_99, %c0_100] : memref<8x8x128xbf16, #tpu.memory_space<vmem>>, vector<1x8x128xbf16>
    %227 = vector.shape_cast %226 : vector<1x8x128xbf16> to vector<8x128xbf16>
    %228 = vector.shape_cast %224 : vector<8x128xbf16> to vector<1x8x128xbf16>
    tpu.vector_store %arg3[%225, %c0_99, %c0_100], %228 {strides = array<i32>} : memref<8x8x128xbf16, #tpu.memory_space<vmem>>, vector<1x8x128xbf16>,
    %c4_i32 = arith.constant 4 : i32
    %229 = arith.truncf %223 : vector<8x128xf32> to vector<8x128xbf16>
    %230 = arith.index_cast %c4_i32 : i32 to index
    %c0_101 = arith.constant 0 : index
    %c0_102 = arith.constant 0 : index
    %231 = vector.load %arg1[%230, %c0_101, %c0_102] : memref<8x8x512xbf16, #tpu.memory_space<vmem>>, vector<1x8x512xbf16>
    %232 = vector.shape_cast %231 : vector<1x8x512xbf16> to vector<8x512xbf16>
    %c0_103 = arith.constant 0 : index
    %c0_104 = arith.constant 0 : index
    %233 = vector.load %arg4[%c0_103, %c0_104] : memref<128x512xbf16, #tpu.memory_space<vmem>>, vector<128x128xbf16>
    %234 = vector.extract_strided_slice %232 {offsets = [0, 0], sizes = [8, 128], strides = [1, 1]} : vector<8x512xbf16> to vector<8x128xbf16>
    %235 = arith.extf %234 : vector<8x128xbf16> to vector<8x128xf32>
    %cst_105 = arith.constant dense<0.000000e+00> : vector<8x128xf32>
    %236 = tpu.matmul %229, %233, %cst_105 {dimension_numbers = #tpu.dot_dimension_numbers<[1], [0], [0], [1], [0, 0, 1, 1], [], []>} : vector<8x128xbf16>, vector<128x128xbf16>, vector<8x128xf32> -> vector<8x128xf32>
    %237 = arith.addf %235, %236 : vector<8x128xf32>
    %cst_106 = arith.constant 5.000000e-01 : f32
    %238 = vector.broadcast %cst_106 : f32 to vector<8x128xf32>
    %239 = arith.mulf %238, %237 : vector<8x128xf32>
    %240 = math.tanh %239 : vector<8x128xf32>
    %cst_107 = arith.constant 1.000000e+00 : f32
    %241 = vector.broadcast %cst_107 : f32 to vector<8x128xf32>
    %242 = arith.addf %241, %240 : vector<8x128xf32>
    %cst_108 = arith.constant 5.000000e-01 : f32
    %243 = vector.broadcast %cst_108 : f32 to vector<8x128xf32>
    %244 = arith.mulf %243, %242 : vector<8x128xf32>
    %c0_109 = arith.constant 0 : index
    %c128_110 = arith.constant 128 : index
    %245 = vector.load %arg4[%c0_109, %c128_110] : memref<128x512xbf16, #tpu.memory_space<vmem>>, vector<128x128xbf16>
    %246 = vector.extract_strided_slice %232 {offsets = [0, 128], sizes = [8, 128], strides = [1, 1]} : vector<8x512xbf16> to vector<8x128xbf16>
    %247 = arith.extf %246 : vector<8x128xbf16> to vector<8x128xf32>
    %cst_111 = arith.constant dense<0.000000e+00> : vector<8x128xf32>
    %248 = tpu.matmul %229, %245, %cst_111 {dimension_numbers = #tpu.dot_dimension_numbers<[1], [0], [0], [1], [0, 0, 1, 1], [], []>} : vector<8x128xbf16>, vector<128x128xbf16>, vector<8x128xf32> -> vector<8x128xf32>
    %249 = arith.addf %247, %248 : vector<8x128xf32>
    %cst_112 = arith.constant 5.000000e-01 : f32
    %250 = vector.broadcast %cst_112 : f32 to vector<8x128xf32>
    %251 = arith.mulf %250, %249 : vector<8x128xf32>
    %252 = math.tanh %251 : vector<8x128xf32>
    %cst_113 = arith.constant 1.000000e+00 : f32
    %253 = vector.broadcast %cst_113 : f32 to vector<8x128xf32>
    %254 = arith.addf %253, %252 : vector<8x128xf32>
    %cst_114 = arith.constant 5.000000e-01 : f32
    %255 = vector.broadcast %cst_114 : f32 to vector<8x128xf32>
    %256 = arith.mulf %255, %254 : vector<8x128xf32>
    %c0_115 = arith.constant 0 : index
    %c256_116 = arith.constant 256 : index
    %257 = vector.load %arg4[%c0_115, %c256_116] : memref<128x512xbf16, #tpu.memory_space<vmem>>, vector<128x128xbf16>
    %258 = vector.extract_strided_slice %232 {offsets = [0, 256], sizes = [8, 128], strides = [1, 1]} : vector<8x512xbf16> to vector<8x128xbf16>
    %259 = arith.extf %258 : vector<8x128xbf16> to vector<8x128xf32>
    %cst_117 = arith.constant dense<0.000000e+00> : vector<8x128xf32>
    %260 = tpu.matmul %229, %257, %cst_117 {dimension_numbers = #tpu.dot_dimension_numbers<[1], [0], [0], [1], [0, 0, 1, 1], [], []>} : vector<8x128xbf16>, vector<128x128xbf16>, vector<8x128xf32> -> vector<8x128xf32>
    %261 = arith.addf %259, %260 : vector<8x128xf32>
    %262 = math.tanh %261 : vector<8x128xf32>
    %c0_118 = arith.constant 0 : index
    %c384_119 = arith.constant 384 : index
    %263 = vector.load %arg4[%c0_118, %c384_119] : memref<128x512xbf16, #tpu.memory_space<vmem>>, vector<128x128xbf16>
    %264 = vector.extract_strided_slice %232 {offsets = [0, 384], sizes = [8, 128], strides = [1, 1]} : vector<8x512xbf16> to vector<8x128xbf16>
    %265 = arith.extf %264 : vector<8x128xbf16> to vector<8x128xf32>
    %cst_120 = arith.constant dense<0.000000e+00> : vector<8x128xf32>
    %266 = tpu.matmul %229, %263, %cst_120 {dimension_numbers = #tpu.dot_dimension_numbers<[1], [0], [0], [1], [0, 0, 1, 1], [], []>} : vector<8x128xbf16>, vector<128x128xbf16>, vector<8x128xf32> -> vector<8x128xf32>
    %267 = arith.addf %265, %266 : vector<8x128xf32>
    %cst_121 = arith.constant 5.000000e-01 : f32
    %268 = vector.broadcast %cst_121 : f32 to vector<8x128xf32>
    %269 = arith.mulf %268, %267 : vector<8x128xf32>
    %270 = math.tanh %269 : vector<8x128xf32>
    %cst_122 = arith.constant 1.000000e+00 : f32
    %271 = vector.broadcast %cst_122 : f32 to vector<8x128xf32>
    %272 = arith.addf %271, %270 : vector<8x128xf32>
    %cst_123 = arith.constant 5.000000e-01 : f32
    %273 = vector.broadcast %cst_123 : f32 to vector<8x128xf32>
    %274 = arith.mulf %273, %272 : vector<8x128xf32>
    %275 = arith.mulf %256, %221 : vector<8x128xf32>
    %276 = arith.mulf %244, %262 : vector<8x128xf32>
    %277 = arith.addf %275, %276 : vector<8x128xf32>
    %278 = math.tanh %277 : vector<8x128xf32>
    %279 = arith.mulf %274, %278 : vector<8x128xf32>
    %280 = arith.truncf %279 : vector<8x128xf32> to vector<8x128xbf16>
    %281 = arith.index_cast %c4_i32 : i32 to index
    %c0_124 = arith.constant 0 : index
    %c0_125 = arith.constant 0 : index
    %282 = vector.load %arg3[%281, %c0_124, %c0_125] : memref<8x8x128xbf16, #tpu.memory_space<vmem>>, vector<1x8x128xbf16>
    %283 = vector.shape_cast %282 : vector<1x8x128xbf16> to vector<8x128xbf16>
    %284 = vector.shape_cast %280 : vector<8x128xbf16> to vector<1x8x128xbf16>
    tpu.vector_store %arg3[%281, %c0_124, %c0_125], %284 {strides = array<i32>} : memref<8x8x128xbf16, #tpu.memory_space<vmem>>, vector<1x8x128xbf16>,
    %c5_i32 = arith.constant 5 : i32
    %285 = arith.truncf %279 : vector<8x128xf32> to vector<8x128xbf16>
    %286 = arith.index_cast %c5_i32 : i32 to index
    %c0_126 = arith.constant 0 : index
    %c0_127 = arith.constant 0 : index
    %287 = vector.load %arg1[%286, %c0_126, %c0_127] : memref<8x8x512xbf16, #tpu.memory_space<vmem>>, vector<1x8x512xbf16>
    %288 = vector.shape_cast %287 : vector<1x8x512xbf16> to vector<8x512xbf16>
    %c0_128 = arith.constant 0 : index
    %c0_129 = arith.constant 0 : index
    %289 = vector.load %arg4[%c0_128, %c0_129] : memref<128x512xbf16, #tpu.memory_space<vmem>>, vector<128x128xbf16>
    %290 = vector.extract_strided_slice %288 {offsets = [0, 0], sizes = [8, 128], strides = [1, 1]} : vector<8x512xbf16> to vector<8x128xbf16>
    %291 = arith.extf %290 : vector<8x128xbf16> to vector<8x128xf32>
    %cst_130 = arith.constant dense<0.000000e+00> : vector<8x128xf32>
    %292 = tpu.matmul %285, %289, %cst_130 {dimension_numbers = #tpu.dot_dimension_numbers<[1], [0], [0], [1], [0, 0, 1, 1], [], []>} : vector<8x128xbf16>, vector<128x128xbf16>, vector<8x128xf32> -> vector<8x128xf32>
    %293 = arith.addf %291, %292 : vector<8x128xf32>
    %cst_131 = arith.constant 5.000000e-01 : f32
    %294 = vector.broadcast %cst_131 : f32 to vector<8x128xf32>
    %295 = arith.mulf %294, %293 : vector<8x128xf32>
    %296 = math.tanh %295 : vector<8x128xf32>
    %cst_132 = arith.constant 1.000000e+00 : f32
    %297 = vector.broadcast %cst_132 : f32 to vector<8x128xf32>
    %298 = arith.addf %297, %296 : vector<8x128xf32>
    %cst_133 = arith.constant 5.000000e-01 : f32
    %299 = vector.broadcast %cst_133 : f32 to vector<8x128xf32>
    %300 = arith.mulf %299, %298 : vector<8x128xf32>
    %c0_134 = arith.constant 0 : index
    %c128_135 = arith.constant 128 : index
    %301 = vector.load %arg4[%c0_134, %c128_135] : memref<128x512xbf16, #tpu.memory_space<vmem>>, vector<128x128xbf16>
    %302 = vector.extract_strided_slice %288 {offsets = [0, 128], sizes = [8, 128], strides = [1, 1]} : vector<8x512xbf16> to vector<8x128xbf16>
    %303 = arith.extf %302 : vector<8x128xbf16> to vector<8x128xf32>
    %cst_136 = arith.constant dense<0.000000e+00> : vector<8x128xf32>
    %304 = tpu.matmul %285, %301, %cst_136 {dimension_numbers = #tpu.dot_dimension_numbers<[1], [0], [0], [1], [0, 0, 1, 1], [], []>} : vector<8x128xbf16>, vector<128x128xbf16>, vector<8x128xf32> -> vector<8x128xf32>
    %305 = arith.addf %303, %304 : vector<8x128xf32>
    %cst_137 = arith.constant 5.000000e-01 : f32
    %306 = vector.broadcast %cst_137 : f32 to vector<8x128xf32>
    %307 = arith.mulf %306, %305 : vector<8x128xf32>
    %308 = math.tanh %307 : vector<8x128xf32>
    %cst_138 = arith.constant 1.000000e+00 : f32
    %309 = vector.broadcast %cst_138 : f32 to vector<8x128xf32>
    %310 = arith.addf %309, %308 : vector<8x128xf32>
    %cst_139 = arith.constant 5.000000e-01 : f32
    %311 = vector.broadcast %cst_139 : f32 to vector<8x128xf32>
    %312 = arith.mulf %311, %310 : vector<8x128xf32>
    %c0_140 = arith.constant 0 : index
    %c256_141 = arith.constant 256 : index
    %313 = vector.load %arg4[%c0_140, %c256_141] : memref<128x512xbf16, #tpu.memory_space<vmem>>, vector<128x128xbf16>
    %314 = vector.extract_strided_slice %288 {offsets = [0, 256], sizes = [8, 128], strides = [1, 1]} : vector<8x512xbf16> to vector<8x128xbf16>
    %315 = arith.extf %314 : vector<8x128xbf16> to vector<8x128xf32>
    %cst_142 = arith.constant dense<0.000000e+00> : vector<8x128xf32>
    %316 = tpu.matmul %285, %313, %cst_142 {dimension_numbers = #tpu.dot_dimension_numbers<[1], [0], [0], [1], [0, 0, 1, 1], [], []>} : vector<8x128xbf16>, vector<128x128xbf16>, vector<8x128xf32> -> vector<8x128xf32>
    %317 = arith.addf %315, %316 : vector<8x128xf32>
    %318 = math.tanh %317 : vector<8x128xf32>
    %c0_143 = arith.constant 0 : index
    %c384_144 = arith.constant 384 : index
    %319 = vector.load %arg4[%c0_143, %c384_144] : memref<128x512xbf16, #tpu.memory_space<vmem>>, vector<128x128xbf16>
    %320 = vector.extract_strided_slice %288 {offsets = [0, 384], sizes = [8, 128], strides = [1, 1]} : vector<8x512xbf16> to vector<8x128xbf16>
    %321 = arith.extf %320 : vector<8x128xbf16> to vector<8x128xf32>
    %cst_145 = arith.constant dense<0.000000e+00> : vector<8x128xf32>
    %322 = tpu.matmul %285, %319, %cst_145 {dimension_numbers = #tpu.dot_dimension_numbers<[1], [0], [0], [1], [0, 0, 1, 1], [], []>} : vector<8x128xbf16>, vector<128x128xbf16>, vector<8x128xf32> -> vector<8x128xf32>
    %323 = arith.addf %321, %322 : vector<8x128xf32>
    %cst_146 = arith.constant 5.000000e-01 : f32
    %324 = vector.broadcast %cst_146 : f32 to vector<8x128xf32>
    %325 = arith.mulf %324, %323 : vector<8x128xf32>
    %326 = math.tanh %325 : vector<8x128xf32>
    %cst_147 = arith.constant 1.000000e+00 : f32
    %327 = vector.broadcast %cst_147 : f32 to vector<8x128xf32>
    %328 = arith.addf %327, %326 : vector<8x128xf32>
    %cst_148 = arith.constant 5.000000e-01 : f32
    %329 = vector.broadcast %cst_148 : f32 to vector<8x128xf32>
    %330 = arith.mulf %329, %328 : vector<8x128xf32>
    %331 = arith.mulf %312, %277 : vector<8x128xf32>
    %332 = arith.mulf %300, %318 : vector<8x128xf32>
    %333 = arith.addf %331, %332 : vector<8x128xf32>
    %334 = math.tanh %333 : vector<8x128xf32>
    %335 = arith.mulf %330, %334 : vector<8x128xf32>
    %336 = arith.truncf %335 : vector<8x128xf32> to vector<8x128xbf16>
    %337 = arith.index_cast %c5_i32 : i32 to index
    %c0_149 = arith.constant 0 : index
    %c0_150 = arith.constant 0 : index
    %338 = vector.load %arg3[%337, %c0_149, %c0_150] : memref<8x8x128xbf16, #tpu.memory_space<vmem>>, vector<1x8x128xbf16>
    %339 = vector.shape_cast %338 : vector<1x8x128xbf16> to vector<8x128xbf16>
    %340 = vector.shape_cast %336 : vector<8x128xbf16> to vector<1x8x128xbf16>
    tpu.vector_store %arg3[%337, %c0_149, %c0_150], %340 {strides = array<i32>} : memref<8x8x128xbf16, #tpu.memory_space<vmem>>, vector<1x8x128xbf16>,
    %c6_i32 = arith.constant 6 : i32
    %341 = arith.truncf %335 : vector<8x128xf32> to vector<8x128xbf16>
    %342 = arith.index_cast %c6_i32 : i32 to index
    %c0_151 = arith.constant 0 : index
    %c0_152 = arith.constant 0 : index
    %343 = vector.load %arg1[%342, %c0_151, %c0_152] : memref<8x8x512xbf16, #tpu.memory_space<vmem>>, vector<1x8x512xbf16>
    %344 = vector.shape_cast %343 : vector<1x8x512xbf16> to vector<8x512xbf16>
    %c0_153 = arith.constant 0 : index
    %c0_154 = arith.constant 0 : index
    %345 = vector.load %arg4[%c0_153, %c0_154] : memref<128x512xbf16, #tpu.memory_space<vmem>>, vector<128x128xbf16>
    %346 = vector.extract_strided_slice %344 {offsets = [0, 0], sizes = [8, 128], strides = [1, 1]} : vector<8x512xbf16> to vector<8x128xbf16>
    %347 = arith.extf %346 : vector<8x128xbf16> to vector<8x128xf32>
    %cst_155 = arith.constant dense<0.000000e+00> : vector<8x128xf32>
    %348 = tpu.matmul %341, %345, %cst_155 {dimension_numbers = #tpu.dot_dimension_numbers<[1], [0], [0], [1], [0, 0, 1, 1], [], []>} : vector<8x128xbf16>, vector<128x128xbf16>, vector<8x128xf32> -> vector<8x128xf32>
    %349 = arith.addf %347, %348 : vector<8x128xf32>
    %cst_156 = arith.constant 5.000000e-01 : f32
    %350 = vector.broadcast %cst_156 : f32 to vector<8x128xf32>
    %351 = arith.mulf %350, %349 : vector<8x128xf32>
    %352 = math.tanh %351 : vector<8x128xf32>
    %cst_157 = arith.constant 1.000000e+00 : f32
    %353 = vector.broadcast %cst_157 : f32 to vector<8x128xf32>
    %354 = arith.addf %353, %352 : vector<8x128xf32>
    %cst_158 = arith.constant 5.000000e-01 : f32
    %355 = vector.broadcast %cst_158 : f32 to vector<8x128xf32>
    %356 = arith.mulf %355, %354 : vector<8x128xf32>
    %c0_159 = arith.constant 0 : index
    %c128_160 = arith.constant 128 : index
    %357 = vector.load %arg4[%c0_159, %c128_160] : memref<128x512xbf16, #tpu.memory_space<vmem>>, vector<128x128xbf16>
    %358 = vector.extract_strided_slice %344 {offsets = [0, 128], sizes = [8, 128], strides = [1, 1]} : vector<8x512xbf16> to vector<8x128xbf16>
    %359 = arith.extf %358 : vector<8x128xbf16> to vector<8x128xf32>
    %cst_161 = arith.constant dense<0.000000e+00> : vector<8x128xf32>
    %360 = tpu.matmul %341, %357, %cst_161 {dimension_numbers = #tpu.dot_dimension_numbers<[1], [0], [0], [1], [0, 0, 1, 1], [], []>} : vector<8x128xbf16>, vector<128x128xbf16>, vector<8x128xf32> -> vector<8x128xf32>
    %361 = arith.addf %359, %360 : vector<8x128xf32>
    %cst_162 = arith.constant 5.000000e-01 : f32
    %362 = vector.broadcast %cst_162 : f32 to vector<8x128xf32>
    %363 = arith.mulf %362, %361 : vector<8x128xf32>
    %364 = math.tanh %363 : vector<8x128xf32>
    %cst_163 = arith.constant 1.000000e+00 : f32
    %365 = vector.broadcast %cst_163 : f32 to vector<8x128xf32>
    %366 = arith.addf %365, %364 : vector<8x128xf32>
    %cst_164 = arith.constant 5.000000e-01 : f32
    %367 = vector.broadcast %cst_164 : f32 to vector<8x128xf32>
    %368 = arith.mulf %367, %366 : vector<8x128xf32>
    %c0_165 = arith.constant 0 : index
    %c256_166 = arith.constant 256 : index
    %369 = vector.load %arg4[%c0_165, %c256_166] : memref<128x512xbf16, #tpu.memory_space<vmem>>, vector<128x128xbf16>
    %370 = vector.extract_strided_slice %344 {offsets = [0, 256], sizes = [8, 128], strides = [1, 1]} : vector<8x512xbf16> to vector<8x128xbf16>
    %371 = arith.extf %370 : vector<8x128xbf16> to vector<8x128xf32>
    %cst_167 = arith.constant dense<0.000000e+00> : vector<8x128xf32>
    %372 = tpu.matmul %341, %369, %cst_167 {dimension_numbers = #tpu.dot_dimension_numbers<[1], [0], [0], [1], [0, 0, 1, 1], [], []>} : vector<8x128xbf16>, vector<128x128xbf16>, vector<8x128xf32> -> vector<8x128xf32>
    %373 = arith.addf %371, %372 : vector<8x128xf32>
    %374 = math.tanh %373 : vector<8x128xf32>
    %c0_168 = arith.constant 0 : index
    %c384_169 = arith.constant 384 : index
    %375 = vector.load %arg4[%c0_168, %c384_169] : memref<128x512xbf16, #tpu.memory_space<vmem>>, vector<128x128xbf16>
    %376 = vector.extract_strided_slice %344 {offsets = [0, 384], sizes = [8, 128], strides = [1, 1]} : vector<8x512xbf16> to vector<8x128xbf16>
    %377 = arith.extf %376 : vector<8x128xbf16> to vector<8x128xf32>
    %cst_170 = arith.constant dense<0.000000e+00> : vector<8x128xf32>
    %378 = tpu.matmul %341, %375, %cst_170 {dimension_numbers = #tpu.dot_dimension_numbers<[1], [0], [0], [1], [0, 0, 1, 1], [], []>} : vector<8x128xbf16>, vector<128x128xbf16>, vector<8x128xf32> -> vector<8x128xf32>
    %379 = arith.addf %377, %378 : vector<8x128xf32>
    %cst_171 = arith.constant 5.000000e-01 : f32
    %380 = vector.broadcast %cst_171 : f32 to vector<8x128xf32>
    %381 = arith.mulf %380, %379 : vector<8x128xf32>
    %382 = math.tanh %381 : vector<8x128xf32>
    %cst_172 = arith.constant 1.000000e+00 : f32
    %383 = vector.broadcast %cst_172 : f32 to vector<8x128xf32>
    %384 = arith.addf %383, %382 : vector<8x128xf32>
    %cst_173 = arith.constant 5.000000e-01 : f32
    %385 = vector.broadcast %cst_173 : f32 to vector<8x128xf32>
    %386 = arith.mulf %385, %384 : vector<8x128xf32>
    %387 = arith.mulf %368, %333 : vector<8x128xf32>
    %388 = arith.mulf %356, %374 : vector<8x128xf32>
    %389 = arith.addf %387, %388 : vector<8x128xf32>
    %390 = math.tanh %389 : vector<8x128xf32>
    %391 = arith.mulf %386, %390 : vector<8x128xf32>
    %392 = arith.truncf %391 : vector<8x128xf32> to vector<8x128xbf16>
    %393 = arith.index_cast %c6_i32 : i32 to index
    %c0_174 = arith.constant 0 : index
    %c0_175 = arith.constant 0 : index
    %394 = vector.load %arg3[%393, %c0_174, %c0_175] : memref<8x8x128xbf16, #tpu.memory_space<vmem>>, vector<1x8x128xbf16>
    %395 = vector.shape_cast %394 : vector<1x8x128xbf16> to vector<8x128xbf16>
    %396 = vector.shape_cast %392 : vector<8x128xbf16> to vector<1x8x128xbf16>
    tpu.vector_store %arg3[%393, %c0_174, %c0_175], %396 {strides = array<i32>} : memref<8x8x128xbf16, #tpu.memory_space<vmem>>, vector<1x8x128xbf16>,
    %c7_i32 = arith.constant 7 : i32
    %397 = arith.truncf %391 : vector<8x128xf32> to vector<8x128xbf16>
    %398 = arith.index_cast %c7_i32 : i32 to index
    %c0_176 = arith.constant 0 : index
    %c0_177 = arith.constant 0 : index
    %399 = vector.load %arg1[%398, %c0_176, %c0_177] : memref<8x8x512xbf16, #tpu.memory_space<vmem>>, vector<1x8x512xbf16>
    %400 = vector.shape_cast %399 : vector<1x8x512xbf16> to vector<8x512xbf16>
    %c0_178 = arith.constant 0 : index
    %c0_179 = arith.constant 0 : index
    %401 = vector.load %arg4[%c0_178, %c0_179] : memref<128x512xbf16, #tpu.memory_space<vmem>>, vector<128x128xbf16>
    %402 = vector.extract_strided_slice %400 {offsets = [0, 0], sizes = [8, 128], strides = [1, 1]} : vector<8x512xbf16> to vector<8x128xbf16>
    %403 = arith.extf %402 : vector<8x128xbf16> to vector<8x128xf32>
    %cst_180 = arith.constant dense<0.000000e+00> : vector<8x128xf32>
    %404 = tpu.matmul %397, %401, %cst_180 {dimension_numbers = #tpu.dot_dimension_numbers<[1], [0], [0], [1], [0, 0, 1, 1], [], []>} : vector<8x128xbf16>, vector<128x128xbf16>, vector<8x128xf32> -> vector<8x128xf32>
    %405 = arith.addf %403, %404 : vector<8x128xf32>
    %cst_181 = arith.constant 5.000000e-01 : f32
    %406 = vector.broadcast %cst_181 : f32 to vector<8x128xf32>
    %407 = arith.mulf %406, %405 : vector<8x128xf32>
    %408 = math.tanh %407 : vector<8x128xf32>
    %cst_182 = arith.constant 1.000000e+00 : f32
    %409 = vector.broadcast %cst_182 : f32 to vector<8x128xf32>
    %410 = arith.addf %409, %408 : vector<8x128xf32>
    %cst_183 = arith.constant 5.000000e-01 : f32
    %411 = vector.broadcast %cst_183 : f32 to vector<8x128xf32>
    %412 = arith.mulf %411, %410 : vector<8x128xf32>
    %c0_184 = arith.constant 0 : index
    %c128_185 = arith.constant 128 : index
    %413 = vector.load %arg4[%c0_184, %c128_185] : memref<128x512xbf16, #tpu.memory_space<vmem>>, vector<128x128xbf16>
    %414 = vector.extract_strided_slice %400 {offsets = [0, 128], sizes = [8, 128], strides = [1, 1]} : vector<8x512xbf16> to vector<8x128xbf16>
    %415 = arith.extf %414 : vector<8x128xbf16> to vector<8x128xf32>
    %cst_186 = arith.constant dense<0.000000e+00> : vector<8x128xf32>
    %416 = tpu.matmul %397, %413, %cst_186 {dimension_numbers = #tpu.dot_dimension_numbers<[1], [0], [0], [1], [0, 0, 1, 1], [], []>} : vector<8x128xbf16>, vector<128x128xbf16>, vector<8x128xf32> -> vector<8x128xf32>
    %417 = arith.addf %415, %416 : vector<8x128xf32>
    %cst_187 = arith.constant 5.000000e-01 : f32
    %418 = vector.broadcast %cst_187 : f32 to vector<8x128xf32>
    %419 = arith.mulf %418, %417 : vector<8x128xf32>
    %420 = math.tanh %419 : vector<8x128xf32>
    %cst_188 = arith.constant 1.000000e+00 : f32
    %421 = vector.broadcast %cst_188 : f32 to vector<8x128xf32>
    %422 = arith.addf %421, %420 : vector<8x128xf32>
    %cst_189 = arith.constant 5.000000e-01 : f32
    %423 = vector.broadcast %cst_189 : f32 to vector<8x128xf32>
    %424 = arith.mulf %423, %422 : vector<8x128xf32>
    %c0_190 = arith.constant 0 : index
    %c256_191 = arith.constant 256 : index
    %425 = vector.load %arg4[%c0_190, %c256_191] : memref<128x512xbf16, #tpu.memory_space<vmem>>, vector<128x128xbf16>
    %426 = vector.extract_strided_slice %400 {offsets = [0, 256], sizes = [8, 128], strides = [1, 1]} : vector<8x512xbf16> to vector<8x128xbf16>
    %427 = arith.extf %426 : vector<8x128xbf16> to vector<8x128xf32>
    %cst_192 = arith.constant dense<0.000000e+00> : vector<8x128xf32>
    %428 = tpu.matmul %397, %425, %cst_192 {dimension_numbers = #tpu.dot_dimension_numbers<[1], [0], [0], [1], [0, 0, 1, 1], [], []>} : vector<8x128xbf16>, vector<128x128xbf16>, vector<8x128xf32> -> vector<8x128xf32>
    %429 = arith.addf %427, %428 : vector<8x128xf32>
    %430 = math.tanh %429 : vector<8x128xf32>
    %c0_193 = arith.constant 0 : index
    %c384_194 = arith.constant 384 : index
    %431 = vector.load %arg4[%c0_193, %c384_194] : memref<128x512xbf16, #tpu.memory_space<vmem>>, vector<128x128xbf16>
    %432 = vector.extract_strided_slice %400 {offsets = [0, 384], sizes = [8, 128], strides = [1, 1]} : vector<8x512xbf16> to vector<8x128xbf16>
    %433 = arith.extf %432 : vector<8x128xbf16> to vector<8x128xf32>
    %cst_195 = arith.constant dense<0.000000e+00> : vector<8x128xf32>
    %434 = tpu.matmul %397, %431, %cst_195 {dimension_numbers = #tpu.dot_dimension_numbers<[1], [0], [0], [1], [0, 0, 1, 1], [], []>} : vector<8x128xbf16>, vector<128x128xbf16>, vector<8x128xf32> -> vector<8x128xf32>
    %435 = arith.addf %433, %434 : vector<8x128xf32>
    %cst_196 = arith.constant 5.000000e-01 : f32
    %436 = vector.broadcast %cst_196 : f32 to vector<8x128xf32>
    %437 = arith.mulf %436, %435 : vector<8x128xf32>
    %438 = math.tanh %437 : vector<8x128xf32>
    %cst_197 = arith.constant 1.000000e+00 : f32
    %439 = vector.broadcast %cst_197 : f32 to vector<8x128xf32>
    %440 = arith.addf %439, %438 : vector<8x128xf32>
    %cst_198 = arith.constant 5.000000e-01 : f32
    %441 = vector.broadcast %cst_198 : f32 to vector<8x128xf32>
    %442 = arith.mulf %441, %440 : vector<8x128xf32>
    %443 = arith.mulf %424, %389 : vector<8x128xf32>
    %444 = arith.mulf %412, %430 : vector<8x128xf32>
    %445 = arith.addf %443, %444 : vector<8x128xf32>
    %446 = math.tanh %445 : vector<8x128xf32>
    %447 = arith.mulf %442, %446 : vector<8x128xf32>
    %448 = arith.truncf %447 : vector<8x128xf32> to vector<8x128xbf16>
    %449 = arith.index_cast %c7_i32 : i32 to index
    %c0_199 = arith.constant 0 : index
    %c0_200 = arith.constant 0 : index
    %450 = vector.load %arg3[%449, %c0_199, %c0_200] : memref<8x8x128xbf16, #tpu.memory_space<vmem>>, vector<1x8x128xbf16>
    %451 = vector.shape_cast %450 : vector<1x8x128xbf16> to vector<8x128xbf16>
    %452 = vector.shape_cast %448 : vector<8x128xbf16> to vector<1x8x128xbf16>
    tpu.vector_store %arg3[%449, %c0_199, %c0_200], %452 {strides = array<i32>} : memref<8x8x128xbf16, #tpu.memory_space<vmem>>, vector<1x8x128xbf16>,
    %c8_i32 = arith.constant 8 : i32
    %c0_201 = arith.constant 0 : index
    %c0_202 = arith.constant 0 : index
    %453 = vector.load %arg5[%c0_201, %c0_202] : memref<8x128xf32, #tpu.memory_space<vmem>>, vector<8x128xf32>
    tpu.vector_store %arg5[%c0_201, %c0_202], %447 {strides = array<i32>} : memref<8x128xf32, #tpu.memory_space<vmem>>, vector<8x128xf32>,
    %c0_203 = arith.constant 0 : index
    %c0_204 = arith.constant 0 : index
    %454 = vector.load %arg6[%c0_203, %c0_204] : memref<8x128xf32, #tpu.memory_space<vmem>>, vector<8x128xf32>
    tpu.vector_store %arg6[%c0_203, %c0_204], %445 {strides = array<i32>} : memref<8x128xf32, #tpu.memory_space<vmem>>, vector<8x128xf32>,
    return
  }
  func.func @transform_0(%arg0: i32) -> (i32, i32, i32) {
    %c0_i32 = arith.constant 0 : i32
    %c0_i32_0 = arith.constant 0 : i32
    %c0_i32_1 = arith.constant 0 : i32
    return %arg0, %c0_i32, %c0_i32_0 : i32, i32, i32
  }
  func.func @transform_2(%arg0: i32) -> (i32, i32, i32) {
    %c0_i32 = arith.constant 0 : i32
    %c0_i32_0 = arith.constant 0 : i32
    %c0_i32_1 = arith.constant 0 : i32
    return %arg0, %c0_i32, %c0_i32_0 : i32, i32, i32
  }
}

module attributes {stable_mosaic.version = 11 : i64} {
  func.func @lstm_recurrence_kernel(%arg0: i32, %arg1: memref<8x8x512xbf16, #tpu.memory_space<vmem>>, %arg2: memref<128x512xbf16, #tpu.memory_space<any>>, %arg3: memref<8x8x128xbf16, #tpu.memory_space<vmem>>, %arg4: memref<128x512xbf16, #tpu.memory_space<vmem>>, %arg5: memref<8x128xf32, #tpu.memory_space<vmem>>, %arg6: memref<8x128xf32, #tpu.memory_space<vmem>>) attributes {dimension_semantics = [#tpu.dimension_semantics<arbitrary>], iteration_bounds = array<i64: 1>, scalar_prefetch = 0 : i64, scratch_operands = 3 : i64, tpu.core_type = #tpu.core_type<tc>, window_params = [{transform_indices = @transform_0, window_bounds = array<i64: 8, 8, 512>}, {}, {transform_indices = @transform_2, window_bounds = array<i64: 8, 8, 128>}]} {
    %c0_i32 = arith.constant 0 : i32
    %0 = arith.cmpi eq, %arg0, %c0_i32 : i32
    %1 = arith.extui %0 : i1 to i32
    %c0_i32_0 = arith.constant 0 : i32
    %2 = arith.cmpi ne, %1, %c0_i32_0 : i32
    scf.if %2 {
      "tpu.region"() ({
        %459 = tpu.sem_alloc : memref<!tpu.dma_semaphore, #tpu.memory_space<semaphore_mem>>
        tpu.enqueue_dma source(%arg2 : memref<128x512xbf16, #tpu.memory_space<any>>) target(%arg4 : memref<128x512xbf16, #tpu.memory_space<vmem>>) target_semaphore(%459 : memref<!tpu.dma_semaphore, #tpu.memory_space<semaphore_mem>>)
        tpu.wait_dma2 semaphore(%459 : memref<!tpu.dma_semaphore, #tpu.memory_space<semaphore_mem>>) src(%arg2 : memref<128x512xbf16, #tpu.memory_space<any>>) dst(%arg4 : memref<128x512xbf16, #tpu.memory_space<vmem>>)
        tpu.yield
      }) : () -> ()
      %cst_205 = arith.constant 0.000000e+00 : f32
      %455 = vector.broadcast %cst_205 : f32 to vector<8x128xf32>
      %c0_206 = arith.constant 0 : index
      %c0_207 = arith.constant 0 : index
      %456 = vector.load %arg5[%c0_206, %c0_207] : memref<8x128xf32, #tpu.memory_space<vmem>>, vector<8x128xf32>
      tpu.vector_store %arg5[%c0_206, %c0_207], %455 {strides = array<i32>} : memref<8x128xf32, #tpu.memory_space<vmem>>, vector<8x128xf32>,
      %cst_208 = arith.constant 0.000000e+00 : f32
      %457 = vector.broadcast %cst_208 : f32 to vector<8x128xf32>
      %c0_209 = arith.constant 0 : index
      %c0_210 = arith.constant 0 : index
      %458 = vector.load %arg6[%c0_209, %c0_210] : memref<8x128xf32, #tpu.memory_space<vmem>>, vector<8x128xf32>
      tpu.vector_store %arg6[%c0_209, %c0_210], %457 {strides = array<i32>} : memref<8x128xf32, #tpu.memory_space<vmem>>, vector<8x128xf32>,
    } else {
    }
    %c0 = arith.constant 0 : index
    %c0_1 = arith.constant 0 : index
    %3 = vector.load %arg5[%c0, %c0_1] : memref<8x128xf32, #tpu.memory_space<vmem>>, vector<8x128xf32>
    %c0_2 = arith.constant 0 : index
    %c0_3 = arith.constant 0 : index
    %4 = vector.load %arg6[%c0_2, %c0_3] : memref<8x128xf32, #tpu.memory_space<vmem>>, vector<8x128xf32>
    %c0_i32_4 = arith.constant 0 : i32
    %5 = arith.truncf %3 : vector<8x128xf32> to vector<8x128xbf16>
    %6 = arith.index_cast %c0_i32_4 : i32 to index
    %c0_5 = arith.constant 0 : index
    %c0_6 = arith.constant 0 : index
    %7 = vector.load %arg1[%6, %c0_5, %c0_6] : memref<8x8x512xbf16, #tpu.memory_space<vmem>>, vector<1x8x512xbf16>
    %8 = vector.shape_cast %7 : vector<1x8x512xbf16> to vector<8x512xbf16>
    %c0_7 = arith.constant 0 : index
    %c0_8 = arith.constant 0 : index
    %9 = vector.load %arg4[%c0_7, %c0_8] : memref<128x512xbf16, #tpu.memory_space<vmem>>, vector<128x128xbf16>
    %10 = vector.extract_strided_slice %8 {offsets = [0, 0], sizes = [8, 128], strides = [1, 1]} : vector<8x512xbf16> to vector<8x128xbf16>
    %11 = arith.extf %10 : vector<8x128xbf16> to vector<8x128xf32>
    %cst = arith.constant dense<0.000000e+00> : vector<8x128xf32>
    %12 = tpu.matmul %5, %9, %cst {dimension_numbers = #tpu.dot_dimension_numbers<[1], [0], [0], [1], [0, 0, 1, 1], [], []>} : vector<8x128xbf16>, vector<128x128xbf16>, vector<8x128xf32> -> vector<8x128xf32>
    %13 = arith.addf %11, %12 : vector<8x128xf32>
    %cst_9 = arith.constant 5.000000e-01 : f32
    %14 = vector.broadcast %cst_9 : f32 to vector<8x128xf32>
    %15 = arith.mulf %14, %13 : vector<8x128xf32>
    %16 = math.tanh %15 : vector<8x128xf32>
    %cst_10 = arith.constant 1.000000e+00 : f32
    %17 = vector.broadcast %cst_10 : f32 to vector<8x128xf32>
    %18 = arith.addf %17, %16 : vector<8x128xf32>
    %cst_11 = arith.constant 5.000000e-01 : f32
    %19 = vector.broadcast %cst_11 : f32 to vector<8x128xf32>
    %20 = arith.mulf %19, %18 : vector<8x128xf32>
    %c0_12 = arith.constant 0 : index
    %c128 = arith.constant 128 : index
    %21 = vector.load %arg4[%c0_12, %c128] : memref<128x512xbf16, #tpu.memory_space<vmem>>, vector<128x128xbf16>
    %22 = vector.extract_strided_slice %8 {offsets = [0, 128], sizes = [8, 128], strides = [1, 1]} : vector<8x512xbf16> to vector<8x128xbf16>
    %23 = arith.extf %22 : vector<8x128xbf16> to vector<8x128xf32>
    %cst_13 = arith.constant dense<0.000000e+00> : vector<8x128xf32>
    %24 = tpu.matmul %5, %21, %cst_13 {dimension_numbers = #tpu.dot_dimension_numbers<[1], [0], [0], [1], [0, 0, 1, 1], [], []>} : vector<8x128xbf16>, vector<128x128xbf16>, vector<8x128xf32> -> vector<8x128xf32>
    %25 = arith.addf %23, %24 : vector<8x128xf32>
    %cst_14 = arith.constant 5.000000e-01 : f32
    %26 = vector.broadcast %cst_14 : f32 to vector<8x128xf32>
    %27 = arith.mulf %26, %25 : vector<8x128xf32>
    %28 = math.tanh %27 : vector<8x128xf32>
    %cst_15 = arith.constant 1.000000e+00 : f32
    %29 = vector.broadcast %cst_15 : f32 to vector<8x128xf32>
    %30 = arith.addf %29, %28 : vector<8x128xf32>
    %cst_16 = arith.constant 5.000000e-01 : f32
    %31 = vector.broadcast %cst_16 : f32 to vector<8x128xf32>
    %32 = arith.mulf %31, %30 : vector<8x128xf32>
    %c0_17 = arith.constant 0 : index
    %c256 = arith.constant 256 : index
    %33 = vector.load %arg4[%c0_17, %c256] : memref<128x512xbf16, #tpu.memory_space<vmem>>, vector<128x128xbf16>
    %34 = vector.extract_strided_slice %8 {offsets = [0, 256], sizes = [8, 128], strides = [1, 1]} : vector<8x512xbf16> to vector<8x128xbf16>
    %35 = arith.extf %34 : vector<8x128xbf16> to vector<8x128xf32>
    %cst_18 = arith.constant dense<0.000000e+00> : vector<8x128xf32>
    %36 = tpu.matmul %5, %33, %cst_18 {dimension_numbers = #tpu.dot_dimension_numbers<[1], [0], [0], [1], [0, 0, 1, 1], [], []>} : vector<8x128xbf16>, vector<128x128xbf16>, vector<8x128xf32> -> vector<8x128xf32>
    %37 = arith.addf %35, %36 : vector<8x128xf32>
    %38 = math.tanh %37 : vector<8x128xf32>
    %c0_19 = arith.constant 0 : index
    %c384 = arith.constant 384 : index
    %39 = vector.load %arg4[%c0_19, %c384] : memref<128x512xbf16, #tpu.memory_space<vmem>>, vector<128x128xbf16>
    %40 = vector.extract_strided_slice %8 {offsets = [0, 384], sizes = [8, 128], strides = [1, 1]} : vector<8x512xbf16> to vector<8x128xbf16>
    %41 = arith.extf %40 : vector<8x128xbf16> to vector<8x128xf32>
    %cst_20 = arith.constant dense<0.000000e+00> : vector<8x128xf32>
    %42 = tpu.matmul %5, %39, %cst_20 {dimension_numbers = #tpu.dot_dimension_numbers<[1], [0], [0], [1], [0, 0, 1, 1], [], []>} : vector<8x128xbf16>, vector<128x128xbf16>, vector<8x128xf32> -> vector<8x128xf32>
    %43 = arith.addf %41, %42 : vector<8x128xf32>
    %cst_21 = arith.constant 5.000000e-01 : f32
    %44 = vector.broadcast %cst_21 : f32 to vector<8x128xf32>
    %45 = arith.mulf %44, %43 : vector<8x128xf32>
    %46 = math.tanh %45 : vector<8x128xf32>
    %cst_22 = arith.constant 1.000000e+00 : f32
    %47 = vector.broadcast %cst_22 : f32 to vector<8x128xf32>
    %48 = arith.addf %47, %46 : vector<8x128xf32>
    %cst_23 = arith.constant 5.000000e-01 : f32
    %49 = vector.broadcast %cst_23 : f32 to vector<8x128xf32>
    %50 = arith.mulf %49, %48 : vector<8x128xf32>
    %51 = arith.mulf %32, %4 : vector<8x128xf32>
    %52 = arith.mulf %20, %38 : vector<8x128xf32>
    %53 = arith.addf %51, %52 : vector<8x128xf32>
    %54 = math.tanh %53 : vector<8x128xf32>
    %55 = arith.mulf %50, %54 : vector<8x128xf32>
    %56 = arith.truncf %55 : vector<8x128xf32> to vector<8x128xbf16>
    %57 = arith.index_cast %c0_i32_4 : i32 to index
    %c0_24 = arith.constant 0 : index
    %c0_25 = arith.constant 0 : index
    %58 = vector.load %arg3[%57, %c0_24, %c0_25] : memref<8x8x128xbf16, #tpu.memory_space<vmem>>, vector<1x8x128xbf16>
    %59 = vector.shape_cast %58 : vector<1x8x128xbf16> to vector<8x128xbf16>
    %60 = vector.shape_cast %56 : vector<8x128xbf16> to vector<1x8x128xbf16>
    tpu.vector_store %arg3[%57, %c0_24, %c0_25], %60 {strides = array<i32>} : memref<8x8x128xbf16, #tpu.memory_space<vmem>>, vector<1x8x128xbf16>,
    %c1_i32 = arith.constant 1 : i32
    %61 = arith.truncf %55 : vector<8x128xf32> to vector<8x128xbf16>
    %62 = arith.index_cast %c1_i32 : i32 to index
    %c0_26 = arith.constant 0 : index
    %c0_27 = arith.constant 0 : index
    %63 = vector.load %arg1[%62, %c0_26, %c0_27] : memref<8x8x512xbf16, #tpu.memory_space<vmem>>, vector<1x8x512xbf16>
    %64 = vector.shape_cast %63 : vector<1x8x512xbf16> to vector<8x512xbf16>
    %c0_28 = arith.constant 0 : index
    %c0_29 = arith.constant 0 : index
    %65 = vector.load %arg4[%c0_28, %c0_29] : memref<128x512xbf16, #tpu.memory_space<vmem>>, vector<128x128xbf16>
    %66 = vector.extract_strided_slice %64 {offsets = [0, 0], sizes = [8, 128], strides = [1, 1]} : vector<8x512xbf16> to vector<8x128xbf16>
    %67 = arith.extf %66 : vector<8x128xbf16> to vector<8x128xf32>
    %cst_30 = arith.constant dense<0.000000e+00> : vector<8x128xf32>
    %68 = tpu.matmul %61, %65, %cst_30 {dimension_numbers = #tpu.dot_dimension_numbers<[1], [0], [0], [1], [0, 0, 1, 1], [], []>} : vector<8x128xbf16>, vector<128x128xbf16>, vector<8x128xf32> -> vector<8x128xf32>
    %69 = arith.addf %67, %68 : vector<8x128xf32>
    %cst_31 = arith.constant 5.000000e-01 : f32
    %70 = vector.broadcast %cst_31 : f32 to vector<8x128xf32>
    %71 = arith.mulf %70, %69 : vector<8x128xf32>
    %72 = math.tanh %71 : vector<8x128xf32>
    %cst_32 = arith.constant 1.000000e+00 : f32
    %73 = vector.broadcast %cst_32 : f32 to vector<8x128xf32>
    %74 = arith.addf %73, %72 : vector<8x128xf32>
    %cst_33 = arith.constant 5.000000e-01 : f32
    %75 = vector.broadcast %cst_33 : f32 to vector<8x128xf32>
    %76 = arith.mulf %75, %74 : vector<8x128xf32>
    %c0_34 = arith.constant 0 : index
    %c128_35 = arith.constant 128 : index
    %77 = vector.load %arg4[%c0_34, %c128_35] : memref<128x512xbf16, #tpu.memory_space<vmem>>, vector<128x128xbf16>
    %78 = vector.extract_strided_slice %64 {offsets = [0, 128], sizes = [8, 128], strides = [1, 1]} : vector<8x512xbf16> to vector<8x128xbf16>
    %79 = arith.extf %78 : vector<8x128xbf16> to vector<8x128xf32>
    %cst_36 = arith.constant dense<0.000000e+00> : vector<8x128xf32>
    %80 = tpu.matmul %61, %77, %cst_36 {dimension_numbers = #tpu.dot_dimension_numbers<[1], [0], [0], [1], [0, 0, 1, 1], [], []>} : vector<8x128xbf16>, vector<128x128xbf16>, vector<8x128xf32> -> vector<8x128xf32>
    %81 = arith.addf %79, %80 : vector<8x128xf32>
    %cst_37 = arith.constant 5.000000e-01 : f32
    %82 = vector.broadcast %cst_37 : f32 to vector<8x128xf32>
    %83 = arith.mulf %82, %81 : vector<8x128xf32>
    %84 = math.tanh %83 : vector<8x128xf32>
    %cst_38 = arith.constant 1.000000e+00 : f32
    %85 = vector.broadcast %cst_38 : f32 to vector<8x128xf32>
    %86 = arith.addf %85, %84 : vector<8x128xf32>
    %cst_39 = arith.constant 5.000000e-01 : f32
    %87 = vector.broadcast %cst_39 : f32 to vector<8x128xf32>
    %88 = arith.mulf %87, %86 : vector<8x128xf32>
    %c0_40 = arith.constant 0 : index
    %c256_41 = arith.constant 256 : index
    %89 = vector.load %arg4[%c0_40, %c256_41] : memref<128x512xbf16, #tpu.memory_space<vmem>>, vector<128x128xbf16>
    %90 = vector.extract_strided_slice %64 {offsets = [0, 256], sizes = [8, 128], strides = [1, 1]} : vector<8x512xbf16> to vector<8x128xbf16>
    %91 = arith.extf %90 : vector<8x128xbf16> to vector<8x128xf32>
    %cst_42 = arith.constant dense<0.000000e+00> : vector<8x128xf32>
    %92 = tpu.matmul %61, %89, %cst_42 {dimension_numbers = #tpu.dot_dimension_numbers<[1], [0], [0], [1], [0, 0, 1, 1], [], []>} : vector<8x128xbf16>, vector<128x128xbf16>, vector<8x128xf32> -> vector<8x128xf32>
    %93 = arith.addf %91, %92 : vector<8x128xf32>
    %94 = math.tanh %93 : vector<8x128xf32>
    %c0_43 = arith.constant 0 : index
    %c384_44 = arith.constant 384 : index
    %95 = vector.load %arg4[%c0_43, %c384_44] : memref<128x512xbf16, #tpu.memory_space<vmem>>, vector<128x128xbf16>
    %96 = vector.extract_strided_slice %64 {offsets = [0, 384], sizes = [8, 128], strides = [1, 1]} : vector<8x512xbf16> to vector<8x128xbf16>
    %97 = arith.extf %96 : vector<8x128xbf16> to vector<8x128xf32>
    %cst_45 = arith.constant dense<0.000000e+00> : vector<8x128xf32>
    %98 = tpu.matmul %61, %95, %cst_45 {dimension_numbers = #tpu.dot_dimension_numbers<[1], [0], [0], [1], [0, 0, 1, 1], [], []>} : vector<8x128xbf16>, vector<128x128xbf16>, vector<8x128xf32> -> vector<8x128xf32>
    %99 = arith.addf %97, %98 : vector<8x128xf32>
    %cst_46 = arith.constant 5.000000e-01 : f32
    %100 = vector.broadcast %cst_46 : f32 to vector<8x128xf32>
    %101 = arith.mulf %100, %99 : vector<8x128xf32>
    %102 = math.tanh %101 : vector<8x128xf32>
    %cst_47 = arith.constant 1.000000e+00 : f32
    %103 = vector.broadcast %cst_47 : f32 to vector<8x128xf32>
    %104 = arith.addf %103, %102 : vector<8x128xf32>
    %cst_48 = arith.constant 5.000000e-01 : f32
    %105 = vector.broadcast %cst_48 : f32 to vector<8x128xf32>
    %106 = arith.mulf %105, %104 : vector<8x128xf32>
    %107 = arith.mulf %88, %53 : vector<8x128xf32>
    %108 = arith.mulf %76, %94 : vector<8x128xf32>
    %109 = arith.addf %107, %108 : vector<8x128xf32>
    %110 = math.tanh %109 : vector<8x128xf32>
    %111 = arith.mulf %106, %110 : vector<8x128xf32>
    %112 = arith.truncf %111 : vector<8x128xf32> to vector<8x128xbf16>
    %113 = arith.index_cast %c1_i32 : i32 to index
    %c0_49 = arith.constant 0 : index
    %c0_50 = arith.constant 0 : index
    %114 = vector.load %arg3[%113, %c0_49, %c0_50] : memref<8x8x128xbf16, #tpu.memory_space<vmem>>, vector<1x8x128xbf16>
    %115 = vector.shape_cast %114 : vector<1x8x128xbf16> to vector<8x128xbf16>
    %116 = vector.shape_cast %112 : vector<8x128xbf16> to vector<1x8x128xbf16>
    tpu.vector_store %arg3[%113, %c0_49, %c0_50], %116 {strides = array<i32>} : memref<8x8x128xbf16, #tpu.memory_space<vmem>>, vector<1x8x128xbf16>,
    %c2_i32 = arith.constant 2 : i32
    %117 = arith.truncf %111 : vector<8x128xf32> to vector<8x128xbf16>
    %118 = arith.index_cast %c2_i32 : i32 to index
    %c0_51 = arith.constant 0 : index
    %c0_52 = arith.constant 0 : index
    %119 = vector.load %arg1[%118, %c0_51, %c0_52] : memref<8x8x512xbf16, #tpu.memory_space<vmem>>, vector<1x8x512xbf16>
    %120 = vector.shape_cast %119 : vector<1x8x512xbf16> to vector<8x512xbf16>
    %c0_53 = arith.constant 0 : index
    %c0_54 = arith.constant 0 : index
    %121 = vector.load %arg4[%c0_53, %c0_54] : memref<128x512xbf16, #tpu.memory_space<vmem>>, vector<128x128xbf16>
    %122 = vector.extract_strided_slice %120 {offsets = [0, 0], sizes = [8, 128], strides = [1, 1]} : vector<8x512xbf16> to vector<8x128xbf16>
    %123 = arith.extf %122 : vector<8x128xbf16> to vector<8x128xf32>
    %cst_55 = arith.constant dense<0.000000e+00> : vector<8x128xf32>
    %124 = tpu.matmul %117, %121, %cst_55 {dimension_numbers = #tpu.dot_dimension_numbers<[1], [0], [0], [1], [0, 0, 1, 1], [], []>} : vector<8x128xbf16>, vector<128x128xbf16>, vector<8x128xf32> -> vector<8x128xf32>
    %125 = arith.addf %123, %124 : vector<8x128xf32>
    %cst_56 = arith.constant 5.000000e-01 : f32
    %126 = vector.broadcast %cst_56 : f32 to vector<8x128xf32>
    %127 = arith.mulf %126, %125 : vector<8x128xf32>
    %128 = math.tanh %127 : vector<8x128xf32>
    %cst_57 = arith.constant 1.000000e+00 : f32
    %129 = vector.broadcast %cst_57 : f32 to vector<8x128xf32>
    %130 = arith.addf %129, %128 : vector<8x128xf32>
    %cst_58 = arith.constant 5.000000e-01 : f32
    %131 = vector.broadcast %cst_58 : f32 to vector<8x128xf32>
    %132 = arith.mulf %131, %130 : vector<8x128xf32>
    %c0_59 = arith.constant 0 : index
    %c128_60 = arith.constant 128 : index
    %133 = vector.load %arg4[%c0_59, %c128_60] : memref<128x512xbf16, #tpu.memory_space<vmem>>, vector<128x128xbf16>
    %134 = vector.extract_strided_slice %120 {offsets = [0, 128], sizes = [8, 128], strides = [1, 1]} : vector<8x512xbf16> to vector<8x128xbf16>
    %135 = arith.extf %134 : vector<8x128xbf16> to vector<8x128xf32>
    %cst_61 = arith.constant dense<0.000000e+00> : vector<8x128xf32>
    %136 = tpu.matmul %117, %133, %cst_61 {dimension_numbers = #tpu.dot_dimension_numbers<[1], [0], [0], [1], [0, 0, 1, 1], [], []>} : vector<8x128xbf16>, vector<128x128xbf16>, vector<8x128xf32> -> vector<8x128xf32>
    %137 = arith.addf %135, %136 : vector<8x128xf32>
    %cst_62 = arith.constant 5.000000e-01 : f32
    %138 = vector.broadcast %cst_62 : f32 to vector<8x128xf32>
    %139 = arith.mulf %138, %137 : vector<8x128xf32>
    %140 = math.tanh %139 : vector<8x128xf32>
    %cst_63 = arith.constant 1.000000e+00 : f32
    %141 = vector.broadcast %cst_63 : f32 to vector<8x128xf32>
    %142 = arith.addf %141, %140 : vector<8x128xf32>
    %cst_64 = arith.constant 5.000000e-01 : f32
    %143 = vector.broadcast %cst_64 : f32 to vector<8x128xf32>
    %144 = arith.mulf %143, %142 : vector<8x128xf32>
    %c0_65 = arith.constant 0 : index
    %c256_66 = arith.constant 256 : index
    %145 = vector.load %arg4[%c0_65, %c256_66] : memref<128x512xbf16, #tpu.memory_space<vmem>>, vector<128x128xbf16>
    %146 = vector.extract_strided_slice %120 {offsets = [0, 256], sizes = [8, 128], strides = [1, 1]} : vector<8x512xbf16> to vector<8x128xbf16>
    %147 = arith.extf %146 : vector<8x128xbf16> to vector<8x128xf32>
    %cst_67 = arith.constant dense<0.000000e+00> : vector<8x128xf32>
    %148 = tpu.matmul %117, %145, %cst_67 {dimension_numbers = #tpu.dot_dimension_numbers<[1], [0], [0], [1], [0, 0, 1, 1], [], []>} : vector<8x128xbf16>, vector<128x128xbf16>, vector<8x128xf32> -> vector<8x128xf32>
    %149 = arith.addf %147, %148 : vector<8x128xf32>
    %150 = math.tanh %149 : vector<8x128xf32>
    %c0_68 = arith.constant 0 : index
    %c384_69 = arith.constant 384 : index
    %151 = vector.load %arg4[%c0_68, %c384_69] : memref<128x512xbf16, #tpu.memory_space<vmem>>, vector<128x128xbf16>
    %152 = vector.extract_strided_slice %120 {offsets = [0, 384], sizes = [8, 128], strides = [1, 1]} : vector<8x512xbf16> to vector<8x128xbf16>
    %153 = arith.extf %152 : vector<8x128xbf16> to vector<8x128xf32>
    %cst_70 = arith.constant dense<0.000000e+00> : vector<8x128xf32>
    %154 = tpu.matmul %117, %151, %cst_70 {dimension_numbers = #tpu.dot_dimension_numbers<[1], [0], [0], [1], [0, 0, 1, 1], [], []>} : vector<8x128xbf16>, vector<128x128xbf16>, vector<8x128xf32> -> vector<8x128xf32>
    %155 = arith.addf %153, %154 : vector<8x128xf32>
    %cst_71 = arith.constant 5.000000e-01 : f32
    %156 = vector.broadcast %cst_71 : f32 to vector<8x128xf32>
    %157 = arith.mulf %156, %155 : vector<8x128xf32>
    %158 = math.tanh %157 : vector<8x128xf32>
    %cst_72 = arith.constant 1.000000e+00 : f32
    %159 = vector.broadcast %cst_72 : f32 to vector<8x128xf32>
    %160 = arith.addf %159, %158 : vector<8x128xf32>
    %cst_73 = arith.constant 5.000000e-01 : f32
    %161 = vector.broadcast %cst_73 : f32 to vector<8x128xf32>
    %162 = arith.mulf %161, %160 : vector<8x128xf32>
    %163 = arith.mulf %144, %109 : vector<8x128xf32>
    %164 = arith.mulf %132, %150 : vector<8x128xf32>
    %165 = arith.addf %163, %164 : vector<8x128xf32>
    %166 = math.tanh %165 : vector<8x128xf32>
    %167 = arith.mulf %162, %166 : vector<8x128xf32>
    %168 = arith.truncf %167 : vector<8x128xf32> to vector<8x128xbf16>
    %169 = arith.index_cast %c2_i32 : i32 to index
    %c0_74 = arith.constant 0 : index
    %c0_75 = arith.constant 0 : index
    %170 = vector.load %arg3[%169, %c0_74, %c0_75] : memref<8x8x128xbf16, #tpu.memory_space<vmem>>, vector<1x8x128xbf16>
    %171 = vector.shape_cast %170 : vector<1x8x128xbf16> to vector<8x128xbf16>
    %172 = vector.shape_cast %168 : vector<8x128xbf16> to vector<1x8x128xbf16>
    tpu.vector_store %arg3[%169, %c0_74, %c0_75], %172 {strides = array<i32>} : memref<8x8x128xbf16, #tpu.memory_space<vmem>>, vector<1x8x128xbf16>,
    %c3_i32 = arith.constant 3 : i32
    %173 = arith.truncf %167 : vector<8x128xf32> to vector<8x128xbf16>
    %174 = arith.index_cast %c3_i32 : i32 to index
    %c0_76 = arith.constant 0 : index
    %c0_77 = arith.constant 0 : index
    %175 = vector.load %arg1[%174, %c0_76, %c0_77] : memref<8x8x512xbf16, #tpu.memory_space<vmem>>, vector<1x8x512xbf16>
    %176 = vector.shape_cast %175 : vector<1x8x512xbf16> to vector<8x512xbf16>
    %c0_78 = arith.constant 0 : index
    %c0_79 = arith.constant 0 : index
    %177 = vector.load %arg4[%c0_78, %c0_79] : memref<128x512xbf16, #tpu.memory_space<vmem>>, vector<128x128xbf16>
    %178 = vector.extract_strided_slice %176 {offsets = [0, 0], sizes = [8, 128], strides = [1, 1]} : vector<8x512xbf16> to vector<8x128xbf16>
    %179 = arith.extf %178 : vector<8x128xbf16> to vector<8x128xf32>
    %cst_80 = arith.constant dense<0.000000e+00> : vector<8x128xf32>
    %180 = tpu.matmul %173, %177, %cst_80 {dimension_numbers = #tpu.dot_dimension_numbers<[1], [0], [0], [1], [0, 0, 1, 1], [], []>} : vector<8x128xbf16>, vector<128x128xbf16>, vector<8x128xf32> -> vector<8x128xf32>
    %181 = arith.addf %179, %180 : vector<8x128xf32>
    %cst_81 = arith.constant 5.000000e-01 : f32
    %182 = vector.broadcast %cst_81 : f32 to vector<8x128xf32>
    %183 = arith.mulf %182, %181 : vector<8x128xf32>
    %184 = math.tanh %183 : vector<8x128xf32>
    %cst_82 = arith.constant 1.000000e+00 : f32
    %185 = vector.broadcast %cst_82 : f32 to vector<8x128xf32>
    %186 = arith.addf %185, %184 : vector<8x128xf32>
    %cst_83 = arith.constant 5.000000e-01 : f32
    %187 = vector.broadcast %cst_83 : f32 to vector<8x128xf32>
    %188 = arith.mulf %187, %186 : vector<8x128xf32>
    %c0_84 = arith.constant 0 : index
    %c128_85 = arith.constant 128 : index
    %189 = vector.load %arg4[%c0_84, %c128_85] : memref<128x512xbf16, #tpu.memory_space<vmem>>, vector<128x128xbf16>
    %190 = vector.extract_strided_slice %176 {offsets = [0, 128], sizes = [8, 128], strides = [1, 1]} : vector<8x512xbf16> to vector<8x128xbf16>
    %191 = arith.extf %190 : vector<8x128xbf16> to vector<8x128xf32>
    %cst_86 = arith.constant dense<0.000000e+00> : vector<8x128xf32>
    %192 = tpu.matmul %173, %189, %cst_86 {dimension_numbers = #tpu.dot_dimension_numbers<[1], [0], [0], [1], [0, 0, 1, 1], [], []>} : vector<8x128xbf16>, vector<128x128xbf16>, vector<8x128xf32> -> vector<8x128xf32>
    %193 = arith.addf %191, %192 : vector<8x128xf32>
    %cst_87 = arith.constant 5.000000e-01 : f32
    %194 = vector.broadcast %cst_87 : f32 to vector<8x128xf32>
    %195 = arith.mulf %194, %193 : vector<8x128xf32>
    %196 = math.tanh %195 : vector<8x128xf32>
    %cst_88 = arith.constant 1.000000e+00 : f32
    %197 = vector.broadcast %cst_88 : f32 to vector<8x128xf32>
    %198 = arith.addf %197, %196 : vector<8x128xf32>
    %cst_89 = arith.constant 5.000000e-01 : f32
    %199 = vector.broadcast %cst_89 : f32 to vector<8x128xf32>
    %200 = arith.mulf %199, %198 : vector<8x128xf32>
    %c0_90 = arith.constant 0 : index
    %c256_91 = arith.constant 256 : index
    %201 = vector.load %arg4[%c0_90, %c256_91] : memref<128x512xbf16, #tpu.memory_space<vmem>>, vector<128x128xbf16>
    %202 = vector.extract_strided_slice %176 {offsets = [0, 256], sizes = [8, 128], strides = [1, 1]} : vector<8x512xbf16> to vector<8x128xbf16>
    %203 = arith.extf %202 : vector<8x128xbf16> to vector<8x128xf32>
    %cst_92 = arith.constant dense<0.000000e+00> : vector<8x128xf32>
    %204 = tpu.matmul %173, %201, %cst_92 {dimension_numbers = #tpu.dot_dimension_numbers<[1], [0], [0], [1], [0, 0, 1, 1], [], []>} : vector<8x128xbf16>, vector<128x128xbf16>, vector<8x128xf32> -> vector<8x128xf32>
    %205 = arith.addf %203, %204 : vector<8x128xf32>
    %206 = math.tanh %205 : vector<8x128xf32>
    %c0_93 = arith.constant 0 : index
    %c384_94 = arith.constant 384 : index
    %207 = vector.load %arg4[%c0_93, %c384_94] : memref<128x512xbf16, #tpu.memory_space<vmem>>, vector<128x128xbf16>
    %208 = vector.extract_strided_slice %176 {offsets = [0, 384], sizes = [8, 128], strides = [1, 1]} : vector<8x512xbf16> to vector<8x128xbf16>
    %209 = arith.extf %208 : vector<8x128xbf16> to vector<8x128xf32>
    %cst_95 = arith.constant dense<0.000000e+00> : vector<8x128xf32>
    %210 = tpu.matmul %173, %207, %cst_95 {dimension_numbers = #tpu.dot_dimension_numbers<[1], [0], [0], [1], [0, 0, 1, 1], [], []>} : vector<8x128xbf16>, vector<128x128xbf16>, vector<8x128xf32> -> vector<8x128xf32>
    %211 = arith.addf %209, %210 : vector<8x128xf32>
    %cst_96 = arith.constant 5.000000e-01 : f32
    %212 = vector.broadcast %cst_96 : f32 to vector<8x128xf32>
    %213 = arith.mulf %212, %211 : vector<8x128xf32>
    %214 = math.tanh %213 : vector<8x128xf32>
    %cst_97 = arith.constant 1.000000e+00 : f32
    %215 = vector.broadcast %cst_97 : f32 to vector<8x128xf32>
    %216 = arith.addf %215, %214 : vector<8x128xf32>
    %cst_98 = arith.constant 5.000000e-01 : f32
    %217 = vector.broadcast %cst_98 : f32 to vector<8x128xf32>
    %218 = arith.mulf %217, %216 : vector<8x128xf32>
    %219 = arith.mulf %200, %165 : vector<8x128xf32>
    %220 = arith.mulf %188, %206 : vector<8x128xf32>
    %221 = arith.addf %219, %220 : vector<8x128xf32>
    %222 = math.tanh %221 : vector<8x128xf32>
    %223 = arith.mulf %218, %222 : vector<8x128xf32>
    %224 = arith.truncf %223 : vector<8x128xf32> to vector<8x128xbf16>
    %225 = arith.index_cast %c3_i32 : i32 to index
    %c0_99 = arith.constant 0 : index
    %c0_100 = arith.constant 0 : index
    %226 = vector.load %arg3[%225, %c0_99, %c0_100] : memref<8x8x128xbf16, #tpu.memory_space<vmem>>, vector<1x8x128xbf16>
    %227 = vector.shape_cast %226 : vector<1x8x128xbf16> to vector<8x128xbf16>
    %228 = vector.shape_cast %224 : vector<8x128xbf16> to vector<1x8x128xbf16>
    tpu.vector_store %arg3[%225, %c0_99, %c0_100], %228 {strides = array<i32>} : memref<8x8x128xbf16, #tpu.memory_space<vmem>>, vector<1x8x128xbf16>,
    %c4_i32 = arith.constant 4 : i32
    %229 = arith.truncf %223 : vector<8x128xf32> to vector<8x128xbf16>
    %230 = arith.index_cast %c4_i32 : i32 to index
    %c0_101 = arith.constant 0 : index
    %c0_102 = arith.constant 0 : index
    %231 = vector.load %arg1[%230, %c0_101, %c0_102] : memref<8x8x512xbf16, #tpu.memory_space<vmem>>, vector<1x8x512xbf16>
    %232 = vector.shape_cast %231 : vector<1x8x512xbf16> to vector<8x512xbf16>
    %c0_103 = arith.constant 0 : index
    %c0_104 = arith.constant 0 : index
    %233 = vector.load %arg4[%c0_103, %c0_104] : memref<128x512xbf16, #tpu.memory_space<vmem>>, vector<128x128xbf16>
    %234 = vector.extract_strided_slice %232 {offsets = [0, 0], sizes = [8, 128], strides = [1, 1]} : vector<8x512xbf16> to vector<8x128xbf16>
    %235 = arith.extf %234 : vector<8x128xbf16> to vector<8x128xf32>
    %cst_105 = arith.constant dense<0.000000e+00> : vector<8x128xf32>
    %236 = tpu.matmul %229, %233, %cst_105 {dimension_numbers = #tpu.dot_dimension_numbers<[1], [0], [0], [1], [0, 0, 1, 1], [], []>} : vector<8x128xbf16>, vector<128x128xbf16>, vector<8x128xf32> -> vector<8x128xf32>
    %237 = arith.addf %235, %236 : vector<8x128xf32>
    %cst_106 = arith.constant 5.000000e-01 : f32
    %238 = vector.broadcast %cst_106 : f32 to vector<8x128xf32>
    %239 = arith.mulf %238, %237 : vector<8x128xf32>
    %240 = math.tanh %239 : vector<8x128xf32>
    %cst_107 = arith.constant 1.000000e+00 : f32
    %241 = vector.broadcast %cst_107 : f32 to vector<8x128xf32>
    %242 = arith.addf %241, %240 : vector<8x128xf32>
    %cst_108 = arith.constant 5.000000e-01 : f32
    %243 = vector.broadcast %cst_108 : f32 to vector<8x128xf32>
    %244 = arith.mulf %243, %242 : vector<8x128xf32>
    %c0_109 = arith.constant 0 : index
    %c128_110 = arith.constant 128 : index
    %245 = vector.load %arg4[%c0_109, %c128_110] : memref<128x512xbf16, #tpu.memory_space<vmem>>, vector<128x128xbf16>
    %246 = vector.extract_strided_slice %232 {offsets = [0, 128], sizes = [8, 128], strides = [1, 1]} : vector<8x512xbf16> to vector<8x128xbf16>
    %247 = arith.extf %246 : vector<8x128xbf16> to vector<8x128xf32>
    %cst_111 = arith.constant dense<0.000000e+00> : vector<8x128xf32>
    %248 = tpu.matmul %229, %245, %cst_111 {dimension_numbers = #tpu.dot_dimension_numbers<[1], [0], [0], [1], [0, 0, 1, 1], [], []>} : vector<8x128xbf16>, vector<128x128xbf16>, vector<8x128xf32> -> vector<8x128xf32>
    %249 = arith.addf %247, %248 : vector<8x128xf32>
    %cst_112 = arith.constant 5.000000e-01 : f32
    %250 = vector.broadcast %cst_112 : f32 to vector<8x128xf32>
    %251 = arith.mulf %250, %249 : vector<8x128xf32>
    %252 = math.tanh %251 : vector<8x128xf32>
    %cst_113 = arith.constant 1.000000e+00 : f32
    %253 = vector.broadcast %cst_113 : f32 to vector<8x128xf32>
    %254 = arith.addf %253, %252 : vector<8x128xf32>
    %cst_114 = arith.constant 5.000000e-01 : f32
    %255 = vector.broadcast %cst_114 : f32 to vector<8x128xf32>
    %256 = arith.mulf %255, %254 : vector<8x128xf32>
    %c0_115 = arith.constant 0 : index
    %c256_116 = arith.constant 256 : index
    %257 = vector.load %arg4[%c0_115, %c256_116] : memref<128x512xbf16, #tpu.memory_space<vmem>>, vector<128x128xbf16>
    %258 = vector.extract_strided_slice %232 {offsets = [0, 256], sizes = [8, 128], strides = [1, 1]} : vector<8x512xbf16> to vector<8x128xbf16>
    %259 = arith.extf %258 : vector<8x128xbf16> to vector<8x128xf32>
    %cst_117 = arith.constant dense<0.000000e+00> : vector<8x128xf32>
    %260 = tpu.matmul %229, %257, %cst_117 {dimension_numbers = #tpu.dot_dimension_numbers<[1], [0], [0], [1], [0, 0, 1, 1], [], []>} : vector<8x128xbf16>, vector<128x128xbf16>, vector<8x128xf32> -> vector<8x128xf32>
    %261 = arith.addf %259, %260 : vector<8x128xf32>
    %262 = math.tanh %261 : vector<8x128xf32>
    %c0_118 = arith.constant 0 : index
    %c384_119 = arith.constant 384 : index
    %263 = vector.load %arg4[%c0_118, %c384_119] : memref<128x512xbf16, #tpu.memory_space<vmem>>, vector<128x128xbf16>
    %264 = vector.extract_strided_slice %232 {offsets = [0, 384], sizes = [8, 128], strides = [1, 1]} : vector<8x512xbf16> to vector<8x128xbf16>
    %265 = arith.extf %264 : vector<8x128xbf16> to vector<8x128xf32>
    %cst_120 = arith.constant dense<0.000000e+00> : vector<8x128xf32>
    %266 = tpu.matmul %229, %263, %cst_120 {dimension_numbers = #tpu.dot_dimension_numbers<[1], [0], [0], [1], [0, 0, 1, 1], [], []>} : vector<8x128xbf16>, vector<128x128xbf16>, vector<8x128xf32> -> vector<8x128xf32>
    %267 = arith.addf %265, %266 : vector<8x128xf32>
    %cst_121 = arith.constant 5.000000e-01 : f32
    %268 = vector.broadcast %cst_121 : f32 to vector<8x128xf32>
    %269 = arith.mulf %268, %267 : vector<8x128xf32>
    %270 = math.tanh %269 : vector<8x128xf32>
    %cst_122 = arith.constant 1.000000e+00 : f32
    %271 = vector.broadcast %cst_122 : f32 to vector<8x128xf32>
    %272 = arith.addf %271, %270 : vector<8x128xf32>
    %cst_123 = arith.constant 5.000000e-01 : f32
    %273 = vector.broadcast %cst_123 : f32 to vector<8x128xf32>
    %274 = arith.mulf %273, %272 : vector<8x128xf32>
    %275 = arith.mulf %256, %221 : vector<8x128xf32>
    %276 = arith.mulf %244, %262 : vector<8x128xf32>
    %277 = arith.addf %275, %276 : vector<8x128xf32>
    %278 = math.tanh %277 : vector<8x128xf32>
    %279 = arith.mulf %274, %278 : vector<8x128xf32>
    %280 = arith.truncf %279 : vector<8x128xf32> to vector<8x128xbf16>
    %281 = arith.index_cast %c4_i32 : i32 to index
    %c0_124 = arith.constant 0 : index
    %c0_125 = arith.constant 0 : index
    %282 = vector.load %arg3[%281, %c0_124, %c0_125] : memref<8x8x128xbf16, #tpu.memory_space<vmem>>, vector<1x8x128xbf16>
    %283 = vector.shape_cast %282 : vector<1x8x128xbf16> to vector<8x128xbf16>
    %284 = vector.shape_cast %280 : vector<8x128xbf16> to vector<1x8x128xbf16>
    tpu.vector_store %arg3[%281, %c0_124, %c0_125], %284 {strides = array<i32>} : memref<8x8x128xbf16, #tpu.memory_space<vmem>>, vector<1x8x128xbf16>,
    %c5_i32 = arith.constant 5 : i32
    %285 = arith.truncf %279 : vector<8x128xf32> to vector<8x128xbf16>
    %286 = arith.index_cast %c5_i32 : i32 to index
    %c0_126 = arith.constant 0 : index
    %c0_127 = arith.constant 0 : index
    %287 = vector.load %arg1[%286, %c0_126, %c0_127] : memref<8x8x512xbf16, #tpu.memory_space<vmem>>, vector<1x8x512xbf16>
    %288 = vector.shape_cast %287 : vector<1x8x512xbf16> to vector<8x512xbf16>
    %c0_128 = arith.constant 0 : index
    %c0_129 = arith.constant 0 : index
    %289 = vector.load %arg4[%c0_128, %c0_129] : memref<128x512xbf16, #tpu.memory_space<vmem>>, vector<128x128xbf16>
    %290 = vector.extract_strided_slice %288 {offsets = [0, 0], sizes = [8, 128], strides = [1, 1]} : vector<8x512xbf16> to vector<8x128xbf16>
    %291 = arith.extf %290 : vector<8x128xbf16> to vector<8x128xf32>
    %cst_130 = arith.constant dense<0.000000e+00> : vector<8x128xf32>
    %292 = tpu.matmul %285, %289, %cst_130 {dimension_numbers = #tpu.dot_dimension_numbers<[1], [0], [0], [1], [0, 0, 1, 1], [], []>} : vector<8x128xbf16>, vector<128x128xbf16>, vector<8x128xf32> -> vector<8x128xf32>
    %293 = arith.addf %291, %292 : vector<8x128xf32>
    %cst_131 = arith.constant 5.000000e-01 : f32
    %294 = vector.broadcast %cst_131 : f32 to vector<8x128xf32>
    %295 = arith.mulf %294, %293 : vector<8x128xf32>
    %296 = math.tanh %295 : vector<8x128xf32>
    %cst_132 = arith.constant 1.000000e+00 : f32
    %297 = vector.broadcast %cst_132 : f32 to vector<8x128xf32>
    %298 = arith.addf %297, %296 : vector<8x128xf32>
    %cst_133 = arith.constant 5.000000e-01 : f32
    %299 = vector.broadcast %cst_133 : f32 to vector<8x128xf32>
    %300 = arith.mulf %299, %298 : vector<8x128xf32>
    %c0_134 = arith.constant 0 : index
    %c128_135 = arith.constant 128 : index
    %301 = vector.load %arg4[%c0_134, %c128_135] : memref<128x512xbf16, #tpu.memory_space<vmem>>, vector<128x128xbf16>
    %302 = vector.extract_strided_slice %288 {offsets = [0, 128], sizes = [8, 128], strides = [1, 1]} : vector<8x512xbf16> to vector<8x128xbf16>
    %303 = arith.extf %302 : vector<8x128xbf16> to vector<8x128xf32>
    %cst_136 = arith.constant dense<0.000000e+00> : vector<8x128xf32>
    %304 = tpu.matmul %285, %301, %cst_136 {dimension_numbers = #tpu.dot_dimension_numbers<[1], [0], [0], [1], [0, 0, 1, 1], [], []>} : vector<8x128xbf16>, vector<128x128xbf16>, vector<8x128xf32> -> vector<8x128xf32>
    %305 = arith.addf %303, %304 : vector<8x128xf32>
    %cst_137 = arith.constant 5.000000e-01 : f32
    %306 = vector.broadcast %cst_137 : f32 to vector<8x128xf32>
    %307 = arith.mulf %306, %305 : vector<8x128xf32>
    %308 = math.tanh %307 : vector<8x128xf32>
    %cst_138 = arith.constant 1.000000e+00 : f32
    %309 = vector.broadcast %cst_138 : f32 to vector<8x128xf32>
    %310 = arith.addf %309, %308 : vector<8x128xf32>
    %cst_139 = arith.constant 5.000000e-01 : f32
    %311 = vector.broadcast %cst_139 : f32 to vector<8x128xf32>
    %312 = arith.mulf %311, %310 : vector<8x128xf32>
    %c0_140 = arith.constant 0 : index
    %c256_141 = arith.constant 256 : index
    %313 = vector.load %arg4[%c0_140, %c256_141] : memref<128x512xbf16, #tpu.memory_space<vmem>>, vector<128x128xbf16>
    %314 = vector.extract_strided_slice %288 {offsets = [0, 256], sizes = [8, 128], strides = [1, 1]} : vector<8x512xbf16> to vector<8x128xbf16>
    %315 = arith.extf %314 : vector<8x128xbf16> to vector<8x128xf32>
    %cst_142 = arith.constant dense<0.000000e+00> : vector<8x128xf32>
    %316 = tpu.matmul %285, %313, %cst_142 {dimension_numbers = #tpu.dot_dimension_numbers<[1], [0], [0], [1], [0, 0, 1, 1], [], []>} : vector<8x128xbf16>, vector<128x128xbf16>, vector<8x128xf32> -> vector<8x128xf32>
    %317 = arith.addf %315, %316 : vector<8x128xf32>
    %318 = math.tanh %317 : vector<8x128xf32>
    %c0_143 = arith.constant 0 : index
    %c384_144 = arith.constant 384 : index
    %319 = vector.load %arg4[%c0_143, %c384_144] : memref<128x512xbf16, #tpu.memory_space<vmem>>, vector<128x128xbf16>
    %320 = vector.extract_strided_slice %288 {offsets = [0, 384], sizes = [8, 128], strides = [1, 1]} : vector<8x512xbf16> to vector<8x128xbf16>
    %321 = arith.extf %320 : vector<8x128xbf16> to vector<8x128xf32>
    %cst_145 = arith.constant dense<0.000000e+00> : vector<8x128xf32>
    %322 = tpu.matmul %285, %319, %cst_145 {dimension_numbers = #tpu.dot_dimension_numbers<[1], [0], [0], [1], [0, 0, 1, 1], [], []>} : vector<8x128xbf16>, vector<128x128xbf16>, vector<8x128xf32> -> vector<8x128xf32>
    %323 = arith.addf %321, %322 : vector<8x128xf32>
    %cst_146 = arith.constant 5.000000e-01 : f32
    %324 = vector.broadcast %cst_146 : f32 to vector<8x128xf32>
    %325 = arith.mulf %324, %323 : vector<8x128xf32>
    %326 = math.tanh %325 : vector<8x128xf32>
    %cst_147 = arith.constant 1.000000e+00 : f32
    %327 = vector.broadcast %cst_147 : f32 to vector<8x128xf32>
    %328 = arith.addf %327, %326 : vector<8x128xf32>
    %cst_148 = arith.constant 5.000000e-01 : f32
    %329 = vector.broadcast %cst_148 : f32 to vector<8x128xf32>
    %330 = arith.mulf %329, %328 : vector<8x128xf32>
    %331 = arith.mulf %312, %277 : vector<8x128xf32>
    %332 = arith.mulf %300, %318 : vector<8x128xf32>
    %333 = arith.addf %331, %332 : vector<8x128xf32>
    %334 = math.tanh %333 : vector<8x128xf32>
    %335 = arith.mulf %330, %334 : vector<8x128xf32>
    %336 = arith.truncf %335 : vector<8x128xf32> to vector<8x128xbf16>
    %337 = arith.index_cast %c5_i32 : i32 to index
    %c0_149 = arith.constant 0 : index
    %c0_150 = arith.constant 0 : index
    %338 = vector.load %arg3[%337, %c0_149, %c0_150] : memref<8x8x128xbf16, #tpu.memory_space<vmem>>, vector<1x8x128xbf16>
    %339 = vector.shape_cast %338 : vector<1x8x128xbf16> to vector<8x128xbf16>
    %340 = vector.shape_cast %336 : vector<8x128xbf16> to vector<1x8x128xbf16>
    tpu.vector_store %arg3[%337, %c0_149, %c0_150], %340 {strides = array<i32>} : memref<8x8x128xbf16, #tpu.memory_space<vmem>>, vector<1x8x128xbf16>,
    %c6_i32 = arith.constant 6 : i32
    %341 = arith.truncf %335 : vector<8x128xf32> to vector<8x128xbf16>
    %342 = arith.index_cast %c6_i32 : i32 to index
    %c0_151 = arith.constant 0 : index
    %c0_152 = arith.constant 0 : index
    %343 = vector.load %arg1[%342, %c0_151, %c0_152] : memref<8x8x512xbf16, #tpu.memory_space<vmem>>, vector<1x8x512xbf16>
    %344 = vector.shape_cast %343 : vector<1x8x512xbf16> to vector<8x512xbf16>
    %c0_153 = arith.constant 0 : index
    %c0_154 = arith.constant 0 : index
    %345 = vector.load %arg4[%c0_153, %c0_154] : memref<128x512xbf16, #tpu.memory_space<vmem>>, vector<128x128xbf16>
    %346 = vector.extract_strided_slice %344 {offsets = [0, 0], sizes = [8, 128], strides = [1, 1]} : vector<8x512xbf16> to vector<8x128xbf16>
    %347 = arith.extf %346 : vector<8x128xbf16> to vector<8x128xf32>
    %cst_155 = arith.constant dense<0.000000e+00> : vector<8x128xf32>
    %348 = tpu.matmul %341, %345, %cst_155 {dimension_numbers = #tpu.dot_dimension_numbers<[1], [0], [0], [1], [0, 0, 1, 1], [], []>} : vector<8x128xbf16>, vector<128x128xbf16>, vector<8x128xf32> -> vector<8x128xf32>
    %349 = arith.addf %347, %348 : vector<8x128xf32>
    %cst_156 = arith.constant 5.000000e-01 : f32
    %350 = vector.broadcast %cst_156 : f32 to vector<8x128xf32>
    %351 = arith.mulf %350, %349 : vector<8x128xf32>
    %352 = math.tanh %351 : vector<8x128xf32>
    %cst_157 = arith.constant 1.000000e+00 : f32
    %353 = vector.broadcast %cst_157 : f32 to vector<8x128xf32>
    %354 = arith.addf %353, %352 : vector<8x128xf32>
    %cst_158 = arith.constant 5.000000e-01 : f32
    %355 = vector.broadcast %cst_158 : f32 to vector<8x128xf32>
    %356 = arith.mulf %355, %354 : vector<8x128xf32>
    %c0_159 = arith.constant 0 : index
    %c128_160 = arith.constant 128 : index
    %357 = vector.load %arg4[%c0_159, %c128_160] : memref<128x512xbf16, #tpu.memory_space<vmem>>, vector<128x128xbf16>
    %358 = vector.extract_strided_slice %344 {offsets = [0, 128], sizes = [8, 128], strides = [1, 1]} : vector<8x512xbf16> to vector<8x128xbf16>
    %359 = arith.extf %358 : vector<8x128xbf16> to vector<8x128xf32>
    %cst_161 = arith.constant dense<0.000000e+00> : vector<8x128xf32>
    %360 = tpu.matmul %341, %357, %cst_161 {dimension_numbers = #tpu.dot_dimension_numbers<[1], [0], [0], [1], [0, 0, 1, 1], [], []>} : vector<8x128xbf16>, vector<128x128xbf16>, vector<8x128xf32> -> vector<8x128xf32>
    %361 = arith.addf %359, %360 : vector<8x128xf32>
    %cst_162 = arith.constant 5.000000e-01 : f32
    %362 = vector.broadcast %cst_162 : f32 to vector<8x128xf32>
    %363 = arith.mulf %362, %361 : vector<8x128xf32>
    %364 = math.tanh %363 : vector<8x128xf32>
    %cst_163 = arith.constant 1.000000e+00 : f32
    %365 = vector.broadcast %cst_163 : f32 to vector<8x128xf32>
    %366 = arith.addf %365, %364 : vector<8x128xf32>
    %cst_164 = arith.constant 5.000000e-01 : f32
    %367 = vector.broadcast %cst_164 : f32 to vector<8x128xf32>
    %368 = arith.mulf %367, %366 : vector<8x128xf32>
    %c0_165 = arith.constant 0 : index
    %c256_166 = arith.constant 256 : index
    %369 = vector.load %arg4[%c0_165, %c256_166] : memref<128x512xbf16, #tpu.memory_space<vmem>>, vector<128x128xbf16>
    %370 = vector.extract_strided_slice %344 {offsets = [0, 256], sizes = [8, 128], strides = [1, 1]} : vector<8x512xbf16> to vector<8x128xbf16>
    %371 = arith.extf %370 : vector<8x128xbf16> to vector<8x128xf32>
    %cst_167 = arith.constant dense<0.000000e+00> : vector<8x128xf32>
    %372 = tpu.matmul %341, %369, %cst_167 {dimension_numbers = #tpu.dot_dimension_numbers<[1], [0], [0], [1], [0, 0, 1, 1], [], []>} : vector<8x128xbf16>, vector<128x128xbf16>, vector<8x128xf32> -> vector<8x128xf32>
    %373 = arith.addf %371, %372 : vector<8x128xf32>
    %374 = math.tanh %373 : vector<8x128xf32>
    %c0_168 = arith.constant 0 : index
    %c384_169 = arith.constant 384 : index
    %375 = vector.load %arg4[%c0_168, %c384_169] : memref<128x512xbf16, #tpu.memory_space<vmem>>, vector<128x128xbf16>
    %376 = vector.extract_strided_slice %344 {offsets = [0, 384], sizes = [8, 128], strides = [1, 1]} : vector<8x512xbf16> to vector<8x128xbf16>
    %377 = arith.extf %376 : vector<8x128xbf16> to vector<8x128xf32>
    %cst_170 = arith.constant dense<0.000000e+00> : vector<8x128xf32>
    %378 = tpu.matmul %341, %375, %cst_170 {dimension_numbers = #tpu.dot_dimension_numbers<[1], [0], [0], [1], [0, 0, 1, 1], [], []>} : vector<8x128xbf16>, vector<128x128xbf16>, vector<8x128xf32> -> vector<8x128xf32>
    %379 = arith.addf %377, %378 : vector<8x128xf32>
    %cst_171 = arith.constant 5.000000e-01 : f32
    %380 = vector.broadcast %cst_171 : f32 to vector<8x128xf32>
    %381 = arith.mulf %380, %379 : vector<8x128xf32>
    %382 = math.tanh %381 : vector<8x128xf32>
    %cst_172 = arith.constant 1.000000e+00 : f32
    %383 = vector.broadcast %cst_172 : f32 to vector<8x128xf32>
    %384 = arith.addf %383, %382 : vector<8x128xf32>
    %cst_173 = arith.constant 5.000000e-01 : f32
    %385 = vector.broadcast %cst_173 : f32 to vector<8x128xf32>
    %386 = arith.mulf %385, %384 : vector<8x128xf32>
    %387 = arith.mulf %368, %333 : vector<8x128xf32>
    %388 = arith.mulf %356, %374 : vector<8x128xf32>
    %389 = arith.addf %387, %388 : vector<8x128xf32>
    %390 = math.tanh %389 : vector<8x128xf32>
    %391 = arith.mulf %386, %390 : vector<8x128xf32>
    %392 = arith.truncf %391 : vector<8x128xf32> to vector<8x128xbf16>
    %393 = arith.index_cast %c6_i32 : i32 to index
    %c0_174 = arith.constant 0 : index
    %c0_175 = arith.constant 0 : index
    %394 = vector.load %arg3[%393, %c0_174, %c0_175] : memref<8x8x128xbf16, #tpu.memory_space<vmem>>, vector<1x8x128xbf16>
    %395 = vector.shape_cast %394 : vector<1x8x128xbf16> to vector<8x128xbf16>
    %396 = vector.shape_cast %392 : vector<8x128xbf16> to vector<1x8x128xbf16>
    tpu.vector_store %arg3[%393, %c0_174, %c0_175], %396 {strides = array<i32>} : memref<8x8x128xbf16, #tpu.memory_space<vmem>>, vector<1x8x128xbf16>,
    %c7_i32 = arith.constant 7 : i32
    %397 = arith.truncf %391 : vector<8x128xf32> to vector<8x128xbf16>
    %398 = arith.index_cast %c7_i32 : i32 to index
    %c0_176 = arith.constant 0 : index
    %c0_177 = arith.constant 0 : index
    %399 = vector.load %arg1[%398, %c0_176, %c0_177] : memref<8x8x512xbf16, #tpu.memory_space<vmem>>, vector<1x8x512xbf16>
    %400 = vector.shape_cast %399 : vector<1x8x512xbf16> to vector<8x512xbf16>
    %c0_178 = arith.constant 0 : index
    %c0_179 = arith.constant 0 : index
    %401 = vector.load %arg4[%c0_178, %c0_179] : memref<128x512xbf16, #tpu.memory_space<vmem>>, vector<128x128xbf16>
    %402 = vector.extract_strided_slice %400 {offsets = [0, 0], sizes = [8, 128], strides = [1, 1]} : vector<8x512xbf16> to vector<8x128xbf16>
    %403 = arith.extf %402 : vector<8x128xbf16> to vector<8x128xf32>
    %cst_180 = arith.constant dense<0.000000e+00> : vector<8x128xf32>
    %404 = tpu.matmul %397, %401, %cst_180 {dimension_numbers = #tpu.dot_dimension_numbers<[1], [0], [0], [1], [0, 0, 1, 1], [], []>} : vector<8x128xbf16>, vector<128x128xbf16>, vector<8x128xf32> -> vector<8x128xf32>
    %405 = arith.addf %403, %404 : vector<8x128xf32>
    %cst_181 = arith.constant 5.000000e-01 : f32
    %406 = vector.broadcast %cst_181 : f32 to vector<8x128xf32>
    %407 = arith.mulf %406, %405 : vector<8x128xf32>
    %408 = math.tanh %407 : vector<8x128xf32>
    %cst_182 = arith.constant 1.000000e+00 : f32
    %409 = vector.broadcast %cst_182 : f32 to vector<8x128xf32>
    %410 = arith.addf %409, %408 : vector<8x128xf32>
    %cst_183 = arith.constant 5.000000e-01 : f32
    %411 = vector.broadcast %cst_183 : f32 to vector<8x128xf32>
    %412 = arith.mulf %411, %410 : vector<8x128xf32>
    %c0_184 = arith.constant 0 : index
    %c128_185 = arith.constant 128 : index
    %413 = vector.load %arg4[%c0_184, %c128_185] : memref<128x512xbf16, #tpu.memory_space<vmem>>, vector<128x128xbf16>
    %414 = vector.extract_strided_slice %400 {offsets = [0, 128], sizes = [8, 128], strides = [1, 1]} : vector<8x512xbf16> to vector<8x128xbf16>
    %415 = arith.extf %414 : vector<8x128xbf16> to vector<8x128xf32>
    %cst_186 = arith.constant dense<0.000000e+00> : vector<8x128xf32>
    %416 = tpu.matmul %397, %413, %cst_186 {dimension_numbers = #tpu.dot_dimension_numbers<[1], [0], [0], [1], [0, 0, 1, 1], [], []>} : vector<8x128xbf16>, vector<128x128xbf16>, vector<8x128xf32> -> vector<8x128xf32>
    %417 = arith.addf %415, %416 : vector<8x128xf32>
    %cst_187 = arith.constant 5.000000e-01 : f32
    %418 = vector.broadcast %cst_187 : f32 to vector<8x128xf32>
    %419 = arith.mulf %418, %417 : vector<8x128xf32>
    %420 = math.tanh %419 : vector<8x128xf32>
    %cst_188 = arith.constant 1.000000e+00 : f32
    %421 = vector.broadcast %cst_188 : f32 to vector<8x128xf32>
    %422 = arith.addf %421, %420 : vector<8x128xf32>
    %cst_189 = arith.constant 5.000000e-01 : f32
    %423 = vector.broadcast %cst_189 : f32 to vector<8x128xf32>
    %424 = arith.mulf %423, %422 : vector<8x128xf32>
    %c0_190 = arith.constant 0 : index
    %c256_191 = arith.constant 256 : index
    %425 = vector.load %arg4[%c0_190, %c256_191] : memref<128x512xbf16, #tpu.memory_space<vmem>>, vector<128x128xbf16>
    %426 = vector.extract_strided_slice %400 {offsets = [0, 256], sizes = [8, 128], strides = [1, 1]} : vector<8x512xbf16> to vector<8x128xbf16>
    %427 = arith.extf %426 : vector<8x128xbf16> to vector<8x128xf32>
    %cst_192 = arith.constant dense<0.000000e+00> : vector<8x128xf32>
    %428 = tpu.matmul %397, %425, %cst_192 {dimension_numbers = #tpu.dot_dimension_numbers<[1], [0], [0], [1], [0, 0, 1, 1], [], []>} : vector<8x128xbf16>, vector<128x128xbf16>, vector<8x128xf32> -> vector<8x128xf32>
    %429 = arith.addf %427, %428 : vector<8x128xf32>
    %430 = math.tanh %429 : vector<8x128xf32>
    %c0_193 = arith.constant 0 : index
    %c384_194 = arith.constant 384 : index
    %431 = vector.load %arg4[%c0_193, %c384_194] : memref<128x512xbf16, #tpu.memory_space<vmem>>, vector<128x128xbf16>
    %432 = vector.extract_strided_slice %400 {offsets = [0, 384], sizes = [8, 128], strides = [1, 1]} : vector<8x512xbf16> to vector<8x128xbf16>
    %433 = arith.extf %432 : vector<8x128xbf16> to vector<8x128xf32>
    %cst_195 = arith.constant dense<0.000000e+00> : vector<8x128xf32>
    %434 = tpu.matmul %397, %431, %cst_195 {dimension_numbers = #tpu.dot_dimension_numbers<[1], [0], [0], [1], [0, 0, 1, 1], [], []>} : vector<8x128xbf16>, vector<128x128xbf16>, vector<8x128xf32> -> vector<8x128xf32>
    %435 = arith.addf %433, %434 : vector<8x128xf32>
    %cst_196 = arith.constant 5.000000e-01 : f32
    %436 = vector.broadcast %cst_196 : f32 to vector<8x128xf32>
    %437 = arith.mulf %436, %435 : vector<8x128xf32>
    %438 = math.tanh %437 : vector<8x128xf32>
    %cst_197 = arith.constant 1.000000e+00 : f32
    %439 = vector.broadcast %cst_197 : f32 to vector<8x128xf32>
    %440 = arith.addf %439, %438 : vector<8x128xf32>
    %cst_198 = arith.constant 5.000000e-01 : f32
    %441 = vector.broadcast %cst_198 : f32 to vector<8x128xf32>
    %442 = arith.mulf %441, %440 : vector<8x128xf32>
    %443 = arith.mulf %424, %389 : vector<8x128xf32>
    %444 = arith.mulf %412, %430 : vector<8x128xf32>
    %445 = arith.addf %443, %444 : vector<8x128xf32>
    %446 = math.tanh %445 : vector<8x128xf32>
    %447 = arith.mulf %442, %446 : vector<8x128xf32>
    %448 = arith.truncf %447 : vector<8x128xf32> to vector<8x128xbf16>
    %449 = arith.index_cast %c7_i32 : i32 to index
    %c0_199 = arith.constant 0 : index
    %c0_200 = arith.constant 0 : index
    %450 = vector.load %arg3[%449, %c0_199, %c0_200] : memref<8x8x128xbf16, #tpu.memory_space<vmem>>, vector<1x8x128xbf16>
    %451 = vector.shape_cast %450 : vector<1x8x128xbf16> to vector<8x128xbf16>
    %452 = vector.shape_cast %448 : vector<8x128xbf16> to vector<1x8x128xbf16>
    tpu.vector_store %arg3[%449, %c0_199, %c0_200], %452 {strides = array<i32>} : memref<8x8x128xbf16, #tpu.memory_space<vmem>>, vector<1x8x128xbf16>,
    %c8_i32 = arith.constant 8 : i32
    %c0_201 = arith.constant 0 : index
    %c0_202 = arith.constant 0 : index
    %453 = vector.load %arg5[%c0_201, %c0_202] : memref<8x128xf32, #tpu.memory_space<vmem>>, vector<8x128xf32>
    tpu.vector_store %arg5[%c0_201, %c0_202], %447 {strides = array<i32>} : memref<8x128xf32, #tpu.memory_space<vmem>>, vector<8x128xf32>,
    %c0_203 = arith.constant 0 : index
    %c0_204 = arith.constant 0 : index
    %454 = vector.load %arg6[%c0_203, %c0_204] : memref<8x128xf32, #tpu.memory_space<vmem>>, vector<8x128xf32>
    tpu.vector_store %arg6[%c0_203, %c0_204], %445 {strides = array<i32>} : memref<8x128xf32, #tpu.memory_space<vmem>>, vector<8x128xf32>,
    return
  }
  func.func @transform_0(%arg0: i32) -> (i32, i32, i32) {
    %c0_i32 = arith.constant 0 : i32
    %c0_i32_0 = arith.constant 0 : i32
    %c0_i32_1 = arith.constant 0 : i32
    return %arg0, %c0_i32, %c0_i32_0 : i32, i32, i32
  }
  func.func @transform_2(%arg0: i32) -> (i32, i32, i32) {
    %c0_i32 = arith.constant 0 : i32
    %c0_i32_0 = arith.constant 0 : i32
    %c0_i32_1 = arith.constant 0 : i32
    return %arg0, %c0_i32, %c0_i32_0 : i32, i32, i32
  }
}

</mosaic_0001>

<bundles_post_ra>
// kernel: lstm_model_forward.4
= control target key start
LH: loop header
LB: loop body
LE: loop exit
PB: predicated region body
PF: predicated region fallthrough
CT: control target
= control target key end

     0   :  { %s18_s9 = sld [smem:[#allocation0]]   ;;  %s2947_s10 = smov [#allocation2]   ;;  %s3781_s0 = inlined_call_operand.vmem [shape: bf16[8,8,512], index: 0, kind: input, shape index: {}]   ;;  %s3782_s1 = inlined_call_operand.hbm [shape: bf16[128,512], index: 1, kind: input, shape index: {}]   ;;  %s3783_s2 = inlined_call_operand.vmem [shape: bf16[8,8,128], index: 2, kind: output, shape index: {}]  }
   0x1   :  { %s26_s11 = sshll.u32 %s2947_s10, 4  ;;  %s2948_s12 = smov 512   ;;  %s27_s11 = int_to_ptr.vmem [resolvable:$true] %s26_s11 }
   0x2   :  { %30 = sst [smem:[#allocation7]] %s2948_s12  ;;  %s2949_s13 = smov 4  }
   0x3   :  { %32 = sst [smem:[#allocation7 + $0x1]] %s2948_s12  ;;  %s2950_s14 = smov 64  }
   0x4   :  { %34 = sst [smem:[#allocation7 + $0x2]] %s2949_s13  ;;  %s2951_s16 = smov 128  }
   0x5   :  { %36 = sst [smem:[#allocation7 + $0x3]] %s2950_s14  ;;  %s2952_s18 = smov 2  }
   0x6   :  { %s1902_s15 = sshll.u32 %s18_s9, 26  ;;  %38 = sst [smem:[#allocation7 + $0x4]] %s2951_s16 }
   0x7   :  { %s1903_s17 = sadd.s32 134217728, %s1902_s15  ;;  %40 = sst [smem:[#allocation7 + $0x5]] %s2952_s18 }
   0x8   :  { %s2953_s19 = smov 256   ;;  %44 = sst [smem:[#allocation7 + $0x7]] %s2950_s14 }
   0x9   :  { %42 = sst [smem:[#allocation7 + $0x6]] %s2953_s19  ;;  %s2954_s20 = smov [#allocation5]  }
   0xa   :  { %46 = sst [smem:[#allocation7 + $0x8]] %s2949_s13  ;;  %s2955_s21 = smov [#allocation6]  }
   0xb   :  { %48 = dma.general %s3782_s1, 4096, %s27_s11, %s2954_s20, %s2955_s21, [#allocation7], %s1903_s17, 0  }
   0xc   :  { %2945 = dma.done.wait [#allocation5], 4096 }
   0xd   :  { %2946 = vsyncadd [#allocation5], 4294963200  ;;  %v2977_v0 = vld [vmem:[#allocation2] sm:$0xff]  ;;  %v2979_v1 = vld [vmem:[#allocation2 + $0x8] sm:$0xff]  ;;  %v2956_v2 = vmov 0.0   ;;  %vm2957_vm0 = vmmov 0  }
   0xe   :  { %2213 = vmatprep.subr.bf16.mxu0 %v2956_v2  ;;  %2233 = vmatprep.subr.bf16.mxu1 %v2956_v2  ;;  %v2986_v3 = vld [vmem:[#allocation2 + $0x20] sm:$0xff]  ;;  %v2989_v4 = vld [vmem:[#allocation2 + $0x28] sm:$0xff]  ;;  %v3046_v17 = vld [vmem:[#allocation2 + $0x10] sm:$0xff]  ;;  %v2958_v19 = vmov 0.0|0.0  }
   0xf   :  { %2214 = vmatpush3.bf16.msra.mxu0 %v2977_v0  ;;  %2234 = vmatpush3.bf16.msra.mxu1 %v2979_v1  ;;  %v2998_v5 = vld [vmem:[#allocation2 + $0x40] sm:$0xff]  ;;  %v3001_v6 = vld [vmem:[#allocation2 + $0x48] sm:$0xff]  ;;  %v3049_v18 = vld [vmem:[#allocation2 + $0x18] sm:$0xff] }
  0x10   :  { %2215 = vmatprep.subr.bf16.mxu0 %v2956_v2  ;;  %2235 = vmatprep.subr.bf16.mxu1 %v2956_v2  ;;  %v3006_v7 = vld [vmem:[#allocation2 + $0x60] sm:$0xff]  ;;  %v3009_v8 = vld [vmem:[#allocation2 + $0x68] sm:$0xff]  ;;  %v3054_v20 = vld [vmem:[#allocation2 + $0x30] sm:$0xff] }
  0x11   :  { %2229 = vmatprep.mubr.msk.bf16.mxu0 %vm2957_vm0, %v2956_v2  ;;  %2249 = vmatprep.mubr.msk.bf16.mxu1 %vm2957_vm0, %v2956_v2  ;;  %v3014_v9 = vld [vmem:[#allocation2 + $0x80] sm:$0xff]  ;;  %v3017_v10 = vld [vmem:[#allocation2 + $0x88] sm:$0xff]  ;;  %v3057_v21 = vld [vmem:[#allocation2 + $0x38] sm:$0xff] }
  0x12   :  { %v3022_v11 = vld [vmem:[#allocation2 + $0xa0] sm:$0xff]  ;;  %v3025_v12 = vld [vmem:[#allocation2 + $0xa8] sm:$0xff]  ;;  %v3066_v22 = vld [vmem:[#allocation2 + $0x50] sm:$0xff] }
  0x13   :  { %2216 = vmatpush3.bf16.msra.mxu0 %v2986_v3  ;;  %2236 = vmatpush3.bf16.msra.mxu1 %v2989_v4  ;;  %v3030_v13 = vld [vmem:[#allocation2 + $0xc0] sm:$0xff]  ;;  %v3033_v14 = vld [vmem:[#allocation2 + $0xc8] sm:$0xff]  ;;  %v3069_v23 = vld [vmem:[#allocation2 + $0x58] sm:$0xff] }
  0x14   :  { %2217 = vmatprep.subr.bf16.mxu0 %v2956_v2  ;;  %2237 = vmatprep.subr.bf16.mxu1 %v2956_v2  ;;  %v3038_v15 = vld [vmem:[#allocation2 + $0xe0] sm:$0xff]  ;;  %v3041_v16 = vld [vmem:[#allocation2 + $0xe8] sm:$0xff]  ;;  %v3074_v24 = vld [vmem:[#allocation2 + $0x70] sm:$0xff] }
  0x15   :  { %v3077_v25 = vld [vmem:[#allocation2 + $0x78] sm:$0xff]  ;;  %v3082_v26 = vld [vmem:[#allocation2 + $0x90] sm:$0xff]  ;;  %v58_v42 = vld [vmem:[%s3781_s0] sm:$0xff] }
  0x16   :  { %v3085_v27 = vld [vmem:[#allocation2 + $0x98] sm:$0xff]  ;;  %v3090_v28 = vld [vmem:[#allocation2 + $0xb0] sm:$0xff]  ;;  %v123_v43 = vrot.slane %v58_v42, 4  ;;  %v68_v45 = vunpack.c.l.bf16 %v58_v42  ;;  %v59_v50 = vld [vmem:[%s3781_s0 + $0x8] sm:$0xff] }
  0x17   :  { %2218 = vmatpush3.bf16.msra.mxu0 %v2998_v5  ;;  %2238 = vmatpush3.bf16.msra.mxu1 %v3001_v6  ;;  %v3093_v29 = vld [vmem:[#allocation2 + $0xb8] sm:$0xff]  ;;  %v3098_v30 = vld [vmem:[#allocation2 + $0xd0] sm:$0xff]  ;;  %v231_v51 = vrot.slane %v59_v50, 4  ;;  %v179_v52 = vunpack.c.l.bf16 %v59_v50 }
  0x18   :  { %2219 = vmatprep.subr.bf16.mxu0 %v2956_v2  ;;  %2239 = vmatprep.subr.bf16.mxu1 %v2956_v2  ;;  %v3101_v31 = vld [vmem:[#allocation2 + $0xd8] sm:$0xff]  ;;  %v3106_v32 = vld [vmem:[#allocation2 + $0xf0] sm:$0xff]  ;;  %v125_v44 = vunpack.c.l.bf16 %v123_v43 }
  0x19   :  { %v3109_v33 = vld [vmem:[#allocation2 + $0xf8] sm:$0xff]  ;;  %v233_v53 = vunpack.c.l.bf16 %v231_v51 }
  0x1b   :  { %2220 = vmatpush3.bf16.msra.mxu0 %v3006_v7  ;;  %2240 = vmatpush3.bf16.msra.mxu1 %v3009_v8 }
  0x1c   :  { %2221 = vmatprep.subr.bf16.mxu0 %v2956_v2  ;;  %2241 = vmatprep.subr.bf16.mxu1 %v2956_v2 }
  0x1f   :  { %2222 = vmatpush3.bf16.msra.mxu0 %v3014_v9  ;;  %2242 = vmatpush3.bf16.msra.mxu1 %v3017_v10 }
  0x20   :  { %2223 = vmatprep.subr.bf16.mxu0 %v2956_v2  ;;  %2243 = vmatprep.subr.bf16.mxu1 %v2956_v2 }
  0x23   :  { %2224 = vmatpush3.bf16.msra.mxu0 %v3022_v11  ;;  %2244 = vmatpush3.bf16.msra.mxu1 %v3025_v12 }
  0x24   :  { %2225 = vmatprep.subr.bf16.mxu0 %v2956_v2  ;;  %2245 = vmatprep.subr.bf16.mxu1 %v2956_v2 }
  0x27   :  { %2226 = vmatpush3.bf16.msra.mxu0 %v3030_v13  ;;  %2246 = vmatpush3.bf16.msra.mxu1 %v3033_v14 }
  0x28   :  { %2227 = vmatprep.subr.bf16.mxu0 %v2956_v2  ;;  %2247 = vmatprep.subr.bf16.mxu1 %v2956_v2 }
  0x2b   :  { %2228 = vmatpush3.bf16.msra.mxu0 %v3038_v15  ;;  %2248 = vmatpush3.bf16.msra.mxu1 %v3041_v16 }
  0x2c   :  { %2253 = vmatprep.subr.bf16.mxu0 %v2956_v2  ;;  %2273 = vmatprep.subr.bf16.mxu1 %v2956_v2 }
  0x2e   :  { %2230 = vmatmul.mubr.bf16.vlgmr.msra.gmra.mrb[0].mxu0 %v2958_v19  ;;  %2250 = vmatmul.mubr.bf16.vlgmr.msra.gmra.mrb[0].mxu1 %v2958_v19 }
  0x2f   :  { %2254 = vmatpush3.bf16.msra.mxu0 %v3046_v17  ;;  %2274 = vmatpush3.bf16.msra.mxu1 %v3049_v18 }
  0x30   :  { %2255 = vmatprep.subr.bf16.mxu0 %v2956_v2  ;;  %2275 = vmatprep.subr.bf16.mxu1 %v2956_v2 }
  0x31   :  { %2269 = vmatprep.mubr.msk.bf16.mxu0 %vm2957_vm0, %v2956_v2  ;;  %2289 = vmatprep.mubr.msk.bf16.mxu1 %vm2957_vm0, %v2956_v2 }
  0x33   :  { %2256 = vmatpush3.bf16.msra.mxu0 %v3054_v20  ;;  %2276 = vmatpush3.bf16.msra.mxu1 %v3057_v21 }
  0x34   :  { %2257 = vmatprep.subr.bf16.mxu0 %v2956_v2  ;;  %2277 = vmatprep.subr.bf16.mxu1 %v2956_v2 }
  0x37   :  { %2258 = vmatpush3.bf16.msra.mxu0 %v3066_v22  ;;  %2278 = vmatpush3.bf16.msra.mxu1 %v3069_v23 }
  0x38   :  { %2259 = vmatprep.subr.bf16.mxu0 %v2956_v2  ;;  %2279 = vmatprep.subr.bf16.mxu1 %v2956_v2 }
  0x3b   :  { %2260 = vmatpush3.bf16.msra.mxu0 %v3074_v24  ;;  %2280 = vmatpush3.bf16.msra.mxu1 %v3077_v25 }
  0x3c   :  { %2261 = vmatprep.subr.bf16.mxu0 %v2956_v2  ;;  %2281 = vmatprep.subr.bf16.mxu1 %v2956_v2 }
  0x3f   :  { %2262 = vmatpush3.bf16.msra.mxu0 %v3082_v26  ;;  %2282 = vmatpush3.bf16.msra.mxu1 %v3085_v27 }
  0x40   :  { %2263 = vmatprep.subr.bf16.mxu0 %v2956_v2  ;;  %2283 = vmatprep.subr.bf16.mxu1 %v2956_v2 }
  0x43   :  { %2264 = vmatpush3.bf16.msra.mxu0 %v3090_v28  ;;  %2284 = vmatpush3.bf16.msra.mxu1 %v3093_v29 }
  0x44   :  { %2265 = vmatprep.subr.bf16.mxu0 %v2956_v2  ;;  %2285 = vmatprep.subr.bf16.mxu1 %v2956_v2 }
  0x47   :  { %2266 = vmatpush3.bf16.msra.mxu0 %v3098_v30  ;;  %2286 = vmatpush3.bf16.msra.mxu1 %v3101_v31 }
  0x48   :  { %2267 = vmatprep.subr.bf16.mxu0 %v2956_v2  ;;  %2287 = vmatprep.subr.bf16.mxu1 %v2956_v2 }
  0x4b   :  { %2268 = vmatpush3.bf16.msra.mxu0 %v3106_v32  ;;  %2288 = vmatpush3.bf16.msra.mxu1 %v3109_v33 }
  0x4c   :  { %2293 = vmatprep.subr.bf16.mxu0 %v2956_v2  ;;  %2313 = vmatprep.subr.bf16.mxu1 %v2956_v2 }
  0x4e   :  { %2270 = vmatmul.mubr.bf16.vlgmr.msra.gmra.mrb[4].mxu0 %v2958_v19  ;;  %2290 = vmatmul.mubr.bf16.vlgmr.msra.gmra.mrb[4].mxu1 %v2958_v19 }
  0x4f   :  { %2294 = vmatpush3.bf16.msra.mxu0 %v2977_v0  ;;  %2314 = vmatpush3.bf16.msra.mxu1 %v2979_v1 }
  0x50   :  { %2295 = vmatprep.subr.bf16.mxu0 %v2956_v2  ;;  %2315 = vmatprep.subr.bf16.mxu1 %v2956_v2 }
  0x51   :  { %2309 = vmatprep.mubr.msk.bf16.mxu0 %vm2957_vm0, %v2956_v2  ;;  %2329 = vmatprep.mubr.msk.bf16.mxu1 %vm2957_vm0, %v2956_v2 }
  0x53   :  { %2296 = vmatpush3.bf16.msra.mxu0 %v2986_v3  ;;  %2316 = vmatpush3.bf16.msra.mxu1 %v2989_v4 }
  0x54   :  { %2297 = vmatprep.subr.bf16.mxu0 %v2956_v2  ;;  %2317 = vmatprep.subr.bf16.mxu1 %v2956_v2 }
  0x57   :  { %2298 = vmatpush3.bf16.msra.mxu0 %v2998_v5  ;;  %2318 = vmatpush3.bf16.msra.mxu1 %v3001_v6 }
  0x58   :  { %2299 = vmatprep.subr.bf16.mxu0 %v2956_v2  ;;  %2319 = vmatprep.subr.bf16.mxu1 %v2956_v2 }
  0x5b   :  { %2300 = vmatpush3.bf16.msra.mxu0 %v3006_v7  ;;  %2320 = vmatpush3.bf16.msra.mxu1 %v3009_v8 }
  0x5c   :  { %2301 = vmatprep.subr.bf16.mxu0 %v2956_v2  ;;  %2321 = vmatprep.subr.bf16.mxu1 %v2956_v2 }
  0x5f   :  { %2302 = vmatpush3.bf16.msra.mxu0 %v3014_v9  ;;  %2322 = vmatpush3.bf16.msra.mxu1 %v3017_v10 }
  0x60   :  { %2303 = vmatprep.subr.bf16.mxu0 %v2956_v2  ;;  %2323 = vmatprep.subr.bf16.mxu1 %v2956_v2 }
  0x63   :  { %2304 = vmatpush3.bf16.msra.mxu0 %v3022_v11  ;;  %2324 = vmatpush3.bf16.msra.mxu1 %v3025_v12 }
  0x64   :  { %2305 = vmatprep.subr.bf16.mxu0 %v2956_v2  ;;  %2325 = vmatprep.subr.bf16.mxu1 %v2956_v2 }
  0x67   :  { %2306 = vmatpush3.bf16.msra.mxu0 %v3030_v13  ;;  %2326 = vmatpush3.bf16.msra.mxu1 %v3033_v14 }
  0x68   :  { %2307 = vmatprep.subr.bf16.mxu0 %v2956_v2  ;;  %2327 = vmatprep.subr.bf16.mxu1 %v2956_v2 }
  0x6b   :  { %2308 = vmatpush3.bf16.msra.mxu0 %v3038_v15  ;;  %2328 = vmatpush3.bf16.msra.mxu1 %v3041_v16 }
  0x6c   :  { %2333 = vmatprep.subr.bf16.mxu0 %v2956_v2  ;;  %2353 = vmatprep.subr.bf16.mxu1 %v2956_v2 }
 0x101   :  { %v103_v34 = vpop.f32.mrb[0].mxu0  ;;  %v160_v35 = vpop.f32.mrb[0].mxu1 }
 0x102   :  { %v2231_v36 = vpop.f32.mrb[1].mxu0  ;;  %v2251_v37 = vpop.f32.mrb[1].mxu1  ;;  %v166_v46 = vadd.f32 %v160_v35, %v125_v44  ;;  %v109_v47 = vadd.f32 %v103_v34, %v68_v45 }
 0x103   :  { %v106_v38 = vpop.f32.mrb[2].mxu0  ;;  %v163_v39 = vpop.f32.mrb[2].mxu1 }
 0x104   :  { %v2232_v40 = vpop.f32.mrb[3].mxu0  ;;  %v2252_v41 = vpop.f32.mrb[3].mxu1  ;;  %v167_v48 = vmul.f32 0.5, %v166_v46  ;;  %v110_v49 = vmul.f32 0.5, %v109_v47 }
 0x106   :  { %2865 = vtanh.f32 %v167_v48 }
 0x107   :  { %2867 = vtanh.f32 %v110_v49 }
 0x110   :  { %v2866_v62 = vpop.eup %2865 }
 0x111   :  { %v2868_v35 = vpop.eup %2867  ;;  %v169_v36 = vadd.f32 1.0, %v2866_v62 }
 0x112   :  { %v112_v37 = vadd.f32 1.0, %v2868_v35  ;;  %v1905_v35 = vld [vmem:[%s3781_s0 + $0x18] sm:$0xff] }
 0x113   :  { %v170_v38 = vmul.f32 0.5, %v169_v36  ;;  %v460_v36 = vrot.slane %v1905_v35, 4 }
 0x114   :  { %v113_v39 = vmul.f32 0.5, %v112_v37  ;;  %v408_v37 = vunpack.c.l.bf16 %v1905_v35 }
 0x115   :  { %v279_v41 = vmul.f32 0.0, %v170_v38  ;;  %v462_v38 = vunpack.c.l.bf16 %v460_v36 }
 0x121   :  { %v214_v54 = vpop.f32.mrb[4].mxu0  ;;  %v268_v55 = vpop.f32.mrb[4].mxu1 }
 0x122   :  { %v220_v56 = vadd.f32 %v214_v54, %v179_v52  ;;  %v2271_v57 = vpop.f32.mrb[5].mxu0  ;;  %v274_v58 = vadd.f32 %v268_v55, %v233_v53  ;;  %v2291_v59 = vpop.f32.mrb[5].mxu1 }
 0x123   :  { %v217_v60 = vpop.f32.mrb[6].mxu0  ;;  %v271_v61 = vpop.f32.mrb[6].mxu1 }
 0x124   :  { %2869 = vtanh.f32 %v220_v56  ;;  %v2272_v63 = vpop.f32.mrb[7].mxu0  ;;  %v2292_v19 = vpop.f32.mrb[7].mxu1  ;;  %v275_v34 = vmul.f32 0.5, %v274_v58  ;;  %v1904_v58 = vld [vmem:[%s3781_s0 + $0x10] sm:$0xff] }
 0x125   :  { %v352_v59 = vrot.slane %v1904_v58, 4  ;;  %v297_v61 = vunpack.c.l.bf16 %v1904_v58 }
 0x126   :  { %2871 = vtanh.f32 %v275_v34 }
 0x127   :  { %v354_v60 = vunpack.c.l.bf16 %v352_v59 }
 0x12e   :  { %v2870_v40 = vpop.eup %2869 }
 0x12f   :  { %v280_v42 = vmul.f32 %v2870_v40, %v113_v39 }
 0x130   :  { %v2872_v44 = vpop.eup %2871 }
 0x131   :  { %v3157_v43 = vadd.f32 %v280_v42, %v279_v41  ;;  %v277_v45 = vadd.f32 1.0, %v2872_v44 }
 0x133   :  { %2873 = vtanh.f32 %v3157_v43  ;;  %v278_v46 = vmul.f32 0.5, %v277_v45 }
 0x13d   :  { %v2874_v47 = vpop.eup %2873 }
 0x13e   :  { %v283_v48 = vmul.f32 %v2874_v47, %v278_v46 }
 0x140   :  { %v284_v49 = vpack.c.bf16 %v283_v48, %v283_v48 }
 0x142   :  { %285 = vst [vmem:[%s3783_s2] sm:$0xf] %v284_v49  ;;  %2310 = vmatmul.mubr.bf16.vlgmr.msra.gmra.mrb[8].mxu0 %v284_v49  ;;  %2330 = vmatmul.mubr.bf16.vlgmr.msra.gmra.mrb[8].mxu1 %v284_v49 }
 0x143   :  { %2334 = vmatpush3.bf16.msra.mxu0 %v3046_v17  ;;  %2354 = vmatpush3.bf16.msra.mxu1 %v3049_v18 }
 0x144   :  { %2335 = vmatprep.subr.bf16.mxu0 %v2956_v2  ;;  %2355 = vmatprep.subr.bf16.mxu1 %v2956_v2 }
 0x145   :  { %2349 = vmatprep.mubr.msk.bf16.mxu0 %vm2957_vm0, %v2956_v2  ;;  %2369 = vmatprep.mubr.msk.bf16.mxu1 %vm2957_vm0, %v2956_v2 }
 0x147   :  { %2336 = vmatpush3.bf16.msra.mxu0 %v3054_v20  ;;  %2356 = vmatpush3.bf16.msra.mxu1 %v3057_v21 }
 0x148   :  { %2337 = vmatprep.subr.bf16.mxu0 %v2956_v2  ;;  %2357 = vmatprep.subr.bf16.mxu1 %v2956_v2 }
 0x14b   :  { %2338 = vmatpush3.bf16.msra.mxu0 %v3066_v22  ;;  %2358 = vmatpush3.bf16.msra.mxu1 %v3069_v23 }
 0x14c   :  { %2339 = vmatprep.subr.bf16.mxu0 %v2956_v2  ;;  %2359 = vmatprep.subr.bf16.mxu1 %v2956_v2 }
 0x14f   :  { %2340 = vmatpush3.bf16.msra.mxu0 %v3074_v24  ;;  %2360 = vmatpush3.bf16.msra.mxu1 %v3077_v25 }
 0x150   :  { %2341 = vmatprep.subr.bf16.mxu0 %v2956_v2  ;;  %2361 = vmatprep.subr.bf16.mxu1 %v2956_v2 }
 0x153   :  { %2342 = vmatpush3.bf16.msra.mxu0 %v3082_v26  ;;  %2362 = vmatpush3.bf16.msra.mxu1 %v3085_v27 }
 0x154   :  { %2343 = vmatprep.subr.bf16.mxu0 %v2956_v2  ;;  %2363 = vmatprep.subr.bf16.mxu1 %v2956_v2 }
 0x157   :  { %2344 = vmatpush3.bf16.msra.mxu0 %v3090_v28  ;;  %2364 = vmatpush3.bf16.msra.mxu1 %v3093_v29 }
 0x158   :  { %2345 = vmatprep.subr.bf16.mxu0 %v2956_v2  ;;  %2365 = vmatprep.subr.bf16.mxu1 %v2956_v2 }
 0x15b   :  { %2346 = vmatpush3.bf16.msra.mxu0 %v3098_v30  ;;  %2366 = vmatpush3.bf16.msra.mxu1 %v3101_v31 }
 0x15c   :  { %2347 = vmatprep.subr.bf16.mxu0 %v2956_v2  ;;  %2367 = vmatprep.subr.bf16.mxu1 %v2956_v2 }
 0x15f   :  { %2348 = vmatpush3.bf16.msra.mxu0 %v3106_v32  ;;  %2368 = vmatpush3.bf16.msra.mxu1 %v3109_v33 }
 0x160   :  { %2373 = vmatprep.subr.bf16.mxu0 %v2956_v2  ;;  %2393 = vmatprep.subr.bf16.mxu1 %v2956_v2 }
 0x162   :  { %2350 = vmatmul.mubr.bf16.vlgmr.msra.gmra.mrb[12].mxu0 %v284_v49  ;;  %2370 = vmatmul.mubr.bf16.vlgmr.msra.gmra.mrb[12].mxu1 %v284_v49 }
 0x163   :  { %2374 = vmatpush3.bf16.msra.mxu0 %v2977_v0  ;;  %2394 = vmatpush3.bf16.msra.mxu1 %v2979_v1 }
 0x164   :  { %2375 = vmatprep.subr.bf16.mxu0 %v2956_v2  ;;  %2395 = vmatprep.subr.bf16.mxu1 %v2956_v2 }
 0x165   :  { %2389 = vmatprep.mubr.msk.bf16.mxu0 %vm2957_vm0, %v2956_v2  ;;  %2409 = vmatprep.mubr.msk.bf16.mxu1 %vm2957_vm0, %v2956_v2 }
 0x167   :  { %2376 = vmatpush3.bf16.msra.mxu0 %v2986_v3  ;;  %2396 = vmatpush3.bf16.msra.mxu1 %v2989_v4 }
 0x168   :  { %2377 = vmatprep.subr.bf16.mxu0 %v2956_v2  ;;  %2397 = vmatprep.subr.bf16.mxu1 %v2956_v2 }
 0x16b   :  { %2378 = vmatpush3.bf16.msra.mxu0 %v2998_v5  ;;  %2398 = vmatpush3.bf16.msra.mxu1 %v3001_v6 }
 0x16c   :  { %2379 = vmatprep.subr.bf16.mxu0 %v2956_v2  ;;  %2399 = vmatprep.subr.bf16.mxu1 %v2956_v2 }
 0x16f   :  { %2380 = vmatpush3.bf16.msra.mxu0 %v3006_v7  ;;  %2400 = vmatpush3.bf16.msra.mxu1 %v3009_v8 }
 0x170   :  { %2381 = vmatprep.subr.bf16.mxu0 %v2956_v2  ;;  %2401 = vmatprep.subr.bf16.mxu1 %v2956_v2 }
 0x173   :  { %2382 = vmatpush3.bf16.msra.mxu0 %v3014_v9  ;;  %2402 = vmatpush3.bf16.msra.mxu1 %v3017_v10 }
 0x174   :  { %2383 = vmatprep.subr.bf16.mxu0 %v2956_v2  ;;  %2403 = vmatprep.subr.bf16.mxu1 %v2956_v2 }
 0x177   :  { %2384 = vmatpush3.bf16.msra.mxu0 %v3022_v11  ;;  %2404 = vmatpush3.bf16.msra.mxu1 %v3025_v12 }
 0x178   :  { %2385 = vmatprep.subr.bf16.mxu0 %v2956_v2  ;;  %2405 = vmatprep.subr.bf16.mxu1 %v2956_v2 }
 0x17b   :  { %2386 = vmatpush3.bf16.msra.mxu0 %v3030_v13  ;;  %2406 = vmatpush3.bf16.msra.mxu1 %v3033_v14 }
 0x17c   :  { %2387 = vmatprep.subr.bf16.mxu0 %v2956_v2  ;;  %2407 = vmatprep.subr.bf16.mxu1 %v2956_v2 }
 0x17f   :  { %2388 = vmatpush3.bf16.msra.mxu0 %v3038_v15  ;;  %2408 = vmatpush3.bf16.msra.mxu1 %v3041_v16 }
 0x180   :  { %2413 = vmatprep.subr.bf16.mxu0 %v2956_v2  ;;  %2433 = vmatprep.subr.bf16.mxu1 %v2956_v2 }
 0x215   :  { %v332_v50 = vpop.f32.mrb[8].mxu0  ;;  %v389_v51 = vpop.f32.mrb[8].mxu1 }
 0x216   :  { %v2311_v52 = vpop.f32.mrb[9].mxu0  ;;  %v2331_v53 = vpop.f32.mrb[9].mxu1  ;;  %v395_v62 = vadd.f32 %v389_v51, %v354_v60  ;;  %v338_v63 = vadd.f32 %v332_v50, %v297_v61 }
 0x217   :  { %v335_v54 = vpop.f32.mrb[10].mxu0  ;;  %v392_v55 = vpop.f32.mrb[10].mxu1 }
 0x218   :  { %v2312_v56 = vpop.f32.mrb[11].mxu0  ;;  %v2332_v57 = vpop.f32.mrb[11].mxu1  ;;  %v396_v19 = vmul.f32 0.5, %v395_v62  ;;  %v339_v34 = vmul.f32 0.5, %v338_v63 }
 0x21a   :  { %2875 = vtanh.f32 %v396_v19 }
 0x21b   :  { %2877 = vtanh.f32 %v339_v34 }
 0x224   :  { %v2876_v48 = vpop.eup %2875 }
 0x225   :  { %v2878_v51 = vpop.eup %2877  ;;  %v398_v52 = vadd.f32 1.0, %v2876_v48 }
 0x226   :  { %v341_v54 = vadd.f32 1.0, %v2878_v51 }
 0x227   :  { %v399_v55 = vmul.f32 0.5, %v398_v52 }
 0x228   :  { %v342_v56 = vmul.f32 0.5, %v341_v54 }
 0x229   :  { %v508_v58 = vmul.f32 %v399_v55, %v3157_v43  ;;  %v1908_v43 = vld [vmem:[%s3781_s0 + $0x28] sm:$0xff] }
 0x22a   :  { %v690_v36 = vrot.slane %v1908_v43, 4 }
 0x235   :  { %v443_v39 = vpop.f32.mrb[12].mxu0  ;;  %v497_v40 = vpop.f32.mrb[12].mxu1 }
 0x236   :  { %v449_v41 = vadd.f32 %v443_v39, %v408_v37  ;;  %v2351_v42 = vpop.f32.mrb[13].mxu0  ;;  %v2371_v44 = vpop.f32.mrb[13].mxu1  ;;  %v503_v45 = vadd.f32 %v497_v40, %v462_v38  ;;  %v638_v37 = vunpack.c.l.bf16 %v1908_v43  ;;  %v692_v38 = vunpack.c.l.bf16 %v690_v36  ;;  %v1911_v43 = vld [vmem:[%s3781_s0 + $0x38] sm:$0xff] }
 0x237   :  { %v446_v46 = vpop.f32.mrb[14].mxu0  ;;  %v500_v47 = vpop.f32.mrb[14].mxu1  ;;  %v920_v36 = vrot.slane %v1911_v43, 4 }
 0x238   :  { %2879 = vtanh.f32 %v449_v41  ;;  %v2352_v49 = vpop.f32.mrb[15].mxu0  ;;  %v2372_v50 = vpop.f32.mrb[15].mxu1  ;;  %v504_v53 = vmul.f32 0.5, %v503_v45 }
 0x23a   :  { %2881 = vtanh.f32 %v504_v53 }
 0x242   :  { %v2880_v57 = vpop.eup %2879 }
 0x243   :  { %v509_v59 = vmul.f32 %v2880_v57, %v342_v56 }
 0x244   :  { %v2882_v61 = vpop.eup %2881 }
 0x245   :  { %v3242_v60 = vadd.f32 %v509_v59, %v508_v58  ;;  %v506_v62 = vadd.f32 1.0, %v2882_v61 }
 0x247   :  { %2883 = vtanh.f32 %v3242_v60  ;;  %v507_v63 = vmul.f32 0.5, %v506_v62 }
 0x251   :  { %v2884_v19 = vpop.eup %2883 }
 0x252   :  { %v512_v34 = vmul.f32 %v2884_v19, %v507_v63 }
 0x254   :  { %v513_v35 = vpack.c.bf16 %v512_v34, %v512_v34 }
 0x256   :  { %1906 = vst [vmem:[%s3783_s2 + $0x4] sm:$0xf] %v513_v35  ;;  %2390 = vmatmul.mubr.bf16.vlgmr.msra.gmra.mrb[16].mxu0 %v513_v35  ;;  %2410 = vmatmul.mubr.bf16.vlgmr.msra.gmra.mrb[16].mxu1 %v513_v35 }
 0x257   :  { %2414 = vmatpush3.bf16.msra.mxu0 %v3046_v17  ;;  %2434 = vmatpush3.bf16.msra.mxu1 %v3049_v18 }
 0x258   :  { %2415 = vmatprep.subr.bf16.mxu0 %v2956_v2  ;;  %2435 = vmatprep.subr.bf16.mxu1 %v2956_v2 }
 0x259   :  { %2429 = vmatprep.mubr.msk.bf16.mxu0 %vm2957_vm0, %v2956_v2  ;;  %2449 = vmatprep.mubr.msk.bf16.mxu1 %vm2957_vm0, %v2956_v2 }
 0x25b   :  { %2416 = vmatpush3.bf16.msra.mxu0 %v3054_v20  ;;  %2436 = vmatpush3.bf16.msra.mxu1 %v3057_v21 }
 0x25c   :  { %2417 = vmatprep.subr.bf16.mxu0 %v2956_v2  ;;  %2437 = vmatprep.subr.bf16.mxu1 %v2956_v2 }
 0x25f   :  { %2418 = vmatpush3.bf16.msra.mxu0 %v3066_v22  ;;  %2438 = vmatpush3.bf16.msra.mxu1 %v3069_v23 }
 0x260   :  { %2419 = vmatprep.subr.bf16.mxu0 %v2956_v2  ;;  %2439 = vmatprep.subr.bf16.mxu1 %v2956_v2 }
 0x263   :  { %2420 = vmatpush3.bf16.msra.mxu0 %v3074_v24  ;;  %2440 = vmatpush3.bf16.msra.mxu1 %v3077_v25 }
 0x264   :  { %2421 = vmatprep.subr.bf16.mxu0 %v2956_v2  ;;  %2441 = vmatprep.subr.bf16.mxu1 %v2956_v2 }
 0x267   :  { %2422 = vmatpush3.bf16.msra.mxu0 %v3082_v26  ;;  %2442 = vmatpush3.bf16.msra.mxu1 %v3085_v27 }
 0x268   :  { %2423 = vmatprep.subr.bf16.mxu0 %v2956_v2  ;;  %2443 = vmatprep.subr.bf16.mxu1 %v2956_v2 }
 0x26b   :  { %2424 = vmatpush3.bf16.msra.mxu0 %v3090_v28  ;;  %2444 = vmatpush3.bf16.msra.mxu1 %v3093_v29 }
 0x26c   :  { %2425 = vmatprep.subr.bf16.mxu0 %v2956_v2  ;;  %2445 = vmatprep.subr.bf16.mxu1 %v2956_v2 }
 0x26f   :  { %2426 = vmatpush3.bf16.msra.mxu0 %v3098_v30  ;;  %2446 = vmatpush3.bf16.msra.mxu1 %v3101_v31 }
 0x270   :  { %2427 = vmatprep.subr.bf16.mxu0 %v2956_v2  ;;  %2447 = vmatprep.subr.bf16.mxu1 %v2956_v2 }
 0x273   :  { %2428 = vmatpush3.bf16.msra.mxu0 %v3106_v32  ;;  %2448 = vmatpush3.bf16.msra.mxu1 %v3109_v33 }
 0x274   :  { %2453 = vmatprep.subr.bf16.mxu0 %v2956_v2  ;;  %2473 = vmatprep.subr.bf16.mxu1 %v2956_v2 }
 0x276   :  { %2430 = vmatmul.mubr.bf16.vlgmr.msra.gmra.mrb[20].mxu0 %v513_v35  ;;  %2450 = vmatmul.mubr.bf16.vlgmr.msra.gmra.mrb[20].mxu1 %v513_v35 }
 0x277   :  { %2454 = vmatpush3.bf16.msra.mxu0 %v2977_v0  ;;  %2474 = vmatpush3.bf16.msra.mxu1 %v2979_v1 }
 0x278   :  { %2455 = vmatprep.subr.bf16.mxu0 %v2956_v2  ;;  %2475 = vmatprep.subr.bf16.mxu1 %v2956_v2 }
 0x279   :  { %2469 = vmatprep.mubr.msk.bf16.mxu0 %vm2957_vm0, %v2956_v2  ;;  %2489 = vmatprep.mubr.msk.bf16.mxu1 %vm2957_vm0, %v2956_v2 }
 0x27b   :  { %2456 = vmatpush3.bf16.msra.mxu0 %v2986_v3  ;;  %2476 = vmatpush3.bf16.msra.mxu1 %v2989_v4 }
 0x27c   :  { %2457 = vmatprep.subr.bf16.mxu0 %v2956_v2  ;;  %2477 = vmatprep.subr.bf16.mxu1 %v2956_v2 }
 0x27f   :  { %2458 = vmatpush3.bf16.msra.mxu0 %v2998_v5  ;;  %2478 = vmatpush3.bf16.msra.mxu1 %v3001_v6 }
 0x280   :  { %2459 = vmatprep.subr.bf16.mxu0 %v2956_v2  ;;  %2479 = vmatprep.subr.bf16.mxu1 %v2956_v2 }
 0x283   :  { %2460 = vmatpush3.bf16.msra.mxu0 %v3006_v7  ;;  %2480 = vmatpush3.bf16.msra.mxu1 %v3009_v8 }
 0x284   :  { %2461 = vmatprep.subr.bf16.mxu0 %v2956_v2  ;;  %2481 = vmatprep.subr.bf16.mxu1 %v2956_v2 }
 0x287   :  { %2462 = vmatpush3.bf16.msra.mxu0 %v3014_v9  ;;  %2482 = vmatpush3.bf16.msra.mxu1 %v3017_v10  ;;  %v1907_v9 = vld [vmem:[%s3781_s0 + $0x20] sm:$0xff] }
 0x288   :  { %2463 = vmatprep.subr.bf16.mxu0 %v2956_v2  ;;  %2483 = vmatprep.subr.bf16.mxu1 %v2956_v2  ;;  %v582_v10 = vrot.slane %v1907_v9, 4 }
 0x28b   :  { %2464 = vmatpush3.bf16.msra.mxu0 %v3022_v11  ;;  %2484 = vmatpush3.bf16.msra.mxu1 %v3025_v12  ;;  %v584_v11 = vunpack.c.l.bf16 %v582_v10  ;;  %v527_v12 = vunpack.c.l.bf16 %v1907_v9  ;;  %v1910_v9 = vld [vmem:[%s3781_s0 + $0x30] sm:$0xff] }
 0x28c   :  { %2465 = vmatprep.subr.bf16.mxu0 %v2956_v2  ;;  %2485 = vmatprep.subr.bf16.mxu1 %v2956_v2  ;;  %v812_v10 = vrot.slane %v1910_v9, 4 }
 0x28f   :  { %2466 = vmatpush3.bf16.msra.mxu0 %v3030_v13  ;;  %2486 = vmatpush3.bf16.msra.mxu1 %v3033_v14 }
 0x290   :  { %2467 = vmatprep.subr.bf16.mxu0 %v2956_v2  ;;  %2487 = vmatprep.subr.bf16.mxu1 %v2956_v2 }
 0x293   :  { %2468 = vmatpush3.bf16.msra.mxu0 %v3038_v15  ;;  %2488 = vmatpush3.bf16.msra.mxu1 %v3041_v16 }
 0x294   :  { %2493 = vmatprep.subr.bf16.mxu0 %v2956_v2  ;;  %2513 = vmatprep.subr.bf16.mxu1 %v2956_v2 }
 0x329   :  { %v562_v0 = vpop.f32.mrb[16].mxu0  ;;  %v619_v1 = vpop.f32.mrb[16].mxu1 }
 0x32a   :  { %v2391_v3 = vpop.f32.mrb[17].mxu0  ;;  %v2411_v4 = vpop.f32.mrb[17].mxu1  ;;  %v625_v13 = vadd.f32 %v619_v1, %v584_v11  ;;  %v568_v14 = vadd.f32 %v562_v0, %v527_v12  ;;  %v814_v11 = vunpack.c.l.bf16 %v812_v10  ;;  %v757_v12 = vunpack.c.l.bf16 %v1910_v9  ;;  %v3486_v9 = vld [vmem:[#allocation2 + $0x90] sm:$0xff]  ;;  %v3488_v10 = vld [vmem:[#allocation2 + $0x98] sm:$0xff] }
 0x32b   :  { %v565_v5 = vpop.f32.mrb[18].mxu0  ;;  %v622_v6 = vpop.f32.mrb[18].mxu1 }
 0x32c   :  { %v2392_v7 = vpop.f32.mrb[19].mxu0  ;;  %v2412_v8 = vpop.f32.mrb[19].mxu1  ;;  %v626_v15 = vmul.f32 0.5, %v625_v13  ;;  %v569_v16 = vmul.f32 0.5, %v568_v14 }
 0x32e   :  { %2885 = vtanh.f32 %v626_v15 }
 0x32f   :  { %2887 = vtanh.f32 %v569_v16 }
 0x338   :  { %v2886_v48 = vpop.eup %2885 }
 0x339   :  { %v2888_v51 = vpop.eup %2887  ;;  %v628_v52 = vadd.f32 1.0, %v2886_v48 }
 0x33a   :  { %v571_v54 = vadd.f32 1.0, %v2888_v51 }
 0x33b   :  { %v629_v55 = vmul.f32 0.5, %v628_v52 }
 0x33c   :  { %v572_v56 = vmul.f32 0.5, %v571_v54 }
 0x33d   :  { %v738_v58 = vmul.f32 %v629_v55, %v3242_v60 }
 0x349   :  { %v673_v39 = vpop.f32.mrb[20].mxu0  ;;  %v727_v40 = vpop.f32.mrb[20].mxu1 }
 0x34a   :  { %v679_v41 = vadd.f32 %v673_v39, %v638_v37  ;;  %v2431_v42 = vpop.f32.mrb[21].mxu0  ;;  %v2451_v44 = vpop.f32.mrb[21].mxu1  ;;  %v733_v45 = vadd.f32 %v727_v40, %v692_v38  ;;  %v868_v37 = vunpack.c.l.bf16 %v1911_v43  ;;  %v922_v38 = vunpack.c.l.bf16 %v920_v36 }
 0x34b   :  { %v676_v46 = vpop.f32.mrb[22].mxu0  ;;  %v730_v47 = vpop.f32.mrb[22].mxu1 }
 0x34c   :  { %2889 = vtanh.f32 %v679_v41  ;;  %v2432_v49 = vpop.f32.mrb[23].mxu0  ;;  %v2452_v50 = vpop.f32.mrb[23].mxu1  ;;  %v734_v53 = vmul.f32 0.5, %v733_v45 }
 0x34e   :  { %2891 = vtanh.f32 %v734_v53 }
 0x356   :  { %v2890_v57 = vpop.eup %2889 }
 0x357   :  { %v739_v59 = vmul.f32 %v2890_v57, %v572_v56 }
 0x358   :  { %v2892_v62 = vpop.eup %2891 }
 0x359   :  { %v3327_v61 = vadd.f32 %v739_v59, %v738_v58  ;;  %v736_v63 = vadd.f32 1.0, %v2892_v62 }
 0x35b   :  { %2893 = vtanh.f32 %v3327_v61  ;;  %v737_v19 = vmul.f32 0.5, %v736_v63 }
 0x365   :  { %v2894_v34 = vpop.eup %2893 }
 0x366   :  { %v742_v35 = vmul.f32 %v2894_v34, %v737_v19 }
 0x368   :  { %v743_v0 = vpack.c.bf16 %v742_v35, %v742_v35 }
 0x36a   :  { %1909 = vst [vmem:[%s3783_s2 + $0x8] sm:$0xf] %v743_v0  ;;  %2470 = vmatmul.mubr.bf16.vlgmr.msra.gmra.mrb[24].mxu0 %v743_v0  ;;  %2490 = vmatmul.mubr.bf16.vlgmr.msra.gmra.mrb[24].mxu1 %v743_v0 }
 0x36b   :  { %2494 = vmatpush3.bf16.msra.mxu0 %v3046_v17  ;;  %2514 = vmatpush3.bf16.msra.mxu1 %v3049_v18  ;;  %v3373_v17 = vld [vmem:[#allocation2] sm:$0xff]  ;;  %v3375_v18 = vld [vmem:[#allocation2 + $0x8] sm:$0xff] }
 0x36c   :  { %2495 = vmatprep.subr.bf16.mxu0 %v2956_v2  ;;  %2515 = vmatprep.subr.bf16.mxu1 %v2956_v2 }
 0x36d   :  { %2509 = vmatprep.mubr.msk.bf16.mxu0 %vm2957_vm0, %v2956_v2  ;;  %2529 = vmatprep.mubr.msk.bf16.mxu1 %vm2957_vm0, %v2956_v2 }
 0x36f   :  { %2496 = vmatpush3.bf16.msra.mxu0 %v3054_v20  ;;  %2516 = vmatpush3.bf16.msra.mxu1 %v3057_v21  ;;  %v3381_v20 = vld [vmem:[#allocation2 + $0x20] sm:$0xff]  ;;  %v3383_v21 = vld [vmem:[#allocation2 + $0x28] sm:$0xff] }
 0x370   :  { %2497 = vmatprep.subr.bf16.mxu0 %v2956_v2  ;;  %2517 = vmatprep.subr.bf16.mxu1 %v2956_v2 }
 0x373   :  { %2498 = vmatpush3.bf16.msra.mxu0 %v3066_v22  ;;  %2518 = vmatpush3.bf16.msra.mxu1 %v3069_v23  ;;  %v3389_v22 = vld [vmem:[#allocation2 + $0x40] sm:$0xff]  ;;  %v3391_v23 = vld [vmem:[#allocation2 + $0x48] sm:$0xff] }
 0x374   :  { %2499 = vmatprep.subr.bf16.mxu0 %v2956_v2  ;;  %2519 = vmatprep.subr.bf16.mxu1 %v2956_v2 }
 0x377   :  { %2500 = vmatpush3.bf16.msra.mxu0 %v3074_v24  ;;  %2520 = vmatpush3.bf16.msra.mxu1 %v3077_v25  ;;  %v3397_v24 = vld [vmem:[#allocation2 + $0x60] sm:$0xff]  ;;  %v3399_v25 = vld [vmem:[#allocation2 + $0x68] sm:$0xff] }
 0x378   :  { %2501 = vmatprep.subr.bf16.mxu0 %v2956_v2  ;;  %2521 = vmatprep.subr.bf16.mxu1 %v2956_v2 }
 0x37b   :  { %2502 = vmatpush3.bf16.msra.mxu0 %v3082_v26  ;;  %2522 = vmatpush3.bf16.msra.mxu1 %v3085_v27  ;;  %v3405_v26 = vld [vmem:[#allocation2 + $0x80] sm:$0xff]  ;;  %v3407_v27 = vld [vmem:[#allocation2 + $0x88] sm:$0xff] }
 0x37c   :  { %2503 = vmatprep.subr.bf16.mxu0 %v2956_v2  ;;  %2523 = vmatprep.subr.bf16.mxu1 %v2956_v2 }
 0x37f   :  { %2504 = vmatpush3.bf16.msra.mxu0 %v3090_v28  ;;  %2524 = vmatpush3.bf16.msra.mxu1 %v3093_v29  ;;  %v3413_v28 = vld [vmem:[#allocation2 + $0xa0] sm:$0xff]  ;;  %v3415_v29 = vld [vmem:[#allocation2 + $0xa8] sm:$0xff] }
 0x380   :  { %2505 = vmatprep.subr.bf16.mxu0 %v2956_v2  ;;  %2525 = vmatprep.subr.bf16.mxu1 %v2956_v2 }
 0x383   :  { %2506 = vmatpush3.bf16.msra.mxu0 %v3098_v30  ;;  %2526 = vmatpush3.bf16.msra.mxu1 %v3101_v31  ;;  %v3421_v30 = vld [vmem:[#allocation2 + $0xc0] sm:$0xff]  ;;  %v3423_v31 = vld [vmem:[#allocation2 + $0xc8] sm:$0xff] }
 0x384   :  { %2507 = vmatprep.subr.bf16.mxu0 %v2956_v2  ;;  %2527 = vmatprep.subr.bf16.mxu1 %v2956_v2 }
 0x387   :  { %2508 = vmatpush3.bf16.msra.mxu0 %v3106_v32  ;;  %2528 = vmatpush3.bf16.msra.mxu1 %v3109_v33  ;;  %v3429_v32 = vld [vmem:[#allocation2 + $0xe0] sm:$0xff]  ;;  %v3431_v33 = vld [vmem:[#allocation2 + $0xe8] sm:$0xff] }
 0x388   :  { %2533 = vmatprep.subr.bf16.mxu0 %v2956_v2  ;;  %2553 = vmatprep.subr.bf16.mxu1 %v2956_v2 }
 0x38a   :  { %2510 = vmatmul.mubr.bf16.vlgmr.msra.gmra.mrb[28].mxu0 %v743_v0  ;;  %2530 = vmatmul.mubr.bf16.vlgmr.msra.gmra.mrb[28].mxu1 %v743_v0 }
 0x38b   :  { %2549 = vmatprep.mubr.msk.bf16.mxu0 %vm2957_vm0, %v2956_v2  ;;  %2569 = vmatprep.mubr.msk.bf16.mxu1 %vm2957_vm0, %v2956_v2 }
 0x38c   :  { %2534 = vmatpush3.bf16.msra.mxu0 %v3373_v17  ;;  %2554 = vmatpush3.bf16.msra.mxu1 %v3375_v18 }
 0x38d   :  { %2535 = vmatprep.subr.bf16.mxu0 %v2956_v2  ;;  %2555 = vmatprep.subr.bf16.mxu1 %v2956_v2 }
 0x390   :  { %2536 = vmatpush3.bf16.msra.mxu0 %v3381_v20  ;;  %2556 = vmatpush3.bf16.msra.mxu1 %v3383_v21 }
 0x391   :  { %2537 = vmatprep.subr.bf16.mxu0 %v2956_v2  ;;  %2557 = vmatprep.subr.bf16.mxu1 %v2956_v2 }
 0x394   :  { %2538 = vmatpush3.bf16.msra.mxu0 %v3389_v22  ;;  %2558 = vmatpush3.bf16.msra.mxu1 %v3391_v23 }
 0x395   :  { %2539 = vmatprep.subr.bf16.mxu0 %v2956_v2  ;;  %2559 = vmatprep.subr.bf16.mxu1 %v2956_v2 }
 0x398   :  { %2540 = vmatpush3.bf16.msra.mxu0 %v3397_v24  ;;  %2560 = vmatpush3.bf16.msra.mxu1 %v3399_v25 }
 0x399   :  { %2541 = vmatprep.subr.bf16.mxu0 %v2956_v2  ;;  %2561 = vmatprep.subr.bf16.mxu1 %v2956_v2 }
 0x39c   :  { %2542 = vmatpush3.bf16.msra.mxu0 %v3405_v26  ;;  %2562 = vmatpush3.bf16.msra.mxu1 %v3407_v27 }
 0x39d   :  { %2543 = vmatprep.subr.bf16.mxu0 %v2956_v2  ;;  %2563 = vmatprep.subr.bf16.mxu1 %v2956_v2 }
 0x3a0   :  { %2544 = vmatpush3.bf16.msra.mxu0 %v3413_v28  ;;  %2564 = vmatpush3.bf16.msra.mxu1 %v3415_v29 }
 0x3a1   :  { %2545 = vmatprep.subr.bf16.mxu0 %v2956_v2  ;;  %2565 = vmatprep.subr.bf16.mxu1 %v2956_v2 }
 0x3a4   :  { %2546 = vmatpush3.bf16.msra.mxu0 %v3421_v30  ;;  %2566 = vmatpush3.bf16.msra.mxu1 %v3423_v31 }
 0x3a5   :  { %2547 = vmatprep.subr.bf16.mxu0 %v2956_v2  ;;  %2567 = vmatprep.subr.bf16.mxu1 %v2956_v2 }
 0x3a8   :  { %2548 = vmatpush3.bf16.msra.mxu0 %v3429_v32  ;;  %2568 = vmatpush3.bf16.msra.mxu1 %v3431_v33 }
 0x3a9   :  { %2573 = vmatprep.subr.bf16.mxu0 %v2956_v2  ;;  %2593 = vmatprep.subr.bf16.mxu1 %v2956_v2 }
 0x43d   :  { %v792_v60 = vpop.f32.mrb[24].mxu0  ;;  %v849_v1 = vpop.f32.mrb[24].mxu1 }
 0x43e   :  { %v2471_v3 = vpop.f32.mrb[25].mxu0  ;;  %v2491_v4 = vpop.f32.mrb[25].mxu1  ;;  %v855_v13 = vadd.f32 %v849_v1, %v814_v11  ;;  %v798_v14 = vadd.f32 %v792_v60, %v757_v12  ;;  %v3447_v1 = vld [vmem:[#allocation2 + $0x10] sm:$0xff]  ;;  %v3496_v12 = vld [vmem:[#allocation2 + $0xb8] sm:$0xff] }
 0x43f   :  { %v795_v5 = vpop.f32.mrb[26].mxu0  ;;  %v852_v6 = vpop.f32.mrb[26].mxu1  ;;  %v3449_v3 = vld [vmem:[#allocation2 + $0x18] sm:$0xff]  ;;  %v3494_v11 = vld [vmem:[#allocation2 + $0xb0] sm:$0xff] }
 0x440   :  { %v2472_v7 = vpop.f32.mrb[27].mxu0  ;;  %v2492_v8 = vpop.f32.mrb[27].mxu1  ;;  %v856_v15 = vmul.f32 0.5, %v855_v13  ;;  %v799_v16 = vmul.f32 0.5, %v798_v14  ;;  %v3460_v4 = vld [vmem:[#allocation2 + $0x38] sm:$0xff]  ;;  %v3470_v5 = vld [vmem:[#allocation2 + $0x50] sm:$0xff] }
 0x441   :  { %v3472_v6 = vld [vmem:[#allocation2 + $0x58] sm:$0xff]  ;;  %v3478_v7 = vld [vmem:[#allocation2 + $0x70] sm:$0xff] }
 0x442   :  { %2895 = vtanh.f32 %v856_v15  ;;  %v3480_v8 = vld [vmem:[#allocation2 + $0x78] sm:$0xff]  ;;  %v3502_v13 = vld [vmem:[#allocation2 + $0xd0] sm:$0xff] }
 0x443   :  { %2897 = vtanh.f32 %v799_v16  ;;  %v3504_v14 = vld [vmem:[#allocation2 + $0xd8] sm:$0xff]  ;;  %v3510_v15 = vld [vmem:[#allocation2 + $0xf0] sm:$0xff] }
 0x444   :  { %v3512_v16 = vld [vmem:[#allocation2 + $0xf8] sm:$0xff] }
 0x44c   :  { %v2896_v48 = vpop.eup %2895 }
 0x44d   :  { %v2898_v51 = vpop.eup %2897  ;;  %v858_v52 = vadd.f32 1.0, %v2896_v48 }
 0x44e   :  { %v801_v54 = vadd.f32 1.0, %v2898_v51 }
 0x44f   :  { %v859_v55 = vmul.f32 0.5, %v858_v52  ;;  %v1914_v52 = vld [vmem:[%s3781_s0 + $0x48] sm:$0xff] }
 0x450   :  { %v802_v56 = vmul.f32 0.5, %v801_v54  ;;  %v1098_v54 = vunpack.c.l.bf16 %v1914_v52 }
 0x451   :  { %v968_v58 = vmul.f32 %v859_v55, %v3327_v61  ;;  %v3458_v61 = vld [vmem:[#allocation2 + $0x30] sm:$0xff] }
 0x45d   :  { %v903_v39 = vpop.f32.mrb[28].mxu0  ;;  %v957_v40 = vpop.f32.mrb[28].mxu1 }
 0x45e   :  { %v909_v41 = vadd.f32 %v903_v39, %v868_v37  ;;  %v2511_v42 = vpop.f32.mrb[29].mxu0  ;;  %v2531_v44 = vpop.f32.mrb[29].mxu1  ;;  %v963_v45 = vadd.f32 %v957_v40, %v922_v38 }
 0x45f   :  { %v906_v46 = vpop.f32.mrb[30].mxu0  ;;  %v960_v47 = vpop.f32.mrb[30].mxu1  ;;  %v1913_v44 = vld [vmem:[%s3781_s0 + $0x40] sm:$0xff] }
 0x460   :  { %2899 = vtanh.f32 %v909_v41  ;;  %v2512_v49 = vpop.f32.mrb[31].mxu0  ;;  %v2532_v50 = vpop.f32.mrb[31].mxu1  ;;  %v964_v53 = vmul.f32 0.5, %v963_v45  ;;  %v1042_v45 = vrot.slane %v1913_v44, 4  ;;  %v987_v47 = vunpack.c.l.bf16 %v1913_v44 }
 0x462   :  { %2901 = vtanh.f32 %v964_v53  ;;  %v1044_v46 = vunpack.c.l.bf16 %v1042_v45  ;;  %v1150_v53 = vrot.slane %v1914_v52, 4 }
 0x464   :  { %v1152_v55 = vunpack.c.l.bf16 %v1150_v53 }
 0x46a   :  { %v2900_v57 = vpop.eup %2899 }
 0x46b   :  { %v969_v59 = vmul.f32 %v2900_v57, %v802_v56 }
 0x46c   :  { %v2902_v63 = vpop.eup %2901 }
 0x46d   :  { %v3444_v62 = vadd.f32 %v969_v59, %v968_v58  ;;  %v966_v19 = vadd.f32 1.0, %v2902_v63 }
 0x46f   :  { %2903 = vtanh.f32 %v3444_v62  ;;  %v967_v34 = vmul.f32 0.5, %v966_v19 }
 0x479   :  { %v2904_v35 = vpop.eup %2903 }
 0x47a   :  { %v972_v0 = vmul.f32 %v2904_v35, %v967_v34 }
 0x47c   :  { %v973_v60 = vpack.c.bf16 %v972_v0, %v972_v0 }
 0x47e   :  { %1912 = vst [vmem:[%s3783_s2 + $0xc] sm:$0xf] %v973_v60  ;;  %2550 = vmatmul.mubr.bf16.vlgmr.msra.gmra.mrb[32].mxu0 %v973_v60  ;;  %2570 = vmatmul.mubr.bf16.vlgmr.msra.gmra.mrb[32].mxu1 %v973_v60 }
 0x47f   :  { %2574 = vmatpush3.bf16.msra.mxu0 %v3447_v1  ;;  %2594 = vmatpush3.bf16.msra.mxu1 %v3449_v3 }
 0x480   :  { %2575 = vmatprep.subr.bf16.mxu0 %v2956_v2  ;;  %2595 = vmatprep.subr.bf16.mxu1 %v2956_v2 }
 0x481   :  { %2589 = vmatprep.mubr.msk.bf16.mxu0 %vm2957_vm0, %v2956_v2  ;;  %2609 = vmatprep.mubr.msk.bf16.mxu1 %vm2957_vm0, %v2956_v2 }
 0x483   :  { %2576 = vmatpush3.bf16.msra.mxu0 %v3458_v61  ;;  %2596 = vmatpush3.bf16.msra.mxu1 %v3460_v4 }
 0x484   :  { %2577 = vmatprep.subr.bf16.mxu0 %v2956_v2  ;;  %2597 = vmatprep.subr.bf16.mxu1 %v2956_v2 }
 0x487   :  { %2578 = vmatpush3.bf16.msra.mxu0 %v3470_v5  ;;  %2598 = vmatpush3.bf16.msra.mxu1 %v3472_v6 }
 0x488   :  { %2579 = vmatprep.subr.bf16.mxu0 %v2956_v2  ;;  %2599 = vmatprep.subr.bf16.mxu1 %v2956_v2 }
 0x48b   :  { %2580 = vmatpush3.bf16.msra.mxu0 %v3478_v7  ;;  %2600 = vmatpush3.bf16.msra.mxu1 %v3480_v8 }
 0x48c   :  { %2581 = vmatprep.subr.bf16.mxu0 %v2956_v2  ;;  %2601 = vmatprep.subr.bf16.mxu1 %v2956_v2 }
 0x48f   :  { %2582 = vmatpush3.bf16.msra.mxu0 %v3486_v9  ;;  %2602 = vmatpush3.bf16.msra.mxu1 %v3488_v10 }
 0x490   :  { %2583 = vmatprep.subr.bf16.mxu0 %v2956_v2  ;;  %2603 = vmatprep.subr.bf16.mxu1 %v2956_v2 }
 0x493   :  { %2584 = vmatpush3.bf16.msra.mxu0 %v3494_v11  ;;  %2604 = vmatpush3.bf16.msra.mxu1 %v3496_v12 }
 0x494   :  { %2585 = vmatprep.subr.bf16.mxu0 %v2956_v2  ;;  %2605 = vmatprep.subr.bf16.mxu1 %v2956_v2 }
 0x497   :  { %2586 = vmatpush3.bf16.msra.mxu0 %v3502_v13  ;;  %2606 = vmatpush3.bf16.msra.mxu1 %v3504_v14 }
 0x498   :  { %2587 = vmatprep.subr.bf16.mxu0 %v2956_v2  ;;  %2607 = vmatprep.subr.bf16.mxu1 %v2956_v2 }
 0x49b   :  { %2588 = vmatpush3.bf16.msra.mxu0 %v3510_v15  ;;  %2608 = vmatpush3.bf16.msra.mxu1 %v3512_v16 }
 0x49c   :  { %2613 = vmatprep.subr.bf16.mxu0 %v2956_v2  ;;  %2633 = vmatprep.subr.bf16.mxu1 %v2956_v2 }
 0x49e   :  { %2590 = vmatmul.mubr.bf16.vlgmr.msra.gmra.mrb[36].mxu0 %v973_v60  ;;  %2610 = vmatmul.mubr.bf16.vlgmr.msra.gmra.mrb[36].mxu1 %v973_v60 }
 0x49f   :  { %2614 = vmatpush3.bf16.msra.mxu0 %v3373_v17  ;;  %2634 = vmatpush3.bf16.msra.mxu1 %v3375_v18 }
 0x4a0   :  { %2615 = vmatprep.subr.bf16.mxu0 %v2956_v2  ;;  %2635 = vmatprep.subr.bf16.mxu1 %v2956_v2 }
 0x4a1   :  { %2629 = vmatprep.mubr.msk.bf16.mxu0 %vm2957_vm0, %v2956_v2  ;;  %2649 = vmatprep.mubr.msk.bf16.mxu1 %vm2957_vm0, %v2956_v2 }
 0x4a3   :  { %2616 = vmatpush3.bf16.msra.mxu0 %v3381_v20  ;;  %2636 = vmatpush3.bf16.msra.mxu1 %v3383_v21 }
 0x4a4   :  { %2617 = vmatprep.subr.bf16.mxu0 %v2956_v2  ;;  %2637 = vmatprep.subr.bf16.mxu1 %v2956_v2 }
 0x4a7   :  { %2618 = vmatpush3.bf16.msra.mxu0 %v3389_v22  ;;  %2638 = vmatpush3.bf16.msra.mxu1 %v3391_v23 }
 0x4a8   :  { %2619 = vmatprep.subr.bf16.mxu0 %v2956_v2  ;;  %2639 = vmatprep.subr.bf16.mxu1 %v2956_v2 }
 0x4ab   :  { %2620 = vmatpush3.bf16.msra.mxu0 %v3397_v24  ;;  %2640 = vmatpush3.bf16.msra.mxu1 %v3399_v25 }
 0x4ac   :  { %2621 = vmatprep.subr.bf16.mxu0 %v2956_v2  ;;  %2641 = vmatprep.subr.bf16.mxu1 %v2956_v2 }
 0x4af   :  { %2622 = vmatpush3.bf16.msra.mxu0 %v3405_v26  ;;  %2642 = vmatpush3.bf16.msra.mxu1 %v3407_v27 }
 0x4b0   :  { %2623 = vmatprep.subr.bf16.mxu0 %v2956_v2  ;;  %2643 = vmatprep.subr.bf16.mxu1 %v2956_v2 }
 0x4b3   :  { %2624 = vmatpush3.bf16.msra.mxu0 %v3413_v28  ;;  %2644 = vmatpush3.bf16.msra.mxu1 %v3415_v29 }
 0x4b4   :  { %2625 = vmatprep.subr.bf16.mxu0 %v2956_v2  ;;  %2645 = vmatprep.subr.bf16.mxu1 %v2956_v2 }
 0x4b7   :  { %2626 = vmatpush3.bf16.msra.mxu0 %v3421_v30  ;;  %2646 = vmatpush3.bf16.msra.mxu1 %v3423_v31 }
 0x4b8   :  { %2627 = vmatprep.subr.bf16.mxu0 %v2956_v2  ;;  %2647 = vmatprep.subr.bf16.mxu1 %v2956_v2 }
 0x4bb   :  { %2628 = vmatpush3.bf16.msra.mxu0 %v3429_v32  ;;  %2648 = vmatpush3.bf16.msra.mxu1 %v3431_v33 }
 0x4bc   :  { %2653 = vmatprep.subr.bf16.mxu0 %v2956_v2  ;;  %2673 = vmatprep.subr.bf16.mxu1 %v2956_v2 }
 0x551   :  { %v1022_v43 = vpop.f32.mrb[32].mxu0  ;;  %v1079_v36 = vpop.f32.mrb[32].mxu1 }
 0x552   :  { %v2551_v37 = vpop.f32.mrb[33].mxu0  ;;  %v2571_v38 = vpop.f32.mrb[33].mxu1  ;;  %v1085_v48 = vadd.f32 %v1079_v36, %v1044_v46  ;;  %v1028_v49 = vadd.f32 %v1022_v43, %v987_v47 }
 0x553   :  { %v1025_v39 = vpop.f32.mrb[34].mxu0  ;;  %v1082_v40 = vpop.f32.mrb[34].mxu1 }
 0x554   :  { %v2552_v41 = vpop.f32.mrb[35].mxu0  ;;  %v2572_v42 = vpop.f32.mrb[35].mxu1  ;;  %v1086_v50 = vmul.f32 0.5, %v1085_v48  ;;  %v1029_v51 = vmul.f32 0.5, %v1028_v49 }
 0x556   :  { %2905 = vtanh.f32 %v1086_v50 }
 0x557   :  { %2907 = vtanh.f32 %v1029_v51 }
 0x560   :  { %v2906_v0 = vpop.eup %2905 }
 0x561   :  { %v2908_v36 = vpop.eup %2907  ;;  %v1088_v37 = vadd.f32 1.0, %v2906_v0 }
 0x562   :  { %v1031_v39 = vadd.f32 1.0, %v2908_v36 }
 0x563   :  { %v1089_v40 = vmul.f32 0.5, %v1088_v37  ;;  %v1917_v37 = vld [vmem:[%s3781_s0 + $0x58] sm:$0xff] }
 0x564   :  { %v1032_v41 = vmul.f32 0.5, %v1031_v39  ;;  %v1328_v39 = vunpack.c.l.bf16 %v1917_v37 }
 0x565   :  { %v1198_v44 = vmul.f32 %v1089_v40, %v3444_v62 }
 0x571   :  { %v1133_v56 = vpop.f32.mrb[36].mxu0  ;;  %v1187_v57 = vpop.f32.mrb[36].mxu1 }
 0x572   :  { %v1139_v58 = vadd.f32 %v1133_v56, %v1098_v54  ;;  %v2591_v59 = vpop.f32.mrb[37].mxu0  ;;  %v2611_v63 = vpop.f32.mrb[37].mxu1  ;;  %v1193_v19 = vadd.f32 %v1187_v57, %v1152_v55 }
 0x573   :  { %v1136_v34 = vpop.f32.mrb[38].mxu0  ;;  %v1190_v35 = vpop.f32.mrb[38].mxu1  ;;  %v1916_v63 = vld [vmem:[%s3781_s0 + $0x50] sm:$0xff] }
 0x574   :  { %2909 = vtanh.f32 %v1139_v58  ;;  %v2592_v60 = vpop.f32.mrb[39].mxu0  ;;  %v2612_v43 = vpop.f32.mrb[39].mxu1  ;;  %v1194_v38 = vmul.f32 0.5, %v1193_v19  ;;  %v1272_v19 = vrot.slane %v1916_v63, 4  ;;  %v1217_v35 = vunpack.c.l.bf16 %v1916_v63 }
 0x576   :  { %2911 = vtanh.f32 %v1194_v38  ;;  %v1274_v34 = vunpack.c.l.bf16 %v1272_v19  ;;  %v1380_v38 = vrot.slane %v1917_v37, 4 }
 0x578   :  { %v1382_v40 = vunpack.c.l.bf16 %v1380_v38 }
 0x57e   :  { %v2910_v42 = vpop.eup %2909 }
 0x57f   :  { %v1199_v45 = vmul.f32 %v2910_v42, %v1032_v41 }
 0x580   :  { %v2912_v47 = vpop.eup %2911 }
 0x581   :  { %v3561_v46 = vadd.f32 %v1199_v45, %v1198_v44  ;;  %v1196_v48 = vadd.f32 1.0, %v2912_v47 }
 0x583   :  { %2913 = vtanh.f32 %v3561_v46  ;;  %v1197_v49 = vmul.f32 0.5, %v1196_v48 }
 0x58d   :  { %v2914_v50 = vpop.eup %2913 }
 0x58e   :  { %v1202_v51 = vmul.f32 %v2914_v50, %v1197_v49 }
 0x590   :  { %v1203_v52 = vpack.c.bf16 %v1202_v51, %v1202_v51 }
 0x592   :  { %1915 = vst [vmem:[%s3783_s2 + $0x10] sm:$0xf] %v1203_v52  ;;  %2630 = vmatmul.mubr.bf16.vlgmr.msra.gmra.mrb[40].mxu0 %v1203_v52  ;;  %2650 = vmatmul.mubr.bf16.vlgmr.msra.gmra.mrb[40].mxu1 %v1203_v52 }
 0x593   :  { %2654 = vmatpush3.bf16.msra.mxu0 %v3447_v1  ;;  %2674 = vmatpush3.bf16.msra.mxu1 %v3449_v3 }
 0x594   :  { %2655 = vmatprep.subr.bf16.mxu0 %v2956_v2  ;;  %2675 = vmatprep.subr.bf16.mxu1 %v2956_v2 }
 0x595   :  { %2669 = vmatprep.mubr.msk.bf16.mxu0 %vm2957_vm0, %v2956_v2  ;;  %2689 = vmatprep.mubr.msk.bf16.mxu1 %vm2957_vm0, %v2956_v2 }
 0x597   :  { %2656 = vmatpush3.bf16.msra.mxu0 %v3458_v61  ;;  %2676 = vmatpush3.bf16.msra.mxu1 %v3460_v4 }
 0x598   :  { %2657 = vmatprep.subr.bf16.mxu0 %v2956_v2  ;;  %2677 = vmatprep.subr.bf16.mxu1 %v2956_v2 }
 0x59b   :  { %2658 = vmatpush3.bf16.msra.mxu0 %v3470_v5  ;;  %2678 = vmatpush3.bf16.msra.mxu1 %v3472_v6 }
 0x59c   :  { %2659 = vmatprep.subr.bf16.mxu0 %v2956_v2  ;;  %2679 = vmatprep.subr.bf16.mxu1 %v2956_v2 }
 0x59f   :  { %2660 = vmatpush3.bf16.msra.mxu0 %v3478_v7  ;;  %2680 = vmatpush3.bf16.msra.mxu1 %v3480_v8 }
 0x5a0   :  { %2661 = vmatprep.subr.bf16.mxu0 %v2956_v2  ;;  %2681 = vmatprep.subr.bf16.mxu1 %v2956_v2 }
 0x5a3   :  { %2662 = vmatpush3.bf16.msra.mxu0 %v3486_v9  ;;  %2682 = vmatpush3.bf16.msra.mxu1 %v3488_v10 }
 0x5a4   :  { %2663 = vmatprep.subr.bf16.mxu0 %v2956_v2  ;;  %2683 = vmatprep.subr.bf16.mxu1 %v2956_v2 }
 0x5a7   :  { %2664 = vmatpush3.bf16.msra.mxu0 %v3494_v11  ;;  %2684 = vmatpush3.bf16.msra.mxu1 %v3496_v12 }
 0x5a8   :  { %2665 = vmatprep.subr.bf16.mxu0 %v2956_v2  ;;  %2685 = vmatprep.subr.bf16.mxu1 %v2956_v2 }
 0x5ab   :  { %2666 = vmatpush3.bf16.msra.mxu0 %v3502_v13  ;;  %2686 = vmatpush3.bf16.msra.mxu1 %v3504_v14 }
 0x5ac   :  { %2667 = vmatprep.subr.bf16.mxu0 %v2956_v2  ;;  %2687 = vmatprep.subr.bf16.mxu1 %v2956_v2 }
 0x5af   :  { %2668 = vmatpush3.bf16.msra.mxu0 %v3510_v15  ;;  %2688 = vmatpush3.bf16.msra.mxu1 %v3512_v16 }
 0x5b0   :  { %2693 = vmatprep.subr.bf16.mxu0 %v2956_v2  ;;  %2713 = vmatprep.subr.bf16.mxu1 %v2956_v2 }
 0x5b2   :  { %2670 = vmatmul.mubr.bf16.vlgmr.msra.gmra.mrb[44].mxu0 %v1203_v52  ;;  %2690 = vmatmul.mubr.bf16.vlgmr.msra.gmra.mrb[44].mxu1 %v1203_v52 }
 0x5b3   :  { %2694 = vmatpush3.bf16.msra.mxu0 %v3373_v17  ;;  %2714 = vmatpush3.bf16.msra.mxu1 %v3375_v18 }
 0x5b4   :  { %2695 = vmatprep.subr.bf16.mxu0 %v2956_v2  ;;  %2715 = vmatprep.subr.bf16.mxu1 %v2956_v2 }
 0x5b5   :  { %2709 = vmatprep.mubr.msk.bf16.mxu0 %vm2957_vm0, %v2956_v2  ;;  %2729 = vmatprep.mubr.msk.bf16.mxu1 %vm2957_vm0, %v2956_v2 }
 0x5b7   :  { %2696 = vmatpush3.bf16.msra.mxu0 %v3381_v20  ;;  %2716 = vmatpush3.bf16.msra.mxu1 %v3383_v21 }
 0x5b8   :  { %2697 = vmatprep.subr.bf16.mxu0 %v2956_v2  ;;  %2717 = vmatprep.subr.bf16.mxu1 %v2956_v2 }
 0x5bb   :  { %2698 = vmatpush3.bf16.msra.mxu0 %v3389_v22  ;;  %2718 = vmatpush3.bf16.msra.mxu1 %v3391_v23 }
 0x5bc   :  { %2699 = vmatprep.subr.bf16.mxu0 %v2956_v2  ;;  %2719 = vmatprep.subr.bf16.mxu1 %v2956_v2 }
 0x5bf   :  { %2700 = vmatpush3.bf16.msra.mxu0 %v3397_v24  ;;  %2720 = vmatpush3.bf16.msra.mxu1 %v3399_v25 }
 0x5c0   :  { %2701 = vmatprep.subr.bf16.mxu0 %v2956_v2  ;;  %2721 = vmatprep.subr.bf16.mxu1 %v2956_v2 }
 0x5c3   :  { %2702 = vmatpush3.bf16.msra.mxu0 %v3405_v26  ;;  %2722 = vmatpush3.bf16.msra.mxu1 %v3407_v27 }
 0x5c4   :  { %2703 = vmatprep.subr.bf16.mxu0 %v2956_v2  ;;  %2723 = vmatprep.subr.bf16.mxu1 %v2956_v2 }
 0x5c7   :  { %2704 = vmatpush3.bf16.msra.mxu0 %v3413_v28  ;;  %2724 = vmatpush3.bf16.msra.mxu1 %v3415_v29 }
 0x5c8   :  { %2705 = vmatprep.subr.bf16.mxu0 %v2956_v2  ;;  %2725 = vmatprep.subr.bf16.mxu1 %v2956_v2 }
 0x5cb   :  { %2706 = vmatpush3.bf16.msra.mxu0 %v3421_v30  ;;  %2726 = vmatpush3.bf16.msra.mxu1 %v3423_v31 }
 0x5cc   :  { %2707 = vmatprep.subr.bf16.mxu0 %v2956_v2  ;;  %2727 = vmatprep.subr.bf16.mxu1 %v2956_v2 }
 0x5cf   :  { %2708 = vmatpush3.bf16.msra.mxu0 %v3429_v32  ;;  %2728 = vmatpush3.bf16.msra.mxu1 %v3431_v33 }
 0x5d0   :  { %2733 = vmatprep.subr.bf16.mxu0 %v2956_v2  ;;  %2753 = vmatprep.subr.bf16.mxu1 %v2956_v2 }
 0x665   :  { %v1252_v62 = vpop.f32.mrb[40].mxu0  ;;  %v1309_v53 = vpop.f32.mrb[40].mxu1 }
 0x666   :  { %v2631_v54 = vpop.f32.mrb[41].mxu0  ;;  %v2651_v55 = vpop.f32.mrb[41].mxu1  ;;  %v1315_v0 = vadd.f32 %v1309_v53, %v1274_v34  ;;  %v1258_v60 = vadd.f32 %v1252_v62, %v1217_v35 }
 0x667   :  { %v1255_v56 = vpop.f32.mrb[42].mxu0  ;;  %v1312_v57 = vpop.f32.mrb[42].mxu1 }
 0x668   :  { %v2632_v58 = vpop.f32.mrb[43].mxu0  ;;  %v2652_v59 = vpop.f32.mrb[43].mxu1  ;;  %v1316_v43 = vmul.f32 0.5, %v1315_v0  ;;  %v1259_v36 = vmul.f32 0.5, %v1258_v60 }
 0x66a   :  { %2915 = vtanh.f32 %v1316_v43 }
 0x66b   :  { %2917 = vtanh.f32 %v1259_v36 }
 0x674   :  { %v2916_v51 = vpop.eup %2915 }
 0x675   :  { %v2918_v53 = vpop.eup %2917  ;;  %v1318_v54 = vadd.f32 1.0, %v2916_v51 }
 0x676   :  { %v1261_v56 = vadd.f32 1.0, %v2918_v53 }
 0x677   :  { %v1319_v57 = vmul.f32 0.5, %v1318_v54 }
 0x678   :  { %v1262_v58 = vmul.f32 0.5, %v1261_v56 }
 0x679   :  { %v1428_v63 = vmul.f32 %v1319_v57, %v3561_v46  ;;  %v1920_v46 = vld [vmem:[%s3781_s0 + $0x68] sm:$0xff] }
 0x67a   :  { %v1610_v38 = vrot.slane %v1920_v46, 4 }
 0x685   :  { %v1363_v41 = vpop.f32.mrb[44].mxu0  ;;  %v1417_v42 = vpop.f32.mrb[44].mxu1 }
 0x686   :  { %v1369_v44 = vadd.f32 %v1363_v41, %v1328_v39  ;;  %v2671_v45 = vpop.f32.mrb[45].mxu0  ;;  %v2691_v47 = vpop.f32.mrb[45].mxu1  ;;  %v1423_v48 = vadd.f32 %v1417_v42, %v1382_v40  ;;  %v1558_v39 = vunpack.c.l.bf16 %v1920_v46  ;;  %v1612_v40 = vunpack.c.l.bf16 %v1610_v38 }
 0x687   :  { %v1366_v49 = vpop.f32.mrb[46].mxu0  ;;  %v1420_v50 = vpop.f32.mrb[46].mxu1 }
 0x688   :  { %2919 = vtanh.f32 %v1369_v44  ;;  %v2672_v52 = vpop.f32.mrb[47].mxu0  ;;  %v2692_v62 = vpop.f32.mrb[47].mxu1  ;;  %v1424_v55 = vmul.f32 0.5, %v1423_v48 }
 0x68a   :  { %2921 = vtanh.f32 %v1424_v55 }
 0x692   :  { %v2920_v59 = vpop.eup %2919 }
 0x693   :  { %v1429_v19 = vmul.f32 %v2920_v59, %v1262_v58 }
 0x694   :  { %v2922_v35 = vpop.eup %2921 }
 0x695   :  { %v3646_v34 = vadd.f32 %v1429_v19, %v1428_v63  ;;  %v1426_v0 = vadd.f32 1.0, %v2922_v35 }
 0x697   :  { %2923 = vtanh.f32 %v3646_v34  ;;  %v1427_v60 = vmul.f32 0.5, %v1426_v0 }
 0x6a1   :  { %v2924_v43 = vpop.eup %2923 }
 0x6a2   :  { %v1432_v36 = vmul.f32 %v2924_v43, %v1427_v60 }
 0x6a4   :  { %v1433_v37 = vpack.c.bf16 %v1432_v36, %v1432_v36 }
 0x6a6   :  { %1918 = vst [vmem:[%s3783_s2 + $0x14] sm:$0xf] %v1433_v37  ;;  %2710 = vmatmul.mubr.bf16.vlgmr.msra.gmra.mrb[48].mxu0 %v1433_v37  ;;  %2730 = vmatmul.mubr.bf16.vlgmr.msra.gmra.mrb[48].mxu1 %v1433_v37 }
 0x6a7   :  { %2734 = vmatpush3.bf16.msra.mxu0 %v3447_v1  ;;  %2754 = vmatpush3.bf16.msra.mxu1 %v3449_v3 }
 0x6a8   :  { %2735 = vmatprep.subr.bf16.mxu0 %v2956_v2  ;;  %2755 = vmatprep.subr.bf16.mxu1 %v2956_v2 }
 0x6a9   :  { %2749 = vmatprep.mubr.msk.bf16.mxu0 %vm2957_vm0, %v2956_v2  ;;  %2769 = vmatprep.mubr.msk.bf16.mxu1 %vm2957_vm0, %v2956_v2 }
 0x6ab   :  { %2736 = vmatpush3.bf16.msra.mxu0 %v3458_v61  ;;  %2756 = vmatpush3.bf16.msra.mxu1 %v3460_v4 }
 0x6ac   :  { %2737 = vmatprep.subr.bf16.mxu0 %v2956_v2  ;;  %2757 = vmatprep.subr.bf16.mxu1 %v2956_v2 }
 0x6af   :  { %2738 = vmatpush3.bf16.msra.mxu0 %v3470_v5  ;;  %2758 = vmatpush3.bf16.msra.mxu1 %v3472_v6 }
 0x6b0   :  { %2739 = vmatprep.subr.bf16.mxu0 %v2956_v2  ;;  %2759 = vmatprep.subr.bf16.mxu1 %v2956_v2 }
 0x6b3   :  { %2740 = vmatpush3.bf16.msra.mxu0 %v3478_v7  ;;  %2760 = vmatpush3.bf16.msra.mxu1 %v3480_v8 }
 0x6b4   :  { %2741 = vmatprep.subr.bf16.mxu0 %v2956_v2  ;;  %2761 = vmatprep.subr.bf16.mxu1 %v2956_v2 }
 0x6b7   :  { %2742 = vmatpush3.bf16.msra.mxu0 %v3486_v9  ;;  %2762 = vmatpush3.bf16.msra.mxu1 %v3488_v10 }
 0x6b8   :  { %2743 = vmatprep.subr.bf16.mxu0 %v2956_v2  ;;  %2763 = vmatprep.subr.bf16.mxu1 %v2956_v2 }
 0x6bb   :  { %2744 = vmatpush3.bf16.msra.mxu0 %v3494_v11  ;;  %2764 = vmatpush3.bf16.msra.mxu1 %v3496_v12 }
 0x6bc   :  { %2745 = vmatprep.subr.bf16.mxu0 %v2956_v2  ;;  %2765 = vmatprep.subr.bf16.mxu1 %v2956_v2 }
 0x6bf   :  { %2746 = vmatpush3.bf16.msra.mxu0 %v3502_v13  ;;  %2766 = vmatpush3.bf16.msra.mxu1 %v3504_v14 }
 0x6c0   :  { %2747 = vmatprep.subr.bf16.mxu0 %v2956_v2  ;;  %2767 = vmatprep.subr.bf16.mxu1 %v2956_v2 }
 0x6c3   :  { %2748 = vmatpush3.bf16.msra.mxu0 %v3510_v15  ;;  %2768 = vmatpush3.bf16.msra.mxu1 %v3512_v16 }
 0x6c4   :  { %2773 = vmatprep.subr.bf16.mxu0 %v2956_v2  ;;  %2793 = vmatprep.subr.bf16.mxu1 %v2956_v2 }
 0x6c6   :  { %2750 = vmatmul.mubr.bf16.vlgmr.msra.gmra.mrb[52].mxu0 %v1433_v37  ;;  %2770 = vmatmul.mubr.bf16.vlgmr.msra.gmra.mrb[52].mxu1 %v1433_v37 }
 0x6c7   :  { %2774 = vmatpush3.bf16.msra.mxu0 %v3373_v17  ;;  %2794 = vmatpush3.bf16.msra.mxu1 %v3375_v18 }
 0x6c8   :  { %2775 = vmatprep.subr.bf16.mxu0 %v2956_v2  ;;  %2795 = vmatprep.subr.bf16.mxu1 %v2956_v2 }
 0x6c9   :  { %2789 = vmatprep.mubr.msk.bf16.mxu0 %vm2957_vm0, %v2956_v2  ;;  %2809 = vmatprep.mubr.msk.bf16.mxu1 %vm2957_vm0, %v2956_v2 }
 0x6cb   :  { %2776 = vmatpush3.bf16.msra.mxu0 %v3381_v20  ;;  %2796 = vmatpush3.bf16.msra.mxu1 %v3383_v21 }
 0x6cc   :  { %2777 = vmatprep.subr.bf16.mxu0 %v2956_v2  ;;  %2797 = vmatprep.subr.bf16.mxu1 %v2956_v2 }
 0x6cf   :  { %2778 = vmatpush3.bf16.msra.mxu0 %v3389_v22  ;;  %2798 = vmatpush3.bf16.msra.mxu1 %v3391_v23 }
 0x6d0   :  { %2779 = vmatprep.subr.bf16.mxu0 %v2956_v2  ;;  %2799 = vmatprep.subr.bf16.mxu1 %v2956_v2 }
 0x6d3   :  { %2780 = vmatpush3.bf16.msra.mxu0 %v3397_v24  ;;  %2800 = vmatpush3.bf16.msra.mxu1 %v3399_v25 }
 0x6d4   :  { %2781 = vmatprep.subr.bf16.mxu0 %v2956_v2  ;;  %2801 = vmatprep.subr.bf16.mxu1 %v2956_v2 }
 0x6d7   :  { %2782 = vmatpush3.bf16.msra.mxu0 %v3405_v26  ;;  %2802 = vmatpush3.bf16.msra.mxu1 %v3407_v27  ;;  %v1919_v26 = vld [vmem:[%s3781_s0 + $0x60] sm:$0xff] }
 0x6d8   :  { %2783 = vmatprep.subr.bf16.mxu0 %v2956_v2  ;;  %2803 = vmatprep.subr.bf16.mxu1 %v2956_v2  ;;  %v1502_v27 = vrot.slane %v1919_v26, 4 }
 0x6db   :  { %2784 = vmatpush3.bf16.msra.mxu0 %v3413_v28  ;;  %2804 = vmatpush3.bf16.msra.mxu1 %v3415_v29  ;;  %v1504_v28 = vunpack.c.l.bf16 %v1502_v27  ;;  %v1447_v29 = vunpack.c.l.bf16 %v1919_v26 }
 0x6dc   :  { %2785 = vmatprep.subr.bf16.mxu0 %v2956_v2  ;;  %2805 = vmatprep.subr.bf16.mxu1 %v2956_v2 }
 0x6df   :  { %2786 = vmatpush3.bf16.msra.mxu0 %v3421_v30  ;;  %2806 = vmatpush3.bf16.msra.mxu1 %v3423_v31 }
 0x6e0   :  { %2787 = vmatprep.subr.bf16.mxu0 %v2956_v2  ;;  %2807 = vmatprep.subr.bf16.mxu1 %v2956_v2 }
 0x6e3   :  { %2788 = vmatpush3.bf16.msra.mxu0 %v3429_v32  ;;  %2808 = vmatpush3.bf16.msra.mxu1 %v3431_v33 }
 0x6e4   :  { %2813 = vmatprep.subr.bf16.mxu0 %v2956_v2  ;;  %2833 = vmatprep.subr.bf16.mxu1 %v2956_v2 }
 0x779   :  { %v1482_v17 = vpop.f32.mrb[48].mxu0  ;;  %v1539_v18 = vpop.f32.mrb[48].mxu1 }
 0x77a   :  { %v2711_v20 = vpop.f32.mrb[49].mxu0  ;;  %v2731_v21 = vpop.f32.mrb[49].mxu1  ;;  %v1545_v30 = vadd.f32 %v1539_v18, %v1504_v28  ;;  %v1488_v31 = vadd.f32 %v1482_v17, %v1447_v29 }
 0x77b   :  { %v1485_v22 = vpop.f32.mrb[50].mxu0  ;;  %v1542_v23 = vpop.f32.mrb[50].mxu1 }
 0x77c   :  { %v2712_v24 = vpop.f32.mrb[51].mxu0  ;;  %v2732_v25 = vpop.f32.mrb[51].mxu1  ;;  %v1546_v32 = vmul.f32 0.5, %v1545_v30  ;;  %v1489_v33 = vmul.f32 0.5, %v1488_v31 }
 0x77e   :  { %2925 = vtanh.f32 %v1546_v32 }
 0x77f   :  { %2927 = vtanh.f32 %v1489_v33 }
 0x788   :  { %v2926_v51 = vpop.eup %2925 }
 0x789   :  { %v2928_v53 = vpop.eup %2927  ;;  %v1548_v54 = vadd.f32 1.0, %v2926_v51 }
 0x78a   :  { %v1491_v56 = vadd.f32 1.0, %v2928_v53 }
 0x78b   :  { %v1549_v57 = vmul.f32 0.5, %v1548_v54 }
 0x78c   :  { %v1492_v58 = vmul.f32 0.5, %v1491_v56 }
 0x78d   :  { %v1658_v63 = vmul.f32 %v1549_v57, %v3646_v34 }
 0x799   :  { %v1593_v41 = vpop.f32.mrb[52].mxu0  ;;  %v1647_v42 = vpop.f32.mrb[52].mxu1 }
 0x79a   :  { %v1599_v44 = vadd.f32 %v1593_v41, %v1558_v39  ;;  %v2751_v45 = vpop.f32.mrb[53].mxu0  ;;  %v2771_v47 = vpop.f32.mrb[53].mxu1  ;;  %v1653_v48 = vadd.f32 %v1647_v42, %v1612_v40 }
 0x79b   :  { %v1596_v49 = vpop.f32.mrb[54].mxu0  ;;  %v1650_v50 = vpop.f32.mrb[54].mxu1 }
 0x79c   :  { %2929 = vtanh.f32 %v1599_v44  ;;  %v2752_v52 = vpop.f32.mrb[55].mxu0  ;;  %v2772_v62 = vpop.f32.mrb[55].mxu1  ;;  %v1654_v55 = vmul.f32 0.5, %v1653_v48 }
 0x79e   :  { %2931 = vtanh.f32 %v1654_v55 }
 0x7a6   :  { %v2930_v59 = vpop.eup %2929 }
 0x7a7   :  { %v1659_v19 = vmul.f32 %v2930_v59, %v1492_v58 }
 0x7a8   :  { %v2932_v0 = vpop.eup %2931 }
 0x7a9   :  { %v3731_v35 = vadd.f32 %v1659_v19, %v1658_v63  ;;  %v1656_v60 = vadd.f32 1.0, %v2932_v0 }
 0x7ab   :  { %2933 = vtanh.f32 %v3731_v35  ;;  %v1657_v43 = vmul.f32 0.5, %v1656_v60 }
 0x7b5   :  { %v2934_v36 = vpop.eup %2933 }
 0x7b6   :  { %v1662_v37 = vmul.f32 %v2934_v36, %v1657_v43 }
 0x7b8   :  { %v1663_v17 = vpack.c.bf16 %v1662_v37, %v1662_v37 }
 0x7ba   :  { %1921 = vst [vmem:[%s3783_s2 + $0x18] sm:$0xf] %v1663_v17  ;;  %2790 = vmatmul.mubr.bf16.vlgmr.msra.gmra.mrb[56].mxu0 %v1663_v17  ;;  %2810 = vmatmul.mubr.bf16.vlgmr.msra.gmra.mrb[56].mxu1 %v1663_v17 }
 0x7bb   :  { %2814 = vmatpush3.bf16.msra.mxu0 %v3447_v1  ;;  %2834 = vmatpush3.bf16.msra.mxu1 %v3449_v3 }
 0x7bc   :  { %2815 = vmatprep.subr.bf16.mxu0 %v2956_v2  ;;  %2835 = vmatprep.subr.bf16.mxu1 %v2956_v2 }
 0x7bd   :  { %2829 = vmatprep.mubr.msk.bf16.mxu0 %vm2957_vm0, %v2956_v2  ;;  %2849 = vmatprep.mubr.msk.bf16.mxu1 %vm2957_vm0, %v2956_v2 }
 0x7bf   :  { %2816 = vmatpush3.bf16.msra.mxu0 %v3458_v61  ;;  %2836 = vmatpush3.bf16.msra.mxu1 %v3460_v4 }
 0x7c0   :  { %2817 = vmatprep.subr.bf16.mxu0 %v2956_v2  ;;  %2837 = vmatprep.subr.bf16.mxu1 %v2956_v2 }
 0x7c3   :  { %2818 = vmatpush3.bf16.msra.mxu0 %v3470_v5  ;;  %2838 = vmatpush3.bf16.msra.mxu1 %v3472_v6 }
 0x7c4   :  { %2819 = vmatprep.subr.bf16.mxu0 %v2956_v2  ;;  %2839 = vmatprep.subr.bf16.mxu1 %v2956_v2 }
 0x7c7   :  { %2820 = vmatpush3.bf16.msra.mxu0 %v3478_v7  ;;  %2840 = vmatpush3.bf16.msra.mxu1 %v3480_v8 }
 0x7c8   :  { %2821 = vmatprep.subr.bf16.mxu0 %v2956_v2  ;;  %2841 = vmatprep.subr.bf16.mxu1 %v2956_v2 }
 0x7cb   :  { %2822 = vmatpush3.bf16.msra.mxu0 %v3486_v9  ;;  %2842 = vmatpush3.bf16.msra.mxu1 %v3488_v10  ;;  %v1922_v9 = vld [vmem:[%s3781_s0 + $0x70] sm:$0xff] }
 0x7cc   :  { %2823 = vmatprep.subr.bf16.mxu0 %v2956_v2  ;;  %2843 = vmatprep.subr.bf16.mxu1 %v2956_v2  ;;  %v1732_v10 = vrot.slane %v1922_v9, 4 }
 0x7cf   :  { %2824 = vmatpush3.bf16.msra.mxu0 %v3494_v11  ;;  %2844 = vmatpush3.bf16.msra.mxu1 %v3496_v12  ;;  %v1677_v11 = vunpack.c.l.bf16 %v1922_v9 }
 0x7d0   :  { %2825 = vmatprep.subr.bf16.mxu0 %v2956_v2  ;;  %2845 = vmatprep.subr.bf16.mxu1 %v2956_v2 }
 0x7d3   :  { %2826 = vmatpush3.bf16.msra.mxu0 %v3502_v13  ;;  %2846 = vmatpush3.bf16.msra.mxu1 %v3504_v14 }
 0x7d4   :  { %2827 = vmatprep.subr.bf16.mxu0 %v2956_v2  ;;  %2847 = vmatprep.subr.bf16.mxu1 %v2956_v2  ;;  %v1734_v2 = vunpack.c.l.bf16 %v1732_v10 }
 0x7d7   :  { %2828 = vmatpush3.bf16.msra.mxu0 %v3510_v15  ;;  %2848 = vmatpush3.bf16.msra.mxu1 %v3512_v16  ;;  %v1923_v16 = vld [vmem:[%s3781_s0 + $0x78] sm:$0xff] }
 0x7d8   :  { %v1840_v34 = vrot.slane %v1923_v16, 4  ;;  %v1788_v18 = vunpack.c.l.bf16 %v1923_v16 }
 0x7da   :  { %2830 = vmatmul.mubr.bf16.vlgmr.msra.gmra.mrb[60].mxu0 %v1663_v17  ;;  %2850 = vmatmul.mubr.bf16.vlgmr.msra.gmra.mrb[60].mxu1 %v1663_v17  ;;  %v1842_v20 = vunpack.c.l.bf16 %v1840_v34 }
 0x88d   :  { %v1712_v1 = vpop.f32.mrb[56].mxu0  ;;  %v1769_v3 = vpop.f32.mrb[56].mxu1 }
 0x88e   :  { %v2791_v61 = vpop.f32.mrb[57].mxu0  ;;  %v2811_v4 = vpop.f32.mrb[57].mxu1  ;;  %v1775_v12 = vadd.f32 %v1769_v3, %v1734_v2  ;;  %v1718_v13 = vadd.f32 %v1712_v1, %v1677_v11 }
 0x88f   :  { %v1715_v5 = vpop.f32.mrb[58].mxu0  ;;  %v1772_v6 = vpop.f32.mrb[58].mxu1 }
 0x890   :  { %v2792_v7 = vpop.f32.mrb[59].mxu0  ;;  %v2812_v8 = vpop.f32.mrb[59].mxu1  ;;  %v1776_v14 = vmul.f32 0.5, %v1775_v12  ;;  %v1719_v15 = vmul.f32 0.5, %v1718_v13 }
 0x892   :  { %2935 = vtanh.f32 %v1776_v14 }
 0x893   :  { %2937 = vtanh.f32 %v1719_v15 }
 0x89c   :  { %v2936_v29 = vpop.eup %2935 }
 0x89d   :  { %v2938_v32 = vpop.eup %2937  ;;  %v1778_v33 = vadd.f32 1.0, %v2936_v29 }
 0x89e   :  { %v1721_v38 = vadd.f32 1.0, %v2938_v32 }
 0x89f   :  { %v1779_v39 = vmul.f32 0.5, %v1778_v33 }
 0x8a0   :  { %v1722_v40 = vmul.f32 0.5, %v1721_v38 }
 0x8a1   :  { %v1888_v42 = vmul.f32 %v1779_v39, %v3731_v35 }
 0x8ad   :  { %v1823_v21 = vpop.f32.mrb[60].mxu0  ;;  %v1877_v22 = vpop.f32.mrb[60].mxu1 }
 0x8ae   :  { %v1829_v23 = vadd.f32 %v1823_v21, %v1788_v18  ;;  %v2831_v24 = vpop.f32.mrb[61].mxu0  ;;  %v2851_v25 = vpop.f32.mrb[61].mxu1  ;;  %v1883_v26 = vadd.f32 %v1877_v22, %v1842_v20 }
 0x8af   :  { %v1826_v27 = vpop.f32.mrb[62].mxu0  ;;  %v1880_v28 = vpop.f32.mrb[62].mxu1 }
 0x8b0   :  { %2939 = vtanh.f32 %v1829_v23  ;;  %v2832_v30 = vpop.f32.mrb[63].mxu0  ;;  %v2852_v31 = vpop.f32.mrb[63].mxu1  ;;  %v1884_v46 = vmul.f32 0.5, %v1883_v26 }
 0x8b2   :  { %2941 = vtanh.f32 %v1884_v46 }
 0x8ba   :  { %v2940_v41 = vpop.eup %2939 }
 0x8bb   :  { %v1889_v44 = vmul.f32 %v2940_v41, %v1722_v40 }
 0x8bc   :  { %v2942_v47 = vpop.eup %2941 }
 0x8bd   :  { %v1890_v45 = vadd.f32 %v1889_v44, %v1888_v42  ;;  %v1886_v48 = vadd.f32 1.0, %v2942_v47 }
 0x8bf   :  { %2943 = vtanh.f32 %v1890_v45  ;;  %v1887_v49 = vmul.f32 0.5, %v1886_v48 }
 0x8c9   :  { %v2944_v50 = vpop.eup %2943 }
 0x8ca   :  { %v1892_v51 = vmul.f32 %v2944_v50, %v1887_v49 }
 0x8cc   :  { %v1893_v52 = vpack.c.bf16 %v1892_v51, %v1892_v51 }
 0x8ce   :  { %1924 = vst [vmem:[%s3783_s2 + $0x1c] sm:$0xf] %v1893_v52 }

// kernel: lstm_model_forward.5
= control target key start
LH: loop header
LB: loop body
LE: loop exit
PB: predicated region body
PF: predicated region fallthrough
CT: control target
= control target key end

     0   :  { %s4212_s0 = inlined_call_operand.vmem [shape: bf16[8,8,512], index: 0, kind: input, shape index: {}]   ;;  %s4213_s1 = inlined_call_operand.vmem [shape: bf16[128,512], index: 1, kind: input, shape index: {}]   ;;  %s4214_s2 = inlined_call_operand.vmem [shape: bf16[8,8,128], index: 2, kind: output, shape index: {}]  }
   0x1   :  { %v31_v0 = vld [vmem:[%s4213_s1] sm:$0xf]  ;;  %v33_v1 = vld [vmem:[%s4213_s1 + $0x10] sm:$0xf]  ;;  %v35_v2 = vld [vmem:[%s4213_s1 + $0x4] sm:$0xf] }
   0x2   :  { %32 = vst [vmem:[#allocation2] sm:$0xf] %v31_v0  ;;  %34 = vst [vmem:[#allocation2 + $0x4] sm:$0xf] %v33_v1  ;;  %v37_v3 = vld [vmem:[%s4213_s1 + $0x14] sm:$0xf] }
   0x3   :  { %36 = vst [vmem:[#allocation2 + $0x8] sm:$0xf] %v35_v2  ;;  %v39_v4 = vld [vmem:[%s4213_s1 + $0x8] sm:$0xf]  ;;  %v41_v5 = vld [vmem:[%s4213_s1 + $0x18] sm:$0xf] }
   0x4   :  { %38 = vst [vmem:[#allocation2 + $0xc] sm:$0xf] %v37_v3  ;;  %40 = vst [vmem:[#allocation2 + $0x10] sm:$0xf] %v39_v4  ;;  %v43_v6 = vld [vmem:[%s4213_s1 + $0xc] sm:$0xf] }
   0x5   :  { %42 = vst [vmem:[#allocation2 + $0x14] sm:$0xf] %v41_v5  ;;  %v45_v7 = vld [vmem:[%s4213_s1 + $0x1c] sm:$0xff]   ;;  %v49_v8 = vld [vmem:[%s4213_s1 + $0x30] sm:$0xf] }
   0x6   :  { %44 = vst [vmem:[#allocation2 + $0x18] sm:$0xf] %v43_v6  ;;  %46 = vst [vmem:[#allocation2 + $0x1c] sm:$0xff] %v45_v7   ;;  %v51_v9 = vld [vmem:[%s4213_s1 + $0x24] sm:$0xf]  ;;  %v61_v14 = vld [vmem:[%s4213_s1 + $0x3c] sm:$0xff]  }
   0x7   :  { %50 = vst [vmem:[#allocation2 + $0x24] sm:$0xf] %v49_v8  ;;  %v53_v10 = vld [vmem:[%s4213_s1 + $0x34] sm:$0xf]  ;;  %v55_v11 = vld [vmem:[%s4213_s1 + $0x28] sm:$0xf] }
   0x8   :  { %52 = vst [vmem:[#allocation2 + $0x28] sm:$0xf] %v51_v9  ;;  %54 = vst [vmem:[#allocation2 + $0x2c] sm:$0xf] %v53_v10  ;;  %v57_v12 = vld [vmem:[%s4213_s1 + $0x38] sm:$0xf] }
   0x9   :  { %56 = vst [vmem:[#allocation2 + $0x30] sm:$0xf] %v55_v11  ;;  %v59_v13 = vld [vmem:[%s4213_s1 + $0x2c] sm:$0xf]  ;;  %58 = vst [vmem:[#allocation2 + $0x34] sm:$0xf] %v57_v12 }
   0xa   :  { %60 = vst [vmem:[#allocation2 + $0x38] sm:$0xf] %v59_v13  ;;  %62 = vst [vmem:[#allocation2 + $0x3c] sm:$0xff] %v61_v14   ;;  %v65_v15 = vld [vmem:[%s4213_s1 + $0x50] sm:$0xf]  ;;  %v77_v21 = vld [vmem:[%s4213_s1 + $0x5c] sm:$0xff]  }
   0xb   :  { %v67_v16 = vld [vmem:[%s4213_s1 + $0x44] sm:$0xf]  ;;  %v69_v17 = vld [vmem:[%s4213_s1 + $0x54] sm:$0xf]  ;;  %66 = vst [vmem:[#allocation2 + $0x44] sm:$0xf] %v65_v15 }
   0xc   :  { %68 = vst [vmem:[#allocation2 + $0x48] sm:$0xf] %v67_v16  ;;  %70 = vst [vmem:[#allocation2 + $0x4c] sm:$0xf] %v69_v17  ;;  %v71_v18 = vld [vmem:[%s4213_s1 + $0x48] sm:$0xf] }
   0xd   :  { %v73_v19 = vld [vmem:[%s4213_s1 + $0x58] sm:$0xf]  ;;  %v75_v20 = vld [vmem:[%s4213_s1 + $0x4c] sm:$0xf]  ;;  %72 = vst [vmem:[#allocation2 + $0x50] sm:$0xf] %v71_v18 }
   0xe   :  { %74 = vst [vmem:[#allocation2 + $0x54] sm:$0xf] %v73_v19  ;;  %76 = vst [vmem:[#allocation2 + $0x58] sm:$0xf] %v75_v20  ;;  %v81_v22 = vld [vmem:[%s4213_s1 + $0x70] sm:$0xf] }
   0xf   :  { %v83_v23 = vld [vmem:[%s4213_s1 + $0x64] sm:$0xf]  ;;  %78 = vst [vmem:[#allocation2 + $0x5c] sm:$0xff] %v77_v21   ;;  %82 = vst [vmem:[#allocation2 + $0x64] sm:$0xf] %v81_v22  ;;  %v93_v28 = vld [vmem:[%s4213_s1 + $0x7c] sm:$0xff]  }
  0x10   :  { %84 = vst [vmem:[#allocation2 + $0x68] sm:$0xf] %v83_v23  ;;  %v85_v24 = vld [vmem:[%s4213_s1 + $0x74] sm:$0xf]  ;;  %v87_v25 = vld [vmem:[%s4213_s1 + $0x68] sm:$0xf] }
  0x11   :  { %v89_v26 = vld [vmem:[%s4213_s1 + $0x78] sm:$0xf]  ;;  %86 = vst [vmem:[#allocation2 + $0x6c] sm:$0xf] %v85_v24  ;;  %88 = vst [vmem:[#allocation2 + $0x70] sm:$0xf] %v87_v25 }
  0x12   :  { %90 = vst [vmem:[#allocation2 + $0x74] sm:$0xf] %v89_v26  ;;  %v91_v27 = vld [vmem:[%s4213_s1 + $0x6c] sm:$0xf]  ;;  %v97_v29 = vld [vmem:[%s4213_s1 + $0x90] sm:$0xf] }
  0x13   :  { %92 = vst [vmem:[#allocation2 + $0x78] sm:$0xf] %v91_v27  ;;  %94 = vst [vmem:[#allocation2 + $0x7c] sm:$0xff] %v93_v28   ;;  %v99_v30 = vld [vmem:[%s4213_s1 + $0x84] sm:$0xf]  ;;  %v109_v35 = vld [vmem:[%s4213_s1 + $0x9c] sm:$0xff]  }
  0x14   :  { %98 = vst [vmem:[#allocation2 + $0x84] sm:$0xf] %v97_v29  ;;  %v101_v31 = vld [vmem:[%s4213_s1 + $0x94] sm:$0xf]  ;;  %v103_v32 = vld [vmem:[%s4213_s1 + $0x88] sm:$0xf] }
  0x15   :  { %100 = vst [vmem:[#allocation2 + $0x88] sm:$0xf] %v99_v30  ;;  %102 = vst [vmem:[#allocation2 + $0x8c] sm:$0xf] %v101_v31  ;;  %v105_v33 = vld [vmem:[%s4213_s1 + $0x98] sm:$0xf] }
  0x16   :  { %104 = vst [vmem:[#allocation2 + $0x90] sm:$0xf] %v103_v32  ;;  %v107_v34 = vld [vmem:[%s4213_s1 + $0x8c] sm:$0xf]  ;;  %106 = vst [vmem:[#allocation2 + $0x94] sm:$0xf] %v105_v33 }
  0x17   :  { %108 = vst [vmem:[#allocation2 + $0x98] sm:$0xf] %v107_v34  ;;  %110 = vst [vmem:[#allocation2 + $0x9c] sm:$0xff] %v109_v35   ;;  %v113_v36 = vld [vmem:[%s4213_s1 + $0xb0] sm:$0xf]  ;;  %v125_v42 = vld [vmem:[%s4213_s1 + $0xbc] sm:$0xff]  }
  0x18   :  { %v115_v37 = vld [vmem:[%s4213_s1 + $0xa4] sm:$0xf]  ;;  %v117_v38 = vld [vmem:[%s4213_s1 + $0xb4] sm:$0xf]  ;;  %114 = vst [vmem:[#allocation2 + $0xa4] sm:$0xf] %v113_v36 }
  0x19   :  { %116 = vst [vmem:[#allocation2 + $0xa8] sm:$0xf] %v115_v37  ;;  %118 = vst [vmem:[#allocation2 + $0xac] sm:$0xf] %v117_v38  ;;  %v119_v39 = vld [vmem:[%s4213_s1 + $0xa8] sm:$0xf] }
  0x1a   :  { %v121_v40 = vld [vmem:[%s4213_s1 + $0xb8] sm:$0xf]  ;;  %v123_v41 = vld [vmem:[%s4213_s1 + $0xac] sm:$0xf]  ;;  %120 = vst [vmem:[#allocation2 + $0xb0] sm:$0xf] %v119_v39 }
  0x1b   :  { %122 = vst [vmem:[#allocation2 + $0xb4] sm:$0xf] %v121_v40  ;;  %124 = vst [vmem:[#allocation2 + $0xb8] sm:$0xf] %v123_v41  ;;  %v129_v43 = vld [vmem:[%s4213_s1 + $0xd0] sm:$0xf] }
  0x1c   :  { %v131_v44 = vld [vmem:[%s4213_s1 + $0xc4] sm:$0xf]  ;;  %126 = vst [vmem:[#allocation2 + $0xbc] sm:$0xff] %v125_v42   ;;  %130 = vst [vmem:[#allocation2 + $0xc4] sm:$0xf] %v129_v43  ;;  %v141_v49 = vld [vmem:[%s4213_s1 + $0xdc] sm:$0xff]  }
  0x1d   :  { %132 = vst [vmem:[#allocation2 + $0xc8] sm:$0xf] %v131_v44  ;;  %v133_v45 = vld [vmem:[%s4213_s1 + $0xd4] sm:$0xf]  ;;  %v135_v46 = vld [vmem:[%s4213_s1 + $0xc8] sm:$0xf] }
  0x1e   :  { %v137_v47 = vld [vmem:[%s4213_s1 + $0xd8] sm:$0xf]  ;;  %134 = vst [vmem:[#allocation2 + $0xcc] sm:$0xf] %v133_v45  ;;  %136 = vst [vmem:[#allocation2 + $0xd0] sm:$0xf] %v135_v46 }
  0x1f   :  { %138 = vst [vmem:[#allocation2 + $0xd4] sm:$0xf] %v137_v47  ;;  %v139_v48 = vld [vmem:[%s4213_s1 + $0xcc] sm:$0xf]  ;;  %v145_v50 = vld [vmem:[%s4213_s1 + $0xf0] sm:$0xf] }
  0x20   :  { %140 = vst [vmem:[#allocation2 + $0xd8] sm:$0xf] %v139_v48  ;;  %142 = vst [vmem:[#allocation2 + $0xdc] sm:$0xff] %v141_v49   ;;  %v147_v51 = vld [vmem:[%s4213_s1 + $0xe4] sm:$0xf] }
  0x21   :  { %146 = vst [vmem:[#allocation2 + $0xe4] sm:$0xf] %v145_v50  ;;  %v149_v52 = vld [vmem:[%s4213_s1 + $0xf4] sm:$0xf]  ;;  %v151_v53 = vld [vmem:[%s4213_s1 + $0xe8] sm:$0xf] }
  0x22   :  { %148 = vst [vmem:[#allocation2 + $0xe8] sm:$0xf] %v147_v51  ;;  %150 = vst [vmem:[#allocation2 + $0xec] sm:$0xf] %v149_v52  ;;  %v153_v54 = vld [vmem:[%s4213_s1 + $0xf8] sm:$0xf] }
  0x23   :  { %152 = vst [vmem:[#allocation2 + $0xf0] sm:$0xf] %v151_v53  ;;  %v155_v55 = vld [vmem:[%s4213_s1 + $0xec] sm:$0xf]  ;;  %v157_v56 = vld [vmem:[%s4213_s1 + $0xfc] sm:$0xf] }
  0x24   :  { %154 = vst [vmem:[#allocation2 + $0xf4] sm:$0xf] %v153_v54  ;;  %156 = vst [vmem:[#allocation2 + $0xf8] sm:$0xf] %v155_v55 }
  0x25   :  { %158 = vst [vmem:[#allocation2 + $0xfc] sm:$0xf] %v157_v56 }
  0x26   :  { %317 = vsyncadd [#allocation5], 4096 }
  0x27   :  { %3217 = dma.done.wait [#allocation5], 4096 }
  0x28   :  { %3218 = vsyncadd [#allocation5], 4294963200  ;;  %v3408_v57 = vld [vmem:[#allocation2] sm:$0xff]  ;;  %v3410_v58 = vld [vmem:[#allocation2 + $0x8] sm:$0xff]  ;;  %v3219_v59 = vmov 0.0   ;;  %vm3220_vm0 = vmmov 0  }
  0x29   :  { %2494 = vmatprep.subr.bf16.mxu0 %v3219_v59  ;;  %2514 = vmatprep.subr.bf16.mxu1 %v3219_v59  ;;  %v3417_v60 = vld [vmem:[#allocation2 + $0x20] sm:$0xff]  ;;  %v3420_v61 = vld [vmem:[#allocation2 + $0x28] sm:$0xff]  ;;  %v3477_v10 = vld [vmem:[#allocation2 + $0x10] sm:$0xff]  ;;  %v3221_v12 = vmov 0.0|0.0  }
  0x2a   :  { %2495 = vmatpush3.bf16.msra.mxu0 %v3408_v57  ;;  %2515 = vmatpush3.bf16.msra.mxu1 %v3410_v58  ;;  %v3429_v62 = vld [vmem:[#allocation2 + $0x40] sm:$0xff]  ;;  %v3432_v63 = vld [vmem:[#allocation2 + $0x48] sm:$0xff]  ;;  %v3480_v11 = vld [vmem:[#allocation2 + $0x18] sm:$0xff] }
  0x2b   :  { %2496 = vmatprep.subr.bf16.mxu0 %v3219_v59  ;;  %2516 = vmatprep.subr.bf16.mxu1 %v3219_v59  ;;  %v3437_v0 = vld [vmem:[#allocation2 + $0x60] sm:$0xff]  ;;  %v3440_v1 = vld [vmem:[#allocation2 + $0x68] sm:$0xff]  ;;  %v3485_v13 = vld [vmem:[#allocation2 + $0x30] sm:$0xff] }
  0x2c   :  { %2510 = vmatprep.mubr.msk.bf16.mxu0 %vm3220_vm0, %v3219_v59  ;;  %2530 = vmatprep.mubr.msk.bf16.mxu1 %vm3220_vm0, %v3219_v59  ;;  %v3445_v2 = vld [vmem:[#allocation2 + $0x80] sm:$0xff]  ;;  %v3448_v3 = vld [vmem:[#allocation2 + $0x88] sm:$0xff]  ;;  %v3488_v14 = vld [vmem:[#allocation2 + $0x38] sm:$0xff] }
  0x2d   :  { %v3453_v4 = vld [vmem:[#allocation2 + $0xa0] sm:$0xff]  ;;  %v3456_v5 = vld [vmem:[#allocation2 + $0xa8] sm:$0xff]  ;;  %v3497_v15 = vld [vmem:[#allocation2 + $0x50] sm:$0xff] }
  0x2e   :  { %2497 = vmatpush3.bf16.msra.mxu0 %v3417_v60  ;;  %2517 = vmatpush3.bf16.msra.mxu1 %v3420_v61  ;;  %v3461_v6 = vld [vmem:[#allocation2 + $0xc0] sm:$0xff]  ;;  %v3464_v7 = vld [vmem:[#allocation2 + $0xc8] sm:$0xff]  ;;  %v3500_v16 = vld [vmem:[#allocation2 + $0x58] sm:$0xff] }
  0x2f   :  { %2498 = vmatprep.subr.bf16.mxu0 %v3219_v59  ;;  %2518 = vmatprep.subr.bf16.mxu1 %v3219_v59  ;;  %v3469_v8 = vld [vmem:[#allocation2 + $0xe0] sm:$0xff]  ;;  %v3472_v9 = vld [vmem:[#allocation2 + $0xe8] sm:$0xff]  ;;  %v3505_v17 = vld [vmem:[#allocation2 + $0x70] sm:$0xff] }
  0x30   :  { %v3508_v18 = vld [vmem:[#allocation2 + $0x78] sm:$0xff]  ;;  %v3513_v19 = vld [vmem:[#allocation2 + $0x90] sm:$0xff]  ;;  %v327_v35 = vld [vmem:[%s4212_s0] sm:$0xff] }
  0x31   :  { %v3516_v20 = vld [vmem:[#allocation2 + $0x98] sm:$0xff]  ;;  %v3521_v21 = vld [vmem:[#allocation2 + $0xb0] sm:$0xff]  ;;  %v392_v36 = vrot.slane %v327_v35, 4  ;;  %v337_v38 = vunpack.c.l.bf16 %v327_v35  ;;  %v328_v43 = vld [vmem:[%s4212_s0 + $0x8] sm:$0xff] }
  0x32   :  { %2499 = vmatpush3.bf16.msra.mxu0 %v3429_v62  ;;  %2519 = vmatpush3.bf16.msra.mxu1 %v3432_v63  ;;  %v3524_v22 = vld [vmem:[#allocation2 + $0xb8] sm:$0xff]  ;;  %v3529_v23 = vld [vmem:[#allocation2 + $0xd0] sm:$0xff]  ;;  %v500_v44 = vrot.slane %v328_v43, 4  ;;  %v448_v45 = vunpack.c.l.bf16 %v328_v43 }
  0x33   :  { %2500 = vmatprep.subr.bf16.mxu0 %v3219_v59  ;;  %2520 = vmatprep.subr.bf16.mxu1 %v3219_v59  ;;  %v3532_v24 = vld [vmem:[#allocation2 + $0xd8] sm:$0xff]  ;;  %v3537_v25 = vld [vmem:[#allocation2 + $0xf0] sm:$0xff]  ;;  %v394_v37 = vunpack.c.l.bf16 %v392_v36 }
  0x34   :  { %v3540_v26 = vld [vmem:[#allocation2 + $0xf8] sm:$0xff]  ;;  %v502_v46 = vunpack.c.l.bf16 %v500_v44 }
  0x36   :  { %2501 = vmatpush3.bf16.msra.mxu0 %v3437_v0  ;;  %2521 = vmatpush3.bf16.msra.mxu1 %v3440_v1 }
  0x37   :  { %2502 = vmatprep.subr.bf16.mxu0 %v3219_v59  ;;  %2522 = vmatprep.subr.bf16.mxu1 %v3219_v59 }
  0x3a   :  { %2503 = vmatpush3.bf16.msra.mxu0 %v3445_v2  ;;  %2523 = vmatpush3.bf16.msra.mxu1 %v3448_v3 }
  0x3b   :  { %2504 = vmatprep.subr.bf16.mxu0 %v3219_v59  ;;  %2524 = vmatprep.subr.bf16.mxu1 %v3219_v59 }
  0x3e   :  { %2505 = vmatpush3.bf16.msra.mxu0 %v3453_v4  ;;  %2525 = vmatpush3.bf16.msra.mxu1 %v3456_v5 }
  0x3f   :  { %2506 = vmatprep.subr.bf16.mxu0 %v3219_v59  ;;  %2526 = vmatprep.subr.bf16.mxu1 %v3219_v59 }
  0x42   :  { %2507 = vmatpush3.bf16.msra.mxu0 %v3461_v6  ;;  %2527 = vmatpush3.bf16.msra.mxu1 %v3464_v7 }
  0x43   :  { %2508 = vmatprep.subr.bf16.mxu0 %v3219_v59  ;;  %2528 = vmatprep.subr.bf16.mxu1 %v3219_v59 }
  0x46   :  { %2509 = vmatpush3.bf16.msra.mxu0 %v3469_v8  ;;  %2529 = vmatpush3.bf16.msra.mxu1 %v3472_v9 }
  0x47   :  { %2534 = vmatprep.subr.bf16.mxu0 %v3219_v59  ;;  %2554 = vmatprep.subr.bf16.mxu1 %v3219_v59 }
  0x49   :  { %2511 = vmatmul.mubr.bf16.vlgmr.msra.gmra.mrb[0].mxu0 %v3221_v12  ;;  %2531 = vmatmul.mubr.bf16.vlgmr.msra.gmra.mrb[0].mxu1 %v3221_v12 }
  0x4a   :  { %2535 = vmatpush3.bf16.msra.mxu0 %v3477_v10  ;;  %2555 = vmatpush3.bf16.msra.mxu1 %v3480_v11 }
  0x4b   :  { %2536 = vmatprep.subr.bf16.mxu0 %v3219_v59  ;;  %2556 = vmatprep.subr.bf16.mxu1 %v3219_v59 }
  0x4c   :  { %2550 = vmatprep.mubr.msk.bf16.mxu0 %vm3220_vm0, %v3219_v59  ;;  %2570 = vmatprep.mubr.msk.bf16.mxu1 %vm3220_vm0, %v3219_v59 }
  0x4e   :  { %2537 = vmatpush3.bf16.msra.mxu0 %v3485_v13  ;;  %2557 = vmatpush3.bf16.msra.mxu1 %v3488_v14 }
  0x4f   :  { %2538 = vmatprep.subr.bf16.mxu0 %v3219_v59  ;;  %2558 = vmatprep.subr.bf16.mxu1 %v3219_v59 }
  0x52   :  { %2539 = vmatpush3.bf16.msra.mxu0 %v3497_v15  ;;  %2559 = vmatpush3.bf16.msra.mxu1 %v3500_v16 }
  0x53   :  { %2540 = vmatprep.subr.bf16.mxu0 %v3219_v59  ;;  %2560 = vmatprep.subr.bf16.mxu1 %v3219_v59 }
  0x56   :  { %2541 = vmatpush3.bf16.msra.mxu0 %v3505_v17  ;;  %2561 = vmatpush3.bf16.msra.mxu1 %v3508_v18 }
  0x57   :  { %2542 = vmatprep.subr.bf16.mxu0 %v3219_v59  ;;  %2562 = vmatprep.subr.bf16.mxu1 %v3219_v59 }
  0x5a   :  { %2543 = vmatpush3.bf16.msra.mxu0 %v3513_v19  ;;  %2563 = vmatpush3.bf16.msra.mxu1 %v3516_v20 }
  0x5b   :  { %2544 = vmatprep.subr.bf16.mxu0 %v3219_v59  ;;  %2564 = vmatprep.subr.bf16.mxu1 %v3219_v59 }
  0x5e   :  { %2545 = vmatpush3.bf16.msra.mxu0 %v3521_v21  ;;  %2565 = vmatpush3.bf16.msra.mxu1 %v3524_v22 }
  0x5f   :  { %2546 = vmatprep.subr.bf16.mxu0 %v3219_v59  ;;  %2566 = vmatprep.subr.bf16.mxu1 %v3219_v59 }
  0x62   :  { %2547 = vmatpush3.bf16.msra.mxu0 %v3529_v23  ;;  %2567 = vmatpush3.bf16.msra.mxu1 %v3532_v24 }
  0x63   :  { %2548 = vmatprep.subr.bf16.mxu0 %v3219_v59  ;;  %2568 = vmatprep.subr.bf16.mxu1 %v3219_v59 }
  0x66   :  { %2549 = vmatpush3.bf16.msra.mxu0 %v3537_v25  ;;  %2569 = vmatpush3.bf16.msra.mxu1 %v3540_v26 }
  0x67   :  { %2574 = vmatprep.subr.bf16.mxu0 %v3219_v59  ;;  %2594 = vmatprep.subr.bf16.mxu1 %v3219_v59 }
  0x69   :  { %2551 = vmatmul.mubr.bf16.vlgmr.msra.gmra.mrb[4].mxu0 %v3221_v12  ;;  %2571 = vmatmul.mubr.bf16.vlgmr.msra.gmra.mrb[4].mxu1 %v3221_v12 }
  0x6a   :  { %2575 = vmatpush3.bf16.msra.mxu0 %v3408_v57  ;;  %2595 = vmatpush3.bf16.msra.mxu1 %v3410_v58 }
  0x6b   :  { %2576 = vmatprep.subr.bf16.mxu0 %v3219_v59  ;;  %2596 = vmatprep.subr.bf16.mxu1 %v3219_v59 }
  0x6c   :  { %2590 = vmatprep.mubr.msk.bf16.mxu0 %vm3220_vm0, %v3219_v59  ;;  %2610 = vmatprep.mubr.msk.bf16.mxu1 %vm3220_vm0, %v3219_v59 }
  0x6e   :  { %2577 = vmatpush3.bf16.msra.mxu0 %v3417_v60  ;;  %2597 = vmatpush3.bf16.msra.mxu1 %v3420_v61 }
  0x6f   :  { %2578 = vmatprep.subr.bf16.mxu0 %v3219_v59  ;;  %2598 = vmatprep.subr.bf16.mxu1 %v3219_v59 }
  0x72   :  { %2579 = vmatpush3.bf16.msra.mxu0 %v3429_v62  ;;  %2599 = vmatpush3.bf16.msra.mxu1 %v3432_v63 }
  0x73   :  { %2580 = vmatprep.subr.bf16.mxu0 %v3219_v59  ;;  %2600 = vmatprep.subr.bf16.mxu1 %v3219_v59 }
  0x76   :  { %2581 = vmatpush3.bf16.msra.mxu0 %v3437_v0  ;;  %2601 = vmatpush3.bf16.msra.mxu1 %v3440_v1 }
  0x77   :  { %2582 = vmatprep.subr.bf16.mxu0 %v3219_v59  ;;  %2602 = vmatprep.subr.bf16.mxu1 %v3219_v59 }
  0x7a   :  { %2583 = vmatpush3.bf16.msra.mxu0 %v3445_v2  ;;  %2603 = vmatpush3.bf16.msra.mxu1 %v3448_v3 }
  0x7b   :  { %2584 = vmatprep.subr.bf16.mxu0 %v3219_v59  ;;  %2604 = vmatprep.subr.bf16.mxu1 %v3219_v59 }
  0x7e   :  { %2585 = vmatpush3.bf16.msra.mxu0 %v3453_v4  ;;  %2605 = vmatpush3.bf16.msra.mxu1 %v3456_v5 }
  0x7f   :  { %2586 = vmatprep.subr.bf16.mxu0 %v3219_v59  ;;  %2606 = vmatprep.subr.bf16.mxu1 %v3219_v59 }
  0x82   :  { %2587 = vmatpush3.bf16.msra.mxu0 %v3461_v6  ;;  %2607 = vmatpush3.bf16.msra.mxu1 %v3464_v7 }
  0x83   :  { %2588 = vmatprep.subr.bf16.mxu0 %v3219_v59  ;;  %2608 = vmatprep.subr.bf16.mxu1 %v3219_v59 }
  0x86   :  { %2589 = vmatpush3.bf16.msra.mxu0 %v3469_v8  ;;  %2609 = vmatpush3.bf16.msra.mxu1 %v3472_v9 }
  0x87   :  { %2614 = vmatprep.subr.bf16.mxu0 %v3219_v59  ;;  %2634 = vmatprep.subr.bf16.mxu1 %v3219_v59 }
 0x11c   :  { %v372_v27 = vpop.f32.mrb[0].mxu0  ;;  %v429_v28 = vpop.f32.mrb[0].mxu1 }
 0x11d   :  { %v2512_v29 = vpop.f32.mrb[1].mxu0  ;;  %v2532_v30 = vpop.f32.mrb[1].mxu1  ;;  %v435_v39 = vadd.f32 %v429_v28, %v394_v37  ;;  %v378_v40 = vadd.f32 %v372_v27, %v337_v38 }
 0x11e   :  { %v375_v31 = vpop.f32.mrb[2].mxu0  ;;  %v432_v32 = vpop.f32.mrb[2].mxu1 }
 0x11f   :  { %v2513_v33 = vpop.f32.mrb[3].mxu0  ;;  %v2533_v34 = vpop.f32.mrb[3].mxu1  ;;  %v436_v41 = vmul.f32 0.5, %v435_v39  ;;  %v379_v42 = vmul.f32 0.5, %v378_v40 }
 0x121   :  { %3137 = vtanh.f32 %v436_v41 }
 0x122   :  { %3139 = vtanh.f32 %v379_v42 }
 0x12b   :  { %v3138_v55 = vpop.eup %3137 }
 0x12c   :  { %v3140_v28 = vpop.eup %3139  ;;  %v438_v29 = vadd.f32 1.0, %v3138_v55 }
 0x12d   :  { %v381_v30 = vadd.f32 1.0, %v3140_v28  ;;  %v2186_v28 = vld [vmem:[%s4212_s0 + $0x18] sm:$0xff] }
 0x12e   :  { %v439_v31 = vmul.f32 0.5, %v438_v29  ;;  %v729_v29 = vrot.slane %v2186_v28, 4 }
 0x12f   :  { %v382_v32 = vmul.f32 0.5, %v381_v30  ;;  %v677_v30 = vunpack.c.l.bf16 %v2186_v28 }
 0x130   :  { %v548_v34 = vmul.f32 0.0, %v439_v31  ;;  %v731_v31 = vunpack.c.l.bf16 %v729_v29 }
 0x13c   :  { %v483_v47 = vpop.f32.mrb[4].mxu0  ;;  %v537_v48 = vpop.f32.mrb[4].mxu1 }
 0x13d   :  { %v489_v49 = vadd.f32 %v483_v47, %v448_v45  ;;  %v2552_v50 = vpop.f32.mrb[5].mxu0  ;;  %v543_v51 = vadd.f32 %v537_v48, %v502_v46  ;;  %v2572_v52 = vpop.f32.mrb[5].mxu1 }
 0x13e   :  { %v486_v53 = vpop.f32.mrb[6].mxu0  ;;  %v540_v54 = vpop.f32.mrb[6].mxu1 }
 0x13f   :  { %3141 = vtanh.f32 %v489_v49  ;;  %v2553_v56 = vpop.f32.mrb[7].mxu0  ;;  %v2573_v12 = vpop.f32.mrb[7].mxu1  ;;  %v544_v27 = vmul.f32 0.5, %v543_v51  ;;  %v2185_v51 = vld [vmem:[%s4212_s0 + $0x10] sm:$0xff] }
 0x140   :  { %v621_v52 = vrot.slane %v2185_v51, 4  ;;  %v566_v54 = vunpack.c.l.bf16 %v2185_v51 }
 0x141   :  { %3143 = vtanh.f32 %v544_v27 }
 0x142   :  { %v623_v53 = vunpack.c.l.bf16 %v621_v52 }
 0x149   :  { %v3142_v33 = vpop.eup %3141 }
 0x14a   :  { %v549_v35 = vmul.f32 %v3142_v33, %v382_v32 }
 0x14b   :  { %v3144_v37 = vpop.eup %3143 }
 0x14c   :  { %v3588_v36 = vadd.f32 %v549_v35, %v548_v34  ;;  %v546_v38 = vadd.f32 1.0, %v3144_v37 }
 0x14e   :  { %3145 = vtanh.f32 %v3588_v36  ;;  %v547_v39 = vmul.f32 0.5, %v546_v38 }
 0x158   :  { %v3146_v40 = vpop.eup %3145 }
 0x159   :  { %v552_v41 = vmul.f32 %v3146_v40, %v547_v39 }
 0x15b   :  { %v553_v42 = vpack.c.bf16 %v552_v41, %v552_v41 }
 0x15d   :  { %554 = vst [vmem:[%s4214_s2] sm:$0xf] %v553_v42  ;;  %2591 = vmatmul.mubr.bf16.vlgmr.msra.gmra.mrb[8].mxu0 %v553_v42  ;;  %2611 = vmatmul.mubr.bf16.vlgmr.msra.gmra.mrb[8].mxu1 %v553_v42 }
 0x15e   :  { %2615 = vmatpush3.bf16.msra.mxu0 %v3477_v10  ;;  %2635 = vmatpush3.bf16.msra.mxu1 %v3480_v11 }
 0x15f   :  { %2616 = vmatprep.subr.bf16.mxu0 %v3219_v59  ;;  %2636 = vmatprep.subr.bf16.mxu1 %v3219_v59 }
 0x160   :  { %2630 = vmatprep.mubr.msk.bf16.mxu0 %vm3220_vm0, %v3219_v59  ;;  %2650 = vmatprep.mubr.msk.bf16.mxu1 %vm3220_vm0, %v3219_v59 }
 0x162   :  { %2617 = vmatpush3.bf16.msra.mxu0 %v3485_v13  ;;  %2637 = vmatpush3.bf16.msra.mxu1 %v3488_v14 }
 0x163   :  { %2618 = vmatprep.subr.bf16.mxu0 %v3219_v59  ;;  %2638 = vmatprep.subr.bf16.mxu1 %v3219_v59 }
 0x166   :  { %2619 = vmatpush3.bf16.msra.mxu0 %v3497_v15  ;;  %2639 = vmatpush3.bf16.msra.mxu1 %v3500_v16 }
 0x167   :  { %2620 = vmatprep.subr.bf16.mxu0 %v3219_v59  ;;  %2640 = vmatprep.subr.bf16.mxu1 %v3219_v59 }
 0x16a   :  { %2621 = vmatpush3.bf16.msra.mxu0 %v3505_v17  ;;  %2641 = vmatpush3.bf16.msra.mxu1 %v3508_v18 }
 0x16b   :  { %2622 = vmatprep.subr.bf16.mxu0 %v3219_v59  ;;  %2642 = vmatprep.subr.bf16.mxu1 %v3219_v59 }
 0x16e   :  { %2623 = vmatpush3.bf16.msra.mxu0 %v3513_v19  ;;  %2643 = vmatpush3.bf16.msra.mxu1 %v3516_v20 }
 0x16f   :  { %2624 = vmatprep.subr.bf16.mxu0 %v3219_v59  ;;  %2644 = vmatprep.subr.bf16.mxu1 %v3219_v59 }
 0x172   :  { %2625 = vmatpush3.bf16.msra.mxu0 %v3521_v21  ;;  %2645 = vmatpush3.bf16.msra.mxu1 %v3524_v22 }
 0x173   :  { %2626 = vmatprep.subr.bf16.mxu0 %v3219_v59  ;;  %2646 = vmatprep.subr.bf16.mxu1 %v3219_v59 }
 0x176   :  { %2627 = vmatpush3.bf16.msra.mxu0 %v3529_v23  ;;  %2647 = vmatpush3.bf16.msra.mxu1 %v3532_v24 }
 0x177   :  { %2628 = vmatprep.subr.bf16.mxu0 %v3219_v59  ;;  %2648 = vmatprep.subr.bf16.mxu1 %v3219_v59 }
 0x17a   :  { %2629 = vmatpush3.bf16.msra.mxu0 %v3537_v25  ;;  %2649 = vmatpush3.bf16.msra.mxu1 %v3540_v26 }
 0x17b   :  { %2654 = vmatprep.subr.bf16.mxu0 %v3219_v59  ;;  %2674 = vmatprep.subr.bf16.mxu1 %v3219_v59 }
 0x17d   :  { %2631 = vmatmul.mubr.bf16.vlgmr.msra.gmra.mrb[12].mxu0 %v553_v42  ;;  %2651 = vmatmul.mubr.bf16.vlgmr.msra.gmra.mrb[12].mxu1 %v553_v42 }
 0x17e   :  { %2655 = vmatpush3.bf16.msra.mxu0 %v3408_v57  ;;  %2675 = vmatpush3.bf16.msra.mxu1 %v3410_v58 }
 0x17f   :  { %2656 = vmatprep.subr.bf16.mxu0 %v3219_v59  ;;  %2676 = vmatprep.subr.bf16.mxu1 %v3219_v59 }
 0x180   :  { %2670 = vmatprep.mubr.msk.bf16.mxu0 %vm3220_vm0, %v3219_v59  ;;  %2690 = vmatprep.mubr.msk.bf16.mxu1 %vm3220_vm0, %v3219_v59 }
 0x182   :  { %2657 = vmatpush3.bf16.msra.mxu0 %v3417_v60  ;;  %2677 = vmatpush3.bf16.msra.mxu1 %v3420_v61 }
 0x183   :  { %2658 = vmatprep.subr.bf16.mxu0 %v3219_v59  ;;  %2678 = vmatprep.subr.bf16.mxu1 %v3219_v59 }
 0x186   :  { %2659 = vmatpush3.bf16.msra.mxu0 %v3429_v62  ;;  %2679 = vmatpush3.bf16.msra.mxu1 %v3432_v63 }
 0x187   :  { %2660 = vmatprep.subr.bf16.mxu0 %v3219_v59  ;;  %2680 = vmatprep.subr.bf16.mxu1 %v3219_v59 }
 0x18a   :  { %2661 = vmatpush3.bf16.msra.mxu0 %v3437_v0  ;;  %2681 = vmatpush3.bf16.msra.mxu1 %v3440_v1 }
 0x18b   :  { %2662 = vmatprep.subr.bf16.mxu0 %v3219_v59  ;;  %2682 = vmatprep.subr.bf16.mxu1 %v3219_v59 }
 0x18e   :  { %2663 = vmatpush3.bf16.msra.mxu0 %v3445_v2  ;;  %2683 = vmatpush3.bf16.msra.mxu1 %v3448_v3 }
 0x18f   :  { %2664 = vmatprep.subr.bf16.mxu0 %v3219_v59  ;;  %2684 = vmatprep.subr.bf16.mxu1 %v3219_v59 }
 0x192   :  { %2665 = vmatpush3.bf16.msra.mxu0 %v3453_v4  ;;  %2685 = vmatpush3.bf16.msra.mxu1 %v3456_v5 }
 0x193   :  { %2666 = vmatprep.subr.bf16.mxu0 %v3219_v59  ;;  %2686 = vmatprep.subr.bf16.mxu1 %v3219_v59 }
 0x196   :  { %2667 = vmatpush3.bf16.msra.mxu0 %v3461_v6  ;;  %2687 = vmatpush3.bf16.msra.mxu1 %v3464_v7 }
 0x197   :  { %2668 = vmatprep.subr.bf16.mxu0 %v3219_v59  ;;  %2688 = vmatprep.subr.bf16.mxu1 %v3219_v59 }
 0x19a   :  { %2669 = vmatpush3.bf16.msra.mxu0 %v3469_v8  ;;  %2689 = vmatpush3.bf16.msra.mxu1 %v3472_v9 }
 0x19b   :  { %2694 = vmatprep.subr.bf16.mxu0 %v3219_v59  ;;  %2714 = vmatprep.subr.bf16.mxu1 %v3219_v59 }
 0x230   :  { %v601_v43 = vpop.f32.mrb[8].mxu0  ;;  %v658_v44 = vpop.f32.mrb[8].mxu1 }
 0x231   :  { %v2592_v45 = vpop.f32.mrb[9].mxu0  ;;  %v2612_v46 = vpop.f32.mrb[9].mxu1  ;;  %v664_v55 = vadd.f32 %v658_v44, %v623_v53  ;;  %v607_v56 = vadd.f32 %v601_v43, %v566_v54 }
 0x232   :  { %v604_v47 = vpop.f32.mrb[10].mxu0  ;;  %v661_v48 = vpop.f32.mrb[10].mxu1 }
 0x233   :  { %v2593_v49 = vpop.f32.mrb[11].mxu0  ;;  %v2613_v50 = vpop.f32.mrb[11].mxu1  ;;  %v665_v12 = vmul.f32 0.5, %v664_v55  ;;  %v608_v27 = vmul.f32 0.5, %v607_v56 }
 0x235   :  { %3147 = vtanh.f32 %v665_v12 }
 0x236   :  { %3149 = vtanh.f32 %v608_v27 }
 0x23f   :  { %v3148_v41 = vpop.eup %3147 }
 0x240   :  { %v3150_v44 = vpop.eup %3149  ;;  %v667_v45 = vadd.f32 1.0, %v3148_v41 }
 0x241   :  { %v610_v47 = vadd.f32 1.0, %v3150_v44 }
 0x242   :  { %v668_v48 = vmul.f32 0.5, %v667_v45 }
 0x243   :  { %v611_v49 = vmul.f32 0.5, %v610_v47 }
 0x244   :  { %v777_v51 = vmul.f32 %v668_v48, %v3588_v36  ;;  %v2189_v36 = vld [vmem:[%s4212_s0 + $0x28] sm:$0xff] }
 0x245   :  { %v959_v29 = vrot.slane %v2189_v36, 4 }
 0x250   :  { %v712_v32 = vpop.f32.mrb[12].mxu0  ;;  %v766_v33 = vpop.f32.mrb[12].mxu1 }
 0x251   :  { %v718_v34 = vadd.f32 %v712_v32, %v677_v30  ;;  %v2632_v35 = vpop.f32.mrb[13].mxu0  ;;  %v2652_v37 = vpop.f32.mrb[13].mxu1  ;;  %v772_v38 = vadd.f32 %v766_v33, %v731_v31  ;;  %v907_v30 = vunpack.c.l.bf16 %v2189_v36  ;;  %v961_v31 = vunpack.c.l.bf16 %v959_v29  ;;  %v2192_v36 = vld [vmem:[%s4212_s0 + $0x38] sm:$0xff] }
 0x252   :  { %v715_v39 = vpop.f32.mrb[14].mxu0  ;;  %v769_v40 = vpop.f32.mrb[14].mxu1  ;;  %v1189_v29 = vrot.slane %v2192_v36, 4 }
 0x253   :  { %3151 = vtanh.f32 %v718_v34  ;;  %v2633_v42 = vpop.f32.mrb[15].mxu0  ;;  %v2653_v43 = vpop.f32.mrb[15].mxu1  ;;  %v773_v46 = vmul.f32 0.5, %v772_v38 }
 0x255   :  { %3153 = vtanh.f32 %v773_v46 }
 0x25d   :  { %v3152_v50 = vpop.eup %3151 }
 0x25e   :  { %v778_v52 = vmul.f32 %v3152_v50, %v611_v49 }
 0x25f   :  { %v3154_v54 = vpop.eup %3153 }
 0x260   :  { %v3673_v53 = vadd.f32 %v778_v52, %v777_v51  ;;  %v775_v55 = vadd.f32 1.0, %v3154_v54 }
 0x262   :  { %3155 = vtanh.f32 %v3673_v53  ;;  %v776_v56 = vmul.f32 0.5, %v775_v55 }
 0x26c   :  { %v3156_v12 = vpop.eup %3155 }
 0x26d   :  { %v781_v27 = vmul.f32 %v3156_v12, %v776_v56 }
 0x26f   :  { %v782_v28 = vpack.c.bf16 %v781_v27, %v781_v27 }
 0x271   :  { %2187 = vst [vmem:[%s4214_s2 + $0x4] sm:$0xf] %v782_v28  ;;  %2671 = vmatmul.mubr.bf16.vlgmr.msra.gmra.mrb[16].mxu0 %v782_v28  ;;  %2691 = vmatmul.mubr.bf16.vlgmr.msra.gmra.mrb[16].mxu1 %v782_v28 }
 0x272   :  { %2695 = vmatpush3.bf16.msra.mxu0 %v3477_v10  ;;  %2715 = vmatpush3.bf16.msra.mxu1 %v3480_v11 }
 0x273   :  { %2696 = vmatprep.subr.bf16.mxu0 %v3219_v59  ;;  %2716 = vmatprep.subr.bf16.mxu1 %v3219_v59 }
 0x274   :  { %2710 = vmatprep.mubr.msk.bf16.mxu0 %vm3220_vm0, %v3219_v59  ;;  %2730 = vmatprep.mubr.msk.bf16.mxu1 %vm3220_vm0, %v3219_v59 }
 0x276   :  { %2697 = vmatpush3.bf16.msra.mxu0 %v3485_v13  ;;  %2717 = vmatpush3.bf16.msra.mxu1 %v3488_v14 }
 0x277   :  { %2698 = vmatprep.subr.bf16.mxu0 %v3219_v59  ;;  %2718 = vmatprep.subr.bf16.mxu1 %v3219_v59 }
 0x27a   :  { %2699 = vmatpush3.bf16.msra.mxu0 %v3497_v15  ;;  %2719 = vmatpush3.bf16.msra.mxu1 %v3500_v16 }
 0x27b   :  { %2700 = vmatprep.subr.bf16.mxu0 %v3219_v59  ;;  %2720 = vmatprep.subr.bf16.mxu1 %v3219_v59 }
 0x27e   :  { %2701 = vmatpush3.bf16.msra.mxu0 %v3505_v17  ;;  %2721 = vmatpush3.bf16.msra.mxu1 %v3508_v18 }
 0x27f   :  { %2702 = vmatprep.subr.bf16.mxu0 %v3219_v59  ;;  %2722 = vmatprep.subr.bf16.mxu1 %v3219_v59 }
 0x282   :  { %2703 = vmatpush3.bf16.msra.mxu0 %v3513_v19  ;;  %2723 = vmatpush3.bf16.msra.mxu1 %v3516_v20 }
 0x283   :  { %2704 = vmatprep.subr.bf16.mxu0 %v3219_v59  ;;  %2724 = vmatprep.subr.bf16.mxu1 %v3219_v59 }
 0x286   :  { %2705 = vmatpush3.bf16.msra.mxu0 %v3521_v21  ;;  %2725 = vmatpush3.bf16.msra.mxu1 %v3524_v22 }
 0x287   :  { %2706 = vmatprep.subr.bf16.mxu0 %v3219_v59  ;;  %2726 = vmatprep.subr.bf16.mxu1 %v3219_v59 }
 0x28a   :  { %2707 = vmatpush3.bf16.msra.mxu0 %v3529_v23  ;;  %2727 = vmatpush3.bf16.msra.mxu1 %v3532_v24 }
 0x28b   :  { %2708 = vmatprep.subr.bf16.mxu0 %v3219_v59  ;;  %2728 = vmatprep.subr.bf16.mxu1 %v3219_v59 }
 0x28e   :  { %2709 = vmatpush3.bf16.msra.mxu0 %v3537_v25  ;;  %2729 = vmatpush3.bf16.msra.mxu1 %v3540_v26 }
 0x28f   :  { %2734 = vmatprep.subr.bf16.mxu0 %v3219_v59  ;;  %2754 = vmatprep.subr.bf16.mxu1 %v3219_v59 }
 0x291   :  { %2711 = vmatmul.mubr.bf16.vlgmr.msra.gmra.mrb[20].mxu0 %v782_v28  ;;  %2731 = vmatmul.mubr.bf16.vlgmr.msra.gmra.mrb[20].mxu1 %v782_v28 }
 0x292   :  { %2735 = vmatpush3.bf16.msra.mxu0 %v3408_v57  ;;  %2755 = vmatpush3.bf16.msra.mxu1 %v3410_v58 }
 0x293   :  { %2736 = vmatprep.subr.bf16.mxu0 %v3219_v59  ;;  %2756 = vmatprep.subr.bf16.mxu1 %v3219_v59 }
 0x294   :  { %2750 = vmatprep.mubr.msk.bf16.mxu0 %vm3220_vm0, %v3219_v59  ;;  %2770 = vmatprep.mubr.msk.bf16.mxu1 %vm3220_vm0, %v3219_v59 }
 0x296   :  { %2737 = vmatpush3.bf16.msra.mxu0 %v3417_v60  ;;  %2757 = vmatpush3.bf16.msra.mxu1 %v3420_v61 }
 0x297   :  { %2738 = vmatprep.subr.bf16.mxu0 %v3219_v59  ;;  %2758 = vmatprep.subr.bf16.mxu1 %v3219_v59 }
 0x29a   :  { %2739 = vmatpush3.bf16.msra.mxu0 %v3429_v62  ;;  %2759 = vmatpush3.bf16.msra.mxu1 %v3432_v63 }
 0x29b   :  { %2740 = vmatprep.subr.bf16.mxu0 %v3219_v59  ;;  %2760 = vmatprep.subr.bf16.mxu1 %v3219_v59 }
 0x29e   :  { %2741 = vmatpush3.bf16.msra.mxu0 %v3437_v0  ;;  %2761 = vmatpush3.bf16.msra.mxu1 %v3440_v1 }
 0x29f   :  { %2742 = vmatprep.subr.bf16.mxu0 %v3219_v59  ;;  %2762 = vmatprep.subr.bf16.mxu1 %v3219_v59 }
 0x2a2   :  { %2743 = vmatpush3.bf16.msra.mxu0 %v3445_v2  ;;  %2763 = vmatpush3.bf16.msra.mxu1 %v3448_v3  ;;  %v2188_v2 = vld [vmem:[%s4212_s0 + $0x20] sm:$0xff] }
 0x2a3   :  { %2744 = vmatprep.subr.bf16.mxu0 %v3219_v59  ;;  %2764 = vmatprep.subr.bf16.mxu1 %v3219_v59  ;;  %v851_v3 = vrot.slane %v2188_v2, 4 }
 0x2a6   :  { %2745 = vmatpush3.bf16.msra.mxu0 %v3453_v4  ;;  %2765 = vmatpush3.bf16.msra.mxu1 %v3456_v5  ;;  %v853_v4 = vunpack.c.l.bf16 %v851_v3  ;;  %v796_v5 = vunpack.c.l.bf16 %v2188_v2  ;;  %v2191_v2 = vld [vmem:[%s4212_s0 + $0x30] sm:$0xff] }
 0x2a7   :  { %2746 = vmatprep.subr.bf16.mxu0 %v3219_v59  ;;  %2766 = vmatprep.subr.bf16.mxu1 %v3219_v59  ;;  %v1081_v3 = vrot.slane %v2191_v2, 4 }
 0x2aa   :  { %2747 = vmatpush3.bf16.msra.mxu0 %v3461_v6  ;;  %2767 = vmatpush3.bf16.msra.mxu1 %v3464_v7 }
 0x2ab   :  { %2748 = vmatprep.subr.bf16.mxu0 %v3219_v59  ;;  %2768 = vmatprep.subr.bf16.mxu1 %v3219_v59 }
 0x2ae   :  { %2749 = vmatpush3.bf16.msra.mxu0 %v3469_v8  ;;  %2769 = vmatpush3.bf16.msra.mxu1 %v3472_v9 }
 0x2af   :  { %2774 = vmatprep.subr.bf16.mxu0 %v3219_v59  ;;  %2794 = vmatprep.subr.bf16.mxu1 %v3219_v59 }
 0x344   :  { %v831_v57 = vpop.f32.mrb[16].mxu0  ;;  %v888_v58 = vpop.f32.mrb[16].mxu1 }
 0x345   :  { %v2672_v60 = vpop.f32.mrb[17].mxu0  ;;  %v2692_v61 = vpop.f32.mrb[17].mxu1  ;;  %v894_v6 = vadd.f32 %v888_v58, %v853_v4  ;;  %v837_v7 = vadd.f32 %v831_v57, %v796_v5  ;;  %v1083_v4 = vunpack.c.l.bf16 %v1081_v3  ;;  %v1026_v5 = vunpack.c.l.bf16 %v2191_v2  ;;  %v3917_v2 = vld [vmem:[#allocation2 + $0x90] sm:$0xff]  ;;  %v3919_v3 = vld [vmem:[#allocation2 + $0x98] sm:$0xff] }
 0x346   :  { %v834_v62 = vpop.f32.mrb[18].mxu0  ;;  %v891_v63 = vpop.f32.mrb[18].mxu1 }
 0x347   :  { %v2673_v0 = vpop.f32.mrb[19].mxu0  ;;  %v2693_v1 = vpop.f32.mrb[19].mxu1  ;;  %v895_v8 = vmul.f32 0.5, %v894_v6  ;;  %v838_v9 = vmul.f32 0.5, %v837_v7 }
 0x349   :  { %3157 = vtanh.f32 %v895_v8 }
 0x34a   :  { %3159 = vtanh.f32 %v838_v9 }
 0x353   :  { %v3158_v41 = vpop.eup %3157 }
 0x354   :  { %v3160_v44 = vpop.eup %3159  ;;  %v897_v45 = vadd.f32 1.0, %v3158_v41 }
 0x355   :  { %v840_v47 = vadd.f32 1.0, %v3160_v44 }
 0x356   :  { %v898_v48 = vmul.f32 0.5, %v897_v45 }
 0x357   :  { %v841_v49 = vmul.f32 0.5, %v840_v47 }
 0x358   :  { %v1007_v51 = vmul.f32 %v898_v48, %v3673_v53 }
 0x364   :  { %v942_v32 = vpop.f32.mrb[20].mxu0  ;;  %v996_v33 = vpop.f32.mrb[20].mxu1 }
 0x365   :  { %v948_v34 = vadd.f32 %v942_v32, %v907_v30  ;;  %v2712_v35 = vpop.f32.mrb[21].mxu0  ;;  %v2732_v37 = vpop.f32.mrb[21].mxu1  ;;  %v1002_v38 = vadd.f32 %v996_v33, %v961_v31  ;;  %v1137_v30 = vunpack.c.l.bf16 %v2192_v36  ;;  %v1191_v31 = vunpack.c.l.bf16 %v1189_v29 }
 0x366   :  { %v945_v39 = vpop.f32.mrb[22].mxu0  ;;  %v999_v40 = vpop.f32.mrb[22].mxu1 }
 0x367   :  { %3161 = vtanh.f32 %v948_v34  ;;  %v2713_v42 = vpop.f32.mrb[23].mxu0  ;;  %v2733_v43 = vpop.f32.mrb[23].mxu1  ;;  %v1003_v46 = vmul.f32 0.5, %v1002_v38 }
 0x369   :  { %3163 = vtanh.f32 %v1003_v46 }
 0x371   :  { %v3162_v50 = vpop.eup %3161 }
 0x372   :  { %v1008_v52 = vmul.f32 %v3162_v50, %v841_v49 }
 0x373   :  { %v3164_v55 = vpop.eup %3163 }
 0x374   :  { %v3758_v54 = vadd.f32 %v1008_v52, %v1007_v51  ;;  %v1005_v56 = vadd.f32 1.0, %v3164_v55 }
 0x376   :  { %3165 = vtanh.f32 %v3758_v54  ;;  %v1006_v12 = vmul.f32 0.5, %v1005_v56 }
 0x380   :  { %v3166_v27 = vpop.eup %3165 }
 0x381   :  { %v1011_v28 = vmul.f32 %v3166_v27, %v1006_v12 }
 0x383   :  { %v1012_v57 = vpack.c.bf16 %v1011_v28, %v1011_v28 }
 0x385   :  { %2190 = vst [vmem:[%s4214_s2 + $0x8] sm:$0xf] %v1012_v57  ;;  %2751 = vmatmul.mubr.bf16.vlgmr.msra.gmra.mrb[24].mxu0 %v1012_v57  ;;  %2771 = vmatmul.mubr.bf16.vlgmr.msra.gmra.mrb[24].mxu1 %v1012_v57 }
 0x386   :  { %2775 = vmatpush3.bf16.msra.mxu0 %v3477_v10  ;;  %2795 = vmatpush3.bf16.msra.mxu1 %v3480_v11  ;;  %v3804_v10 = vld [vmem:[#allocation2] sm:$0xff]  ;;  %v3806_v11 = vld [vmem:[#allocation2 + $0x8] sm:$0xff] }
 0x387   :  { %2776 = vmatprep.subr.bf16.mxu0 %v3219_v59  ;;  %2796 = vmatprep.subr.bf16.mxu1 %v3219_v59 }
 0x388   :  { %2790 = vmatprep.mubr.msk.bf16.mxu0 %vm3220_vm0, %v3219_v59  ;;  %2810 = vmatprep.mubr.msk.bf16.mxu1 %vm3220_vm0, %v3219_v59 }
 0x38a   :  { %2777 = vmatpush3.bf16.msra.mxu0 %v3485_v13  ;;  %2797 = vmatpush3.bf16.msra.mxu1 %v3488_v14  ;;  %v3812_v13 = vld [vmem:[#allocation2 + $0x20] sm:$0xff]  ;;  %v3814_v14 = vld [vmem:[#allocation2 + $0x28] sm:$0xff] }
 0x38b   :  { %2778 = vmatprep.subr.bf16.mxu0 %v3219_v59  ;;  %2798 = vmatprep.subr.bf16.mxu1 %v3219_v59 }
 0x38e   :  { %2779 = vmatpush3.bf16.msra.mxu0 %v3497_v15  ;;  %2799 = vmatpush3.bf16.msra.mxu1 %v3500_v16  ;;  %v3820_v15 = vld [vmem:[#allocation2 + $0x40] sm:$0xff]  ;;  %v3822_v16 = vld [vmem:[#allocation2 + $0x48] sm:$0xff] }
 0x38f   :  { %2780 = vmatprep.subr.bf16.mxu0 %v3219_v59  ;;  %2800 = vmatprep.subr.bf16.mxu1 %v3219_v59 }
 0x392   :  { %2781 = vmatpush3.bf16.msra.mxu0 %v3505_v17  ;;  %2801 = vmatpush3.bf16.msra.mxu1 %v3508_v18  ;;  %v3828_v17 = vld [vmem:[#allocation2 + $0x60] sm:$0xff]  ;;  %v3830_v18 = vld [vmem:[#allocation2 + $0x68] sm:$0xff] }
 0x393   :  { %2782 = vmatprep.subr.bf16.mxu0 %v3219_v59  ;;  %2802 = vmatprep.subr.bf16.mxu1 %v3219_v59 }
 0x396   :  { %2783 = vmatpush3.bf16.msra.mxu0 %v3513_v19  ;;  %2803 = vmatpush3.bf16.msra.mxu1 %v3516_v20  ;;  %v3836_v19 = vld [vmem:[#allocation2 + $0x80] sm:$0xff]  ;;  %v3838_v20 = vld [vmem:[#allocation2 + $0x88] sm:$0xff] }
 0x397   :  { %2784 = vmatprep.subr.bf16.mxu0 %v3219_v59  ;;  %2804 = vmatprep.subr.bf16.mxu1 %v3219_v59 }
 0x39a   :  { %2785 = vmatpush3.bf16.msra.mxu0 %v3521_v21  ;;  %2805 = vmatpush3.bf16.msra.mxu1 %v3524_v22  ;;  %v3844_v21 = vld [vmem:[#allocation2 + $0xa0] sm:$0xff]  ;;  %v3846_v22 = vld [vmem:[#allocation2 + $0xa8] sm:$0xff] }
 0x39b   :  { %2786 = vmatprep.subr.bf16.mxu0 %v3219_v59  ;;  %2806 = vmatprep.subr.bf16.mxu1 %v3219_v59 }
 0x39e   :  { %2787 = vmatpush3.bf16.msra.mxu0 %v3529_v23  ;;  %2807 = vmatpush3.bf16.msra.mxu1 %v3532_v24  ;;  %v3852_v23 = vld [vmem:[#allocation2 + $0xc0] sm:$0xff]  ;;  %v3854_v24 = vld [vmem:[#allocation2 + $0xc8] sm:$0xff] }
 0x39f   :  { %2788 = vmatprep.subr.bf16.mxu0 %v3219_v59  ;;  %2808 = vmatprep.subr.bf16.mxu1 %v3219_v59 }
 0x3a2   :  { %2789 = vmatpush3.bf16.msra.mxu0 %v3537_v25  ;;  %2809 = vmatpush3.bf16.msra.mxu1 %v3540_v26  ;;  %v3860_v25 = vld [vmem:[#allocation2 + $0xe0] sm:$0xff]  ;;  %v3862_v26 = vld [vmem:[#allocation2 + $0xe8] sm:$0xff] }
 0x3a3   :  { %2814 = vmatprep.subr.bf16.mxu0 %v3219_v59  ;;  %2834 = vmatprep.subr.bf16.mxu1 %v3219_v59 }
 0x3a5   :  { %2791 = vmatmul.mubr.bf16.vlgmr.msra.gmra.mrb[28].mxu0 %v1012_v57  ;;  %2811 = vmatmul.mubr.bf16.vlgmr.msra.gmra.mrb[28].mxu1 %v1012_v57 }
 0x3a6   :  { %2830 = vmatprep.mubr.msk.bf16.mxu0 %vm3220_vm0, %v3219_v59  ;;  %2850 = vmatprep.mubr.msk.bf16.mxu1 %vm3220_vm0, %v3219_v59 }
 0x3a7   :  { %2815 = vmatpush3.bf16.msra.mxu0 %v3804_v10  ;;  %2835 = vmatpush3.bf16.msra.mxu1 %v3806_v11 }
 0x3a8   :  { %2816 = vmatprep.subr.bf16.mxu0 %v3219_v59  ;;  %2836 = vmatprep.subr.bf16.mxu1 %v3219_v59 }
 0x3ab   :  { %2817 = vmatpush3.bf16.msra.mxu0 %v3812_v13  ;;  %2837 = vmatpush3.bf16.msra.mxu1 %v3814_v14 }
 0x3ac   :  { %2818 = vmatprep.subr.bf16.mxu0 %v3219_v59  ;;  %2838 = vmatprep.subr.bf16.mxu1 %v3219_v59 }
 0x3af   :  { %2819 = vmatpush3.bf16.msra.mxu0 %v3820_v15  ;;  %2839 = vmatpush3.bf16.msra.mxu1 %v3822_v16 }
 0x3b0   :  { %2820 = vmatprep.subr.bf16.mxu0 %v3219_v59  ;;  %2840 = vmatprep.subr.bf16.mxu1 %v3219_v59 }
 0x3b3   :  { %2821 = vmatpush3.bf16.msra.mxu0 %v3828_v17  ;;  %2841 = vmatpush3.bf16.msra.mxu1 %v3830_v18 }
 0x3b4   :  { %2822 = vmatprep.subr.bf16.mxu0 %v3219_v59  ;;  %2842 = vmatprep.subr.bf16.mxu1 %v3219_v59 }
 0x3b7   :  { %2823 = vmatpush3.bf16.msra.mxu0 %v3836_v19  ;;  %2843 = vmatpush3.bf16.msra.mxu1 %v3838_v20 }
 0x3b8   :  { %2824 = vmatprep.subr.bf16.mxu0 %v3219_v59  ;;  %2844 = vmatprep.subr.bf16.mxu1 %v3219_v59 }
 0x3bb   :  { %2825 = vmatpush3.bf16.msra.mxu0 %v3844_v21  ;;  %2845 = vmatpush3.bf16.msra.mxu1 %v3846_v22 }
 0x3bc   :  { %2826 = vmatprep.subr.bf16.mxu0 %v3219_v59  ;;  %2846 = vmatprep.subr.bf16.mxu1 %v3219_v59 }
 0x3bf   :  { %2827 = vmatpush3.bf16.msra.mxu0 %v3852_v23  ;;  %2847 = vmatpush3.bf16.msra.mxu1 %v3854_v24 }
 0x3c0   :  { %2828 = vmatprep.subr.bf16.mxu0 %v3219_v59  ;;  %2848 = vmatprep.subr.bf16.mxu1 %v3219_v59 }
 0x3c3   :  { %2829 = vmatpush3.bf16.msra.mxu0 %v3860_v25  ;;  %2849 = vmatpush3.bf16.msra.mxu1 %v3862_v26 }
 0x3c4   :  { %2854 = vmatprep.subr.bf16.mxu0 %v3219_v59  ;;  %2874 = vmatprep.subr.bf16.mxu1 %v3219_v59 }
 0x458   :  { %v1061_v53 = vpop.f32.mrb[24].mxu0  ;;  %v1118_v58 = vpop.f32.mrb[24].mxu1 }
 0x459   :  { %v2752_v60 = vpop.f32.mrb[25].mxu0  ;;  %v2772_v61 = vpop.f32.mrb[25].mxu1  ;;  %v1124_v6 = vadd.f32 %v1118_v58, %v1083_v4  ;;  %v1067_v7 = vadd.f32 %v1061_v53, %v1026_v5  ;;  %v3878_v58 = vld [vmem:[#allocation2 + $0x10] sm:$0xff]  ;;  %v3927_v5 = vld [vmem:[#allocation2 + $0xb8] sm:$0xff] }
 0x45a   :  { %v1064_v62 = vpop.f32.mrb[26].mxu0  ;;  %v1121_v63 = vpop.f32.mrb[26].mxu1  ;;  %v3880_v60 = vld [vmem:[#allocation2 + $0x18] sm:$0xff]  ;;  %v3925_v4 = vld [vmem:[#allocation2 + $0xb0] sm:$0xff] }
 0x45b   :  { %v2753_v0 = vpop.f32.mrb[27].mxu0  ;;  %v2773_v1 = vpop.f32.mrb[27].mxu1  ;;  %v1125_v8 = vmul.f32 0.5, %v1124_v6  ;;  %v1068_v9 = vmul.f32 0.5, %v1067_v7  ;;  %v3891_v61 = vld [vmem:[#allocation2 + $0x38] sm:$0xff]  ;;  %v3901_v62 = vld [vmem:[#allocation2 + $0x50] sm:$0xff] }
 0x45c   :  { %v3903_v63 = vld [vmem:[#allocation2 + $0x58] sm:$0xff]  ;;  %v3909_v0 = vld [vmem:[#allocation2 + $0x70] sm:$0xff] }
 0x45d   :  { %3167 = vtanh.f32 %v1125_v8  ;;  %v3911_v1 = vld [vmem:[#allocation2 + $0x78] sm:$0xff]  ;;  %v3933_v6 = vld [vmem:[#allocation2 + $0xd0] sm:$0xff] }
 0x45e   :  { %3169 = vtanh.f32 %v1068_v9  ;;  %v3935_v7 = vld [vmem:[#allocation2 + $0xd8] sm:$0xff]  ;;  %v3941_v8 = vld [vmem:[#allocation2 + $0xf0] sm:$0xff] }
 0x45f   :  { %v3943_v9 = vld [vmem:[#allocation2 + $0xf8] sm:$0xff] }
 0x467   :  { %v3168_v41 = vpop.eup %3167 }
 0x468   :  { %v3170_v44 = vpop.eup %3169  ;;  %v1127_v45 = vadd.f32 1.0, %v3168_v41 }
 0x469   :  { %v1070_v47 = vadd.f32 1.0, %v3170_v44 }
 0x46a   :  { %v1128_v48 = vmul.f32 0.5, %v1127_v45  ;;  %v2195_v45 = vld [vmem:[%s4212_s0 + $0x48] sm:$0xff] }
 0x46b   :  { %v1071_v49 = vmul.f32 0.5, %v1070_v47  ;;  %v1367_v47 = vunpack.c.l.bf16 %v2195_v45 }
 0x46c   :  { %v1237_v51 = vmul.f32 %v1128_v48, %v3758_v54  ;;  %v3889_v54 = vld [vmem:[#allocation2 + $0x30] sm:$0xff] }
 0x478   :  { %v1172_v32 = vpop.f32.mrb[28].mxu0  ;;  %v1226_v33 = vpop.f32.mrb[28].mxu1 }
 0x479   :  { %v1178_v34 = vadd.f32 %v1172_v32, %v1137_v30  ;;  %v2792_v35 = vpop.f32.mrb[29].mxu0  ;;  %v2812_v37 = vpop.f32.mrb[29].mxu1  ;;  %v1232_v38 = vadd.f32 %v1226_v33, %v1191_v31 }
 0x47a   :  { %v1175_v39 = vpop.f32.mrb[30].mxu0  ;;  %v1229_v40 = vpop.f32.mrb[30].mxu1  ;;  %v2194_v37 = vld [vmem:[%s4212_s0 + $0x40] sm:$0xff] }
 0x47b   :  { %3171 = vtanh.f32 %v1178_v34  ;;  %v2793_v42 = vpop.f32.mrb[31].mxu0  ;;  %v2813_v43 = vpop.f32.mrb[31].mxu1  ;;  %v1233_v46 = vmul.f32 0.5, %v1232_v38  ;;  %v1311_v38 = vrot.slane %v2194_v37, 4  ;;  %v1256_v40 = vunpack.c.l.bf16 %v2194_v37 }
 0x47d   :  { %3173 = vtanh.f32 %v1233_v46  ;;  %v1313_v39 = vunpack.c.l.bf16 %v1311_v38  ;;  %v1419_v46 = vrot.slane %v2195_v45, 4 }
 0x47f   :  { %v1421_v48 = vunpack.c.l.bf16 %v1419_v46 }
 0x485   :  { %v3172_v50 = vpop.eup %3171 }
 0x486   :  { %v1238_v52 = vmul.f32 %v3172_v50, %v1071_v49 }
 0x487   :  { %v3174_v56 = vpop.eup %3173 }
 0x488   :  { %v3875_v55 = vadd.f32 %v1238_v52, %v1237_v51  ;;  %v1235_v12 = vadd.f32 1.0, %v3174_v56 }
 0x48a   :  { %3175 = vtanh.f32 %v3875_v55  ;;  %v1236_v27 = vmul.f32 0.5, %v1235_v12 }
 0x494   :  { %v3176_v28 = vpop.eup %3175 }
 0x495   :  { %v1241_v57 = vmul.f32 %v3176_v28, %v1236_v27 }
 0x497   :  { %v1242_v53 = vpack.c.bf16 %v1241_v57, %v1241_v57 }
 0x499   :  { %2193 = vst [vmem:[%s4214_s2 + $0xc] sm:$0xf] %v1242_v53  ;;  %2831 = vmatmul.mubr.bf16.vlgmr.msra.gmra.mrb[32].mxu0 %v1242_v53  ;;  %2851 = vmatmul.mubr.bf16.vlgmr.msra.gmra.mrb[32].mxu1 %v1242_v53 }
 0x49a   :  { %2855 = vmatpush3.bf16.msra.mxu0 %v3878_v58  ;;  %2875 = vmatpush3.bf16.msra.mxu1 %v3880_v60 }
 0x49b   :  { %2856 = vmatprep.subr.bf16.mxu0 %v3219_v59  ;;  %2876 = vmatprep.subr.bf16.mxu1 %v3219_v59 }
 0x49c   :  { %2870 = vmatprep.mubr.msk.bf16.mxu0 %vm3220_vm0, %v3219_v59  ;;  %2890 = vmatprep.mubr.msk.bf16.mxu1 %vm3220_vm0, %v3219_v59 }
 0x49e   :  { %2857 = vmatpush3.bf16.msra.mxu0 %v3889_v54  ;;  %2877 = vmatpush3.bf16.msra.mxu1 %v3891_v61 }
 0x49f   :  { %2858 = vmatprep.subr.bf16.mxu0 %v3219_v59  ;;  %2878 = vmatprep.subr.bf16.mxu1 %v3219_v59 }
 0x4a2   :  { %2859 = vmatpush3.bf16.msra.mxu0 %v3901_v62  ;;  %2879 = vmatpush3.bf16.msra.mxu1 %v3903_v63 }
 0x4a3   :  { %2860 = vmatprep.subr.bf16.mxu0 %v3219_v59  ;;  %2880 = vmatprep.subr.bf16.mxu1 %v3219_v59 }
 0x4a6   :  { %2861 = vmatpush3.bf16.msra.mxu0 %v3909_v0  ;;  %2881 = vmatpush3.bf16.msra.mxu1 %v3911_v1 }
 0x4a7   :  { %2862 = vmatprep.subr.bf16.mxu0 %v3219_v59  ;;  %2882 = vmatprep.subr.bf16.mxu1 %v3219_v59 }
 0x4aa   :  { %2863 = vmatpush3.bf16.msra.mxu0 %v3917_v2  ;;  %2883 = vmatpush3.bf16.msra.mxu1 %v3919_v3 }
 0x4ab   :  { %2864 = vmatprep.subr.bf16.mxu0 %v3219_v59  ;;  %2884 = vmatprep.subr.bf16.mxu1 %v3219_v59 }
 0x4ae   :  { %2865 = vmatpush3.bf16.msra.mxu0 %v3925_v4  ;;  %2885 = vmatpush3.bf16.msra.mxu1 %v3927_v5 }
 0x4af   :  { %2866 = vmatprep.subr.bf16.mxu0 %v3219_v59  ;;  %2886 = vmatprep.subr.bf16.mxu1 %v3219_v59 }
 0x4b2   :  { %2867 = vmatpush3.bf16.msra.mxu0 %v3933_v6  ;;  %2887 = vmatpush3.bf16.msra.mxu1 %v3935_v7 }
 0x4b3   :  { %2868 = vmatprep.subr.bf16.mxu0 %v3219_v59  ;;  %2888 = vmatprep.subr.bf16.mxu1 %v3219_v59 }
 0x4b6   :  { %2869 = vmatpush3.bf16.msra.mxu0 %v3941_v8  ;;  %2889 = vmatpush3.bf16.msra.mxu1 %v3943_v9 }
 0x4b7   :  { %2894 = vmatprep.subr.bf16.mxu0 %v3219_v59  ;;  %2914 = vmatprep.subr.bf16.mxu1 %v3219_v59 }
 0x4b9   :  { %2871 = vmatmul.mubr.bf16.vlgmr.msra.gmra.mrb[36].mxu0 %v1242_v53  ;;  %2891 = vmatmul.mubr.bf16.vlgmr.msra.gmra.mrb[36].mxu1 %v1242_v53 }
 0x4ba   :  { %2895 = vmatpush3.bf16.msra.mxu0 %v3804_v10  ;;  %2915 = vmatpush3.bf16.msra.mxu1 %v3806_v11 }
 0x4bb   :  { %2896 = vmatprep.subr.bf16.mxu0 %v3219_v59  ;;  %2916 = vmatprep.subr.bf16.mxu1 %v3219_v59 }
 0x4bc   :  { %2910 = vmatprep.mubr.msk.bf16.mxu0 %vm3220_vm0, %v3219_v59  ;;  %2930 = vmatprep.mubr.msk.bf16.mxu1 %vm3220_vm0, %v3219_v59 }
 0x4be   :  { %2897 = vmatpush3.bf16.msra.mxu0 %v3812_v13  ;;  %2917 = vmatpush3.bf16.msra.mxu1 %v3814_v14 }
 0x4bf   :  { %2898 = vmatprep.subr.bf16.mxu0 %v3219_v59  ;;  %2918 = vmatprep.subr.bf16.mxu1 %v3219_v59 }
 0x4c2   :  { %2899 = vmatpush3.bf16.msra.mxu0 %v3820_v15  ;;  %2919 = vmatpush3.bf16.msra.mxu1 %v3822_v16 }
 0x4c3   :  { %2900 = vmatprep.subr.bf16.mxu0 %v3219_v59  ;;  %2920 = vmatprep.subr.bf16.mxu1 %v3219_v59 }
 0x4c6   :  { %2901 = vmatpush3.bf16.msra.mxu0 %v3828_v17  ;;  %2921 = vmatpush3.bf16.msra.mxu1 %v3830_v18 }
 0x4c7   :  { %2902 = vmatprep.subr.bf16.mxu0 %v3219_v59  ;;  %2922 = vmatprep.subr.bf16.mxu1 %v3219_v59 }
 0x4ca   :  { %2903 = vmatpush3.bf16.msra.mxu0 %v3836_v19  ;;  %2923 = vmatpush3.bf16.msra.mxu1 %v3838_v20 }
 0x4cb   :  { %2904 = vmatprep.subr.bf16.mxu0 %v3219_v59  ;;  %2924 = vmatprep.subr.bf16.mxu1 %v3219_v59 }
 0x4ce   :  { %2905 = vmatpush3.bf16.msra.mxu0 %v3844_v21  ;;  %2925 = vmatpush3.bf16.msra.mxu1 %v3846_v22 }
 0x4cf   :  { %2906 = vmatprep.subr.bf16.mxu0 %v3219_v59  ;;  %2926 = vmatprep.subr.bf16.mxu1 %v3219_v59 }
 0x4d2   :  { %2907 = vmatpush3.bf16.msra.mxu0 %v3852_v23  ;;  %2927 = vmatpush3.bf16.msra.mxu1 %v3854_v24 }
 0x4d3   :  { %2908 = vmatprep.subr.bf16.mxu0 %v3219_v59  ;;  %2928 = vmatprep.subr.bf16.mxu1 %v3219_v59 }
 0x4d6   :  { %2909 = vmatpush3.bf16.msra.mxu0 %v3860_v25  ;;  %2929 = vmatpush3.bf16.msra.mxu1 %v3862_v26 }
 0x4d7   :  { %2934 = vmatprep.subr.bf16.mxu0 %v3219_v59  ;;  %2954 = vmatprep.subr.bf16.mxu1 %v3219_v59 }
 0x56c   :  { %v1291_v36 = vpop.f32.mrb[32].mxu0  ;;  %v1348_v29 = vpop.f32.mrb[32].mxu1 }
 0x56d   :  { %v2832_v30 = vpop.f32.mrb[33].mxu0  ;;  %v2852_v31 = vpop.f32.mrb[33].mxu1  ;;  %v1354_v41 = vadd.f32 %v1348_v29, %v1313_v39  ;;  %v1297_v42 = vadd.f32 %v1291_v36, %v1256_v40 }
 0x56e   :  { %v1294_v32 = vpop.f32.mrb[34].mxu0  ;;  %v1351_v33 = vpop.f32.mrb[34].mxu1 }
 0x56f   :  { %v2833_v34 = vpop.f32.mrb[35].mxu0  ;;  %v2853_v35 = vpop.f32.mrb[35].mxu1  ;;  %v1355_v43 = vmul.f32 0.5, %v1354_v41  ;;  %v1298_v44 = vmul.f32 0.5, %v1297_v42 }
 0x571   :  { %3177 = vtanh.f32 %v1355_v43 }
 0x572   :  { %3179 = vtanh.f32 %v1298_v44 }
 0x57b   :  { %v3178_v57 = vpop.eup %3177 }
 0x57c   :  { %v3180_v29 = vpop.eup %3179  ;;  %v1357_v30 = vadd.f32 1.0, %v3178_v57 }
 0x57d   :  { %v1300_v32 = vadd.f32 1.0, %v3180_v29 }
 0x57e   :  { %v1358_v33 = vmul.f32 0.5, %v1357_v30  ;;  %v2198_v30 = vld [vmem:[%s4212_s0 + $0x58] sm:$0xff] }
 0x57f   :  { %v1301_v34 = vmul.f32 0.5, %v1300_v32  ;;  %v1597_v32 = vunpack.c.l.bf16 %v2198_v30 }
 0x580   :  { %v1467_v37 = vmul.f32 %v1358_v33, %v3875_v55 }
 0x58c   :  { %v1402_v49 = vpop.f32.mrb[36].mxu0  ;;  %v1456_v50 = vpop.f32.mrb[36].mxu1 }
 0x58d   :  { %v1408_v51 = vadd.f32 %v1402_v49, %v1367_v47  ;;  %v2872_v52 = vpop.f32.mrb[37].mxu0  ;;  %v2892_v56 = vpop.f32.mrb[37].mxu1  ;;  %v1462_v12 = vadd.f32 %v1456_v50, %v1421_v48 }
 0x58e   :  { %v1405_v27 = vpop.f32.mrb[38].mxu0  ;;  %v1459_v28 = vpop.f32.mrb[38].mxu1  ;;  %v2197_v56 = vld [vmem:[%s4212_s0 + $0x50] sm:$0xff] }
 0x58f   :  { %3181 = vtanh.f32 %v1408_v51  ;;  %v2873_v53 = vpop.f32.mrb[39].mxu0  ;;  %v2893_v36 = vpop.f32.mrb[39].mxu1  ;;  %v1463_v31 = vmul.f32 0.5, %v1462_v12  ;;  %v1541_v12 = vrot.slane %v2197_v56, 4  ;;  %v1486_v28 = vunpack.c.l.bf16 %v2197_v56 }
 0x591   :  { %3183 = vtanh.f32 %v1463_v31  ;;  %v1543_v27 = vunpack.c.l.bf16 %v1541_v12  ;;  %v1649_v31 = vrot.slane %v2198_v30, 4 }
 0x593   :  { %v1651_v33 = vunpack.c.l.bf16 %v1649_v31 }
 0x599   :  { %v3182_v35 = vpop.eup %3181 }
 0x59a   :  { %v1468_v38 = vmul.f32 %v3182_v35, %v1301_v34 }
 0x59b   :  { %v3184_v40 = vpop.eup %3183 }
 0x59c   :  { %v3992_v39 = vadd.f32 %v1468_v38, %v1467_v37  ;;  %v1465_v41 = vadd.f32 1.0, %v3184_v40 }
 0x59e   :  { %3185 = vtanh.f32 %v3992_v39  ;;  %v1466_v42 = vmul.f32 0.5, %v1465_v41 }
 0x5a8   :  { %v3186_v43 = vpop.eup %3185 }
 0x5a9   :  { %v1471_v44 = vmul.f32 %v3186_v43, %v1466_v42 }
 0x5ab   :  { %v1472_v45 = vpack.c.bf16 %v1471_v44, %v1471_v44 }
 0x5ad   :  { %2196 = vst [vmem:[%s4214_s2 + $0x10] sm:$0xf] %v1472_v45  ;;  %2911 = vmatmul.mubr.bf16.vlgmr.msra.gmra.mrb[40].mxu0 %v1472_v45  ;;  %2931 = vmatmul.mubr.bf16.vlgmr.msra.gmra.mrb[40].mxu1 %v1472_v45 }
 0x5ae   :  { %2935 = vmatpush3.bf16.msra.mxu0 %v3878_v58  ;;  %2955 = vmatpush3.bf16.msra.mxu1 %v3880_v60 }
 0x5af   :  { %2936 = vmatprep.subr.bf16.mxu0 %v3219_v59  ;;  %2956 = vmatprep.subr.bf16.mxu1 %v3219_v59 }
 0x5b0   :  { %2950 = vmatprep.mubr.msk.bf16.mxu0 %vm3220_vm0, %v3219_v59  ;;  %2970 = vmatprep.mubr.msk.bf16.mxu1 %vm3220_vm0, %v3219_v59 }
 0x5b2   :  { %2937 = vmatpush3.bf16.msra.mxu0 %v3889_v54  ;;  %2957 = vmatpush3.bf16.msra.mxu1 %v3891_v61 }
 0x5b3   :  { %2938 = vmatprep.subr.bf16.mxu0 %v3219_v59  ;;  %2958 = vmatprep.subr.bf16.mxu1 %v3219_v59 }
 0x5b6   :  { %2939 = vmatpush3.bf16.msra.mxu0 %v3901_v62  ;;  %2959 = vmatpush3.bf16.msra.mxu1 %v3903_v63 }
 0x5b7   :  { %2940 = vmatprep.subr.bf16.mxu0 %v3219_v59  ;;  %2960 = vmatprep.subr.bf16.mxu1 %v3219_v59 }
 0x5ba   :  { %2941 = vmatpush3.bf16.msra.mxu0 %v3909_v0  ;;  %2961 = vmatpush3.bf16.msra.mxu1 %v3911_v1 }
 0x5bb   :  { %2942 = vmatprep.subr.bf16.mxu0 %v3219_v59  ;;  %2962 = vmatprep.subr.bf16.mxu1 %v3219_v59 }
 0x5be   :  { %2943 = vmatpush3.bf16.msra.mxu0 %v3917_v2  ;;  %2963 = vmatpush3.bf16.msra.mxu1 %v3919_v3 }
 0x5bf   :  { %2944 = vmatprep.subr.bf16.mxu0 %v3219_v59  ;;  %2964 = vmatprep.subr.bf16.mxu1 %v3219_v59 }
 0x5c2   :  { %2945 = vmatpush3.bf16.msra.mxu0 %v3925_v4  ;;  %2965 = vmatpush3.bf16.msra.mxu1 %v3927_v5 }
 0x5c3   :  { %2946 = vmatprep.subr.bf16.mxu0 %v3219_v59  ;;  %2966 = vmatprep.subr.bf16.mxu1 %v3219_v59 }
 0x5c6   :  { %2947 = vmatpush3.bf16.msra.mxu0 %v3933_v6  ;;  %2967 = vmatpush3.bf16.msra.mxu1 %v3935_v7 }
 0x5c7   :  { %2948 = vmatprep.subr.bf16.mxu0 %v3219_v59  ;;  %2968 = vmatprep.subr.bf16.mxu1 %v3219_v59 }
 0x5ca   :  { %2949 = vmatpush3.bf16.msra.mxu0 %v3941_v8  ;;  %2969 = vmatpush3.bf16.msra.mxu1 %v3943_v9 }
 0x5cb   :  { %2974 = vmatprep.subr.bf16.mxu0 %v3219_v59  ;;  %2994 = vmatprep.subr.bf16.mxu1 %v3219_v59 }
 0x5cd   :  { %2951 = vmatmul.mubr.bf16.vlgmr.msra.gmra.mrb[44].mxu0 %v1472_v45  ;;  %2971 = vmatmul.mubr.bf16.vlgmr.msra.gmra.mrb[44].mxu1 %v1472_v45 }
 0x5ce   :  { %2975 = vmatpush3.bf16.msra.mxu0 %v3804_v10  ;;  %2995 = vmatpush3.bf16.msra.mxu1 %v3806_v11 }
 0x5cf   :  { %2976 = vmatprep.subr.bf16.mxu0 %v3219_v59  ;;  %2996 = vmatprep.subr.bf16.mxu1 %v3219_v59 }
 0x5d0   :  { %2990 = vmatprep.mubr.msk.bf16.mxu0 %vm3220_vm0, %v3219_v59  ;;  %3010 = vmatprep.mubr.msk.bf16.mxu1 %vm3220_vm0, %v3219_v59 }
 0x5d2   :  { %2977 = vmatpush3.bf16.msra.mxu0 %v3812_v13  ;;  %2997 = vmatpush3.bf16.msra.mxu1 %v3814_v14 }
 0x5d3   :  { %2978 = vmatprep.subr.bf16.mxu0 %v3219_v59  ;;  %2998 = vmatprep.subr.bf16.mxu1 %v3219_v59 }
 0x5d6   :  { %2979 = vmatpush3.bf16.msra.mxu0 %v3820_v15  ;;  %2999 = vmatpush3.bf16.msra.mxu1 %v3822_v16 }
 0x5d7   :  { %2980 = vmatprep.subr.bf16.mxu0 %v3219_v59  ;;  %3000 = vmatprep.subr.bf16.mxu1 %v3219_v59 }
 0x5da   :  { %2981 = vmatpush3.bf16.msra.mxu0 %v3828_v17  ;;  %3001 = vmatpush3.bf16.msra.mxu1 %v3830_v18 }
 0x5db   :  { %2982 = vmatprep.subr.bf16.mxu0 %v3219_v59  ;;  %3002 = vmatprep.subr.bf16.mxu1 %v3219_v59 }
 0x5de   :  { %2983 = vmatpush3.bf16.msra.mxu0 %v3836_v19  ;;  %3003 = vmatpush3.bf16.msra.mxu1 %v3838_v20 }
 0x5df   :  { %2984 = vmatprep.subr.bf16.mxu0 %v3219_v59  ;;  %3004 = vmatprep.subr.bf16.mxu1 %v3219_v59 }
 0x5e2   :  { %2985 = vmatpush3.bf16.msra.mxu0 %v3844_v21  ;;  %3005 = vmatpush3.bf16.msra.mxu1 %v3846_v22 }
 0x5e3   :  { %2986 = vmatprep.subr.bf16.mxu0 %v3219_v59  ;;  %3006 = vmatprep.subr.bf16.mxu1 %v3219_v59 }
 0x5e6   :  { %2987 = vmatpush3.bf16.msra.mxu0 %v3852_v23  ;;  %3007 = vmatpush3.bf16.msra.mxu1 %v3854_v24 }
 0x5e7   :  { %2988 = vmatprep.subr.bf16.mxu0 %v3219_v59  ;;  %3008 = vmatprep.subr.bf16.mxu1 %v3219_v59 }
 0x5ea   :  { %2989 = vmatpush3.bf16.msra.mxu0 %v3860_v25  ;;  %3009 = vmatpush3.bf16.msra.mxu1 %v3862_v26 }
 0x5eb   :  { %3014 = vmatprep.subr.bf16.mxu0 %v3219_v59  ;;  %3034 = vmatprep.subr.bf16.mxu1 %v3219_v59 }
 0x680   :  { %v1521_v55 = vpop.f32.mrb[40].mxu0  ;;  %v1578_v46 = vpop.f32.mrb[40].mxu1 }
 0x681   :  { %v2912_v47 = vpop.f32.mrb[41].mxu0  ;;  %v2932_v48 = vpop.f32.mrb[41].mxu1  ;;  %v1584_v57 = vadd.f32 %v1578_v46, %v1543_v27  ;;  %v1527_v53 = vadd.f32 %v1521_v55, %v1486_v28 }
 0x682   :  { %v1524_v49 = vpop.f32.mrb[42].mxu0  ;;  %v1581_v50 = vpop.f32.mrb[42].mxu1 }
 0x683   :  { %v2913_v51 = vpop.f32.mrb[43].mxu0  ;;  %v2933_v52 = vpop.f32.mrb[43].mxu1  ;;  %v1585_v36 = vmul.f32 0.5, %v1584_v57  ;;  %v1528_v29 = vmul.f32 0.5, %v1527_v53 }
 0x685   :  { %3187 = vtanh.f32 %v1585_v36 }
 0x686   :  { %3189 = vtanh.f32 %v1528_v29 }
 0x68f   :  { %v3188_v44 = vpop.eup %3187 }
 0x690   :  { %v3190_v46 = vpop.eup %3189  ;;  %v1587_v47 = vadd.f32 1.0, %v3188_v44 }
 0x691   :  { %v1530_v49 = vadd.f32 1.0, %v3190_v46 }
 0x692   :  { %v1588_v50 = vmul.f32 0.5, %v1587_v47 }
 0x693   :  { %v1531_v51 = vmul.f32 0.5, %v1530_v49 }
 0x694   :  { %v1697_v56 = vmul.f32 %v1588_v50, %v3992_v39  ;;  %v2201_v39 = vld [vmem:[%s4212_s0 + $0x68] sm:$0xff] }
 0x695   :  { %v1879_v31 = vrot.slane %v2201_v39, 4 }
 0x6a0   :  { %v1632_v34 = vpop.f32.mrb[44].mxu0  ;;  %v1686_v35 = vpop.f32.mrb[44].mxu1 }
 0x6a1   :  { %v1638_v37 = vadd.f32 %v1632_v34, %v1597_v32  ;;  %v2952_v38 = vpop.f32.mrb[45].mxu0  ;;  %v2972_v40 = vpop.f32.mrb[45].mxu1  ;;  %v1692_v41 = vadd.f32 %v1686_v35, %v1651_v33  ;;  %v1827_v32 = vunpack.c.l.bf16 %v2201_v39  ;;  %v1881_v33 = vunpack.c.l.bf16 %v1879_v31 }
 0x6a2   :  { %v1635_v42 = vpop.f32.mrb[46].mxu0  ;;  %v1689_v43 = vpop.f32.mrb[46].mxu1 }
 0x6a3   :  { %3191 = vtanh.f32 %v1638_v37  ;;  %v2953_v45 = vpop.f32.mrb[47].mxu0  ;;  %v2973_v55 = vpop.f32.mrb[47].mxu1  ;;  %v1693_v48 = vmul.f32 0.5, %v1692_v41 }
 0x6a5   :  { %3193 = vtanh.f32 %v1693_v48 }
 0x6ad   :  { %v3192_v52 = vpop.eup %3191 }
 0x6ae   :  { %v1698_v12 = vmul.f32 %v3192_v52, %v1531_v51 }
 0x6af   :  { %v3194_v28 = vpop.eup %3193 }
 0x6b0   :  { %v4077_v27 = vadd.f32 %v1698_v12, %v1697_v56  ;;  %v1695_v57 = vadd.f32 1.0, %v3194_v28 }
 0x6b2   :  { %3195 = vtanh.f32 %v4077_v27  ;;  %v1696_v53 = vmul.f32 0.5, %v1695_v57 }
 0x6bc   :  { %v3196_v36 = vpop.eup %3195 }
 0x6bd   :  { %v1701_v29 = vmul.f32 %v3196_v36, %v1696_v53 }
 0x6bf   :  { %v1702_v30 = vpack.c.bf16 %v1701_v29, %v1701_v29 }
 0x6c1   :  { %2199 = vst [vmem:[%s4214_s2 + $0x14] sm:$0xf] %v1702_v30  ;;  %2991 = vmatmul.mubr.bf16.vlgmr.msra.gmra.mrb[48].mxu0 %v1702_v30  ;;  %3011 = vmatmul.mubr.bf16.vlgmr.msra.gmra.mrb[48].mxu1 %v1702_v30 }
 0x6c2   :  { %3015 = vmatpush3.bf16.msra.mxu0 %v3878_v58  ;;  %3035 = vmatpush3.bf16.msra.mxu1 %v3880_v60 }
 0x6c3   :  { %3016 = vmatprep.subr.bf16.mxu0 %v3219_v59  ;;  %3036 = vmatprep.subr.bf16.mxu1 %v3219_v59 }
 0x6c4   :  { %3030 = vmatprep.mubr.msk.bf16.mxu0 %vm3220_vm0, %v3219_v59  ;;  %3050 = vmatprep.mubr.msk.bf16.mxu1 %vm3220_vm0, %v3219_v59 }
 0x6c6   :  { %3017 = vmatpush3.bf16.msra.mxu0 %v3889_v54  ;;  %3037 = vmatpush3.bf16.msra.mxu1 %v3891_v61 }
 0x6c7   :  { %3018 = vmatprep.subr.bf16.mxu0 %v3219_v59  ;;  %3038 = vmatprep.subr.bf16.mxu1 %v3219_v59 }
 0x6ca   :  { %3019 = vmatpush3.bf16.msra.mxu0 %v3901_v62  ;;  %3039 = vmatpush3.bf16.msra.mxu1 %v3903_v63 }
 0x6cb   :  { %3020 = vmatprep.subr.bf16.mxu0 %v3219_v59  ;;  %3040 = vmatprep.subr.bf16.mxu1 %v3219_v59 }
 0x6ce   :  { %3021 = vmatpush3.bf16.msra.mxu0 %v3909_v0  ;;  %3041 = vmatpush3.bf16.msra.mxu1 %v3911_v1 }
 0x6cf   :  { %3022 = vmatprep.subr.bf16.mxu0 %v3219_v59  ;;  %3042 = vmatprep.subr.bf16.mxu1 %v3219_v59 }
 0x6d2   :  { %3023 = vmatpush3.bf16.msra.mxu0 %v3917_v2  ;;  %3043 = vmatpush3.bf16.msra.mxu1 %v3919_v3 }
 0x6d3   :  { %3024 = vmatprep.subr.bf16.mxu0 %v3219_v59  ;;  %3044 = vmatprep.subr.bf16.mxu1 %v3219_v59 }
 0x6d6   :  { %3025 = vmatpush3.bf16.msra.mxu0 %v3925_v4  ;;  %3045 = vmatpush3.bf16.msra.mxu1 %v3927_v5 }
 0x6d7   :  { %3026 = vmatprep.subr.bf16.mxu0 %v3219_v59  ;;  %3046 = vmatprep.subr.bf16.mxu1 %v3219_v59 }
 0x6da   :  { %3027 = vmatpush3.bf16.msra.mxu0 %v3933_v6  ;;  %3047 = vmatpush3.bf16.msra.mxu1 %v3935_v7 }
 0x6db   :  { %3028 = vmatprep.subr.bf16.mxu0 %v3219_v59  ;;  %3048 = vmatprep.subr.bf16.mxu1 %v3219_v59 }
 0x6de   :  { %3029 = vmatpush3.bf16.msra.mxu0 %v3941_v8  ;;  %3049 = vmatpush3.bf16.msra.mxu1 %v3943_v9 }
 0x6df   :  { %3054 = vmatprep.subr.bf16.mxu0 %v3219_v59  ;;  %3074 = vmatprep.subr.bf16.mxu1 %v3219_v59 }
 0x6e1   :  { %3031 = vmatmul.mubr.bf16.vlgmr.msra.gmra.mrb[52].mxu0 %v1702_v30  ;;  %3051 = vmatmul.mubr.bf16.vlgmr.msra.gmra.mrb[52].mxu1 %v1702_v30 }
 0x6e2   :  { %3055 = vmatpush3.bf16.msra.mxu0 %v3804_v10  ;;  %3075 = vmatpush3.bf16.msra.mxu1 %v3806_v11 }
 0x6e3   :  { %3056 = vmatprep.subr.bf16.mxu0 %v3219_v59  ;;  %3076 = vmatprep.subr.bf16.mxu1 %v3219_v59 }
 0x6e4   :  { %3070 = vmatprep.mubr.msk.bf16.mxu0 %vm3220_vm0, %v3219_v59  ;;  %3090 = vmatprep.mubr.msk.bf16.mxu1 %vm3220_vm0, %v3219_v59 }
 0x6e6   :  { %3057 = vmatpush3.bf16.msra.mxu0 %v3812_v13  ;;  %3077 = vmatpush3.bf16.msra.mxu1 %v3814_v14 }
 0x6e7   :  { %3058 = vmatprep.subr.bf16.mxu0 %v3219_v59  ;;  %3078 = vmatprep.subr.bf16.mxu1 %v3219_v59 }
 0x6ea   :  { %3059 = vmatpush3.bf16.msra.mxu0 %v3820_v15  ;;  %3079 = vmatpush3.bf16.msra.mxu1 %v3822_v16 }
 0x6eb   :  { %3060 = vmatprep.subr.bf16.mxu0 %v3219_v59  ;;  %3080 = vmatprep.subr.bf16.mxu1 %v3219_v59 }
 0x6ee   :  { %3061 = vmatpush3.bf16.msra.mxu0 %v3828_v17  ;;  %3081 = vmatpush3.bf16.msra.mxu1 %v3830_v18 }
 0x6ef   :  { %3062 = vmatprep.subr.bf16.mxu0 %v3219_v59  ;;  %3082 = vmatprep.subr.bf16.mxu1 %v3219_v59 }
 0x6f2   :  { %3063 = vmatpush3.bf16.msra.mxu0 %v3836_v19  ;;  %3083 = vmatpush3.bf16.msra.mxu1 %v3838_v20  ;;  %v2200_v19 = vld [vmem:[%s4212_s0 + $0x60] sm:$0xff] }
 0x6f3   :  { %3064 = vmatprep.subr.bf16.mxu0 %v3219_v59  ;;  %3084 = vmatprep.subr.bf16.mxu1 %v3219_v59  ;;  %v1771_v20 = vrot.slane %v2200_v19, 4 }
 0x6f6   :  { %3065 = vmatpush3.bf16.msra.mxu0 %v3844_v21  ;;  %3085 = vmatpush3.bf16.msra.mxu1 %v3846_v22  ;;  %v1773_v21 = vunpack.c.l.bf16 %v1771_v20  ;;  %v1716_v22 = vunpack.c.l.bf16 %v2200_v19 }
 0x6f7   :  { %3066 = vmatprep.subr.bf16.mxu0 %v3219_v59  ;;  %3086 = vmatprep.subr.bf16.mxu1 %v3219_v59 }
 0x6fa   :  { %3067 = vmatpush3.bf16.msra.mxu0 %v3852_v23  ;;  %3087 = vmatpush3.bf16.msra.mxu1 %v3854_v24 }
 0x6fb   :  { %3068 = vmatprep.subr.bf16.mxu0 %v3219_v59  ;;  %3088 = vmatprep.subr.bf16.mxu1 %v3219_v59 }
 0x6fe   :  { %3069 = vmatpush3.bf16.msra.mxu0 %v3860_v25  ;;  %3089 = vmatpush3.bf16.msra.mxu1 %v3862_v26 }
 0x6ff   :  { %3094 = vmatprep.subr.bf16.mxu0 %v3219_v59  ;;  %3114 = vmatprep.subr.bf16.mxu1 %v3219_v59 }
 0x794   :  { %v1751_v10 = vpop.f32.mrb[48].mxu0  ;;  %v1808_v11 = vpop.f32.mrb[48].mxu1 }
 0x795   :  { %v2992_v13 = vpop.f32.mrb[49].mxu0  ;;  %v3012_v14 = vpop.f32.mrb[49].mxu1  ;;  %v1814_v23 = vadd.f32 %v1808_v11, %v1773_v21  ;;  %v1757_v24 = vadd.f32 %v1751_v10, %v1716_v22 }
 0x796   :  { %v1754_v15 = vpop.f32.mrb[50].mxu0  ;;  %v1811_v16 = vpop.f32.mrb[50].mxu1 }
 0x797   :  { %v2993_v17 = vpop.f32.mrb[51].mxu0  ;;  %v3013_v18 = vpop.f32.mrb[51].mxu1  ;;  %v1815_v25 = vmul.f32 0.5, %v1814_v23  ;;  %v1758_v26 = vmul.f32 0.5, %v1757_v24 }
 0x799   :  { %3197 = vtanh.f32 %v1815_v25 }
 0x79a   :  { %3199 = vtanh.f32 %v1758_v26 }
 0x7a3   :  { %v3198_v44 = vpop.eup %3197 }
 0x7a4   :  { %v3200_v46 = vpop.eup %3199  ;;  %v1817_v47 = vadd.f32 1.0, %v3198_v44 }
 0x7a5   :  { %v1760_v49 = vadd.f32 1.0, %v3200_v46 }
 0x7a6   :  { %v1818_v50 = vmul.f32 0.5, %v1817_v47 }
 0x7a7   :  { %v1761_v51 = vmul.f32 0.5, %v1760_v49 }
 0x7a8   :  { %v1927_v56 = vmul.f32 %v1818_v50, %v4077_v27 }
 0x7b4   :  { %v1862_v34 = vpop.f32.mrb[52].mxu0  ;;  %v1916_v35 = vpop.f32.mrb[52].mxu1 }
 0x7b5   :  { %v1868_v37 = vadd.f32 %v1862_v34, %v1827_v32  ;;  %v3032_v38 = vpop.f32.mrb[53].mxu0  ;;  %v3052_v40 = vpop.f32.mrb[53].mxu1  ;;  %v1922_v41 = vadd.f32 %v1916_v35, %v1881_v33 }
 0x7b6   :  { %v1865_v42 = vpop.f32.mrb[54].mxu0  ;;  %v1919_v43 = vpop.f32.mrb[54].mxu1 }
 0x7b7   :  { %3201 = vtanh.f32 %v1868_v37  ;;  %v3033_v45 = vpop.f32.mrb[55].mxu0  ;;  %v3053_v55 = vpop.f32.mrb[55].mxu1  ;;  %v1923_v48 = vmul.f32 0.5, %v1922_v41 }
 0x7b9   :  { %3203 = vtanh.f32 %v1923_v48 }
 0x7c1   :  { %v3202_v52 = vpop.eup %3201 }
 0x7c2   :  { %v1928_v12 = vmul.f32 %v3202_v52, %v1761_v51 }
 0x7c3   :  { %v3204_v57 = vpop.eup %3203 }
 0x7c4   :  { %v4162_v28 = vadd.f32 %v1928_v12, %v1927_v56  ;;  %v1925_v53 = vadd.f32 1.0, %v3204_v57 }
 0x7c6   :  { %3205 = vtanh.f32 %v4162_v28  ;;  %v1926_v36 = vmul.f32 0.5, %v1925_v53 }
 0x7d0   :  { %v3206_v29 = vpop.eup %3205 }
 0x7d1   :  { %v1931_v30 = vmul.f32 %v3206_v29, %v1926_v36 }
 0x7d3   :  { %v1932_v10 = vpack.c.bf16 %v1931_v30, %v1931_v30 }
 0x7d5   :  { %2202 = vst [vmem:[%s4214_s2 + $0x18] sm:$0xf] %v1932_v10  ;;  %3071 = vmatmul.mubr.bf16.vlgmr.msra.gmra.mrb[56].mxu0 %v1932_v10  ;;  %3091 = vmatmul.mubr.bf16.vlgmr.msra.gmra.mrb[56].mxu1 %v1932_v10 }
 0x7d6   :  { %3095 = vmatpush3.bf16.msra.mxu0 %v3878_v58  ;;  %3115 = vmatpush3.bf16.msra.mxu1 %v3880_v60 }
 0x7d7   :  { %3096 = vmatprep.subr.bf16.mxu0 %v3219_v59  ;;  %3116 = vmatprep.subr.bf16.mxu1 %v3219_v59 }
 0x7d8   :  { %3110 = vmatprep.mubr.msk.bf16.mxu0 %vm3220_vm0, %v3219_v59  ;;  %3130 = vmatprep.mubr.msk.bf16.mxu1 %vm3220_vm0, %v3219_v59 }
 0x7da   :  { %3097 = vmatpush3.bf16.msra.mxu0 %v3889_v54  ;;  %3117 = vmatpush3.bf16.msra.mxu1 %v3891_v61 }
 0x7db   :  { %3098 = vmatprep.subr.bf16.mxu0 %v3219_v59  ;;  %3118 = vmatprep.subr.bf16.mxu1 %v3219_v59 }
 0x7de   :  { %3099 = vmatpush3.bf16.msra.mxu0 %v3901_v62  ;;  %3119 = vmatpush3.bf16.msra.mxu1 %v3903_v63 }
 0x7df   :  { %3100 = vmatprep.subr.bf16.mxu0 %v3219_v59  ;;  %3120 = vmatprep.subr.bf16.mxu1 %v3219_v59 }
 0x7e2   :  { %3101 = vmatpush3.bf16.msra.mxu0 %v3909_v0  ;;  %3121 = vmatpush3.bf16.msra.mxu1 %v3911_v1 }
 0x7e3   :  { %3102 = vmatprep.subr.bf16.mxu0 %v3219_v59  ;;  %3122 = vmatprep.subr.bf16.mxu1 %v3219_v59 }
 0x7e6   :  { %3103 = vmatpush3.bf16.msra.mxu0 %v3917_v2  ;;  %3123 = vmatpush3.bf16.msra.mxu1 %v3919_v3  ;;  %v2203_v2 = vld [vmem:[%s4212_s0 + $0x70] sm:$0xff] }
 0x7e7   :  { %3104 = vmatprep.subr.bf16.mxu0 %v3219_v59  ;;  %3124 = vmatprep.subr.bf16.mxu1 %v3219_v59  ;;  %v2001_v3 = vrot.slane %v2203_v2, 4 }
 0x7ea   :  { %3105 = vmatpush3.bf16.msra.mxu0 %v3925_v4  ;;  %3125 = vmatpush3.bf16.msra.mxu1 %v3927_v5  ;;  %v1946_v4 = vunpack.c.l.bf16 %v2203_v2 }
 0x7eb   :  { %3106 = vmatprep.subr.bf16.mxu0 %v3219_v59  ;;  %3126 = vmatprep.subr.bf16.mxu1 %v3219_v59 }
 0x7ee   :  { %3107 = vmatpush3.bf16.msra.mxu0 %v3933_v6  ;;  %3127 = vmatpush3.bf16.msra.mxu1 %v3935_v7 }
 0x7ef   :  { %3108 = vmatprep.subr.bf16.mxu0 %v3219_v59  ;;  %3128 = vmatprep.subr.bf16.mxu1 %v3219_v59  ;;  %v2003_v59 = vunpack.c.l.bf16 %v2001_v3 }
 0x7f2   :  { %3109 = vmatpush3.bf16.msra.mxu0 %v3941_v8  ;;  %3129 = vmatpush3.bf16.msra.mxu1 %v3943_v9  ;;  %v2204_v9 = vld [vmem:[%s4212_s0 + $0x78] sm:$0xff] }
 0x7f3   :  { %v2109_v27 = vrot.slane %v2204_v9, 4  ;;  %v2057_v11 = vunpack.c.l.bf16 %v2204_v9 }
 0x7f5   :  { %3111 = vmatmul.mubr.bf16.vlgmr.msra.gmra.mrb[60].mxu0 %v1932_v10  ;;  %3131 = vmatmul.mubr.bf16.vlgmr.msra.gmra.mrb[60].mxu1 %v1932_v10  ;;  %v2111_v13 = vunpack.c.l.bf16 %v2109_v27 }
 0x8a8   :  { %v1981_v58 = vpop.f32.mrb[56].mxu0  ;;  %v2038_v60 = vpop.f32.mrb[56].mxu1 }
 0x8a9   :  { %v3072_v54 = vpop.f32.mrb[57].mxu0  ;;  %v3092_v61 = vpop.f32.mrb[57].mxu1  ;;  %v2044_v5 = vadd.f32 %v2038_v60, %v2003_v59  ;;  %v1987_v6 = vadd.f32 %v1981_v58, %v1946_v4 }
 0x8aa   :  { %v1984_v62 = vpop.f32.mrb[58].mxu0  ;;  %v2041_v63 = vpop.f32.mrb[58].mxu1 }
 0x8ab   :  { %v3073_v0 = vpop.f32.mrb[59].mxu0  ;;  %v3093_v1 = vpop.f32.mrb[59].mxu1  ;;  %v2045_v7 = vmul.f32 0.5, %v2044_v5  ;;  %v1988_v8 = vmul.f32 0.5, %v1987_v6 }
 0x8ad   :  { %3207 = vtanh.f32 %v2045_v7 }
 0x8ae   :  { %3209 = vtanh.f32 %v1988_v8 }
 0x8b7   :  { %v3208_v22 = vpop.eup %3207 }
 0x8b8   :  { %v3210_v25 = vpop.eup %3209  ;;  %v2047_v26 = vadd.f32 1.0, %v3208_v22 }
 0x8b9   :  { %v1990_v31 = vadd.f32 1.0, %v3210_v25 }
 0x8ba   :  { %v2048_v32 = vmul.f32 0.5, %v2047_v26 }
 0x8bb   :  { %v1991_v33 = vmul.f32 0.5, %v1990_v31 }
 0x8bc   :  { %v2157_v35 = vmul.f32 %v2048_v32, %v4162_v28 }
 0x8c8   :  { %v2092_v14 = vpop.f32.mrb[60].mxu0  ;;  %v2146_v15 = vpop.f32.mrb[60].mxu1 }
 0x8c9   :  { %v2098_v16 = vadd.f32 %v2092_v14, %v2057_v11  ;;  %v3112_v17 = vpop.f32.mrb[61].mxu0  ;;  %v3132_v18 = vpop.f32.mrb[61].mxu1  ;;  %v2152_v19 = vadd.f32 %v2146_v15, %v2111_v13 }
 0x8ca   :  { %v2095_v20 = vpop.f32.mrb[62].mxu0  ;;  %v2149_v21 = vpop.f32.mrb[62].mxu1 }
 0x8cb   :  { %3211 = vtanh.f32 %v2098_v16  ;;  %v3113_v23 = vpop.f32.mrb[63].mxu0  ;;  %v3133_v24 = vpop.f32.mrb[63].mxu1  ;;  %v2153_v39 = vmul.f32 0.5, %v2152_v19 }
 0x8cd   :  { %3213 = vtanh.f32 %v2153_v39 }
 0x8d5   :  { %v3212_v34 = vpop.eup %3211 }
 0x8d6   :  { %v2158_v37 = vmul.f32 %v3212_v34, %v1991_v33 }
 0x8d7   :  { %v3214_v40 = vpop.eup %3213 }
 0x8d8   :  { %v2159_v38 = vadd.f32 %v2158_v37, %v2157_v35  ;;  %v2155_v41 = vadd.f32 1.0, %v3214_v40 }
 0x8da   :  { %3215 = vtanh.f32 %v2159_v38  ;;  %v2156_v42 = vmul.f32 0.5, %v2155_v41 }
 0x8e4   :  { %v3216_v43 = vpop.eup %3215 }
 0x8e5   :  { %v2161_v44 = vmul.f32 %v3216_v43, %v2156_v42 }
 0x8e7   :  { %v2162_v45 = vpack.c.bf16 %v2161_v44, %v2161_v44 }
 0x8e9   :  { %2205 = vst [vmem:[%s4214_s2 + $0x1c] sm:$0xf] %v2162_v45 }

</bundles_post_ra>
